<compile_context>
chip_gen: v7x
topology: tpu7x:2x2x1
jax: 0.10.0
libtpu: 0.0.40
codegen_flags: <defaults>
</compile_context>

<pallas_src>
import functools

import jax
import jax.numpy as jnp
from jax import lax
from jax.experimental import pallas as pl
from jax.experimental.pallas import tpu as pltpu


def _round_up(v, mult):
    return ((v + mult - 1) // mult) * mult


# ----------------------------------------------------------------------------
# Fused Pallas kernel: conv1+relu -> conv2+relu -> conv3+relu -> fc4+relu -> fc5
# ----------------------------------------------------------------------------
def _fused_kernel(x_ref, w1_ref, b1_ref, w2_ref, b2_ref, w3_ref, b3_ref,
                  w4_ref, b4_ref, w5_ref, b5_ref, o_ref,
                  a1_ref, a2_ref, a3_ref, *, batch, board_h, fc_taps):
    R = batch * board_h          # rows of the image-stacked activation matrices

    # Zero scratch once so the shift-padding rows are well defined (finite).
    a1_ref[...] = jnp.zeros_like(a1_ref)
    a2_ref[...] = jnp.zeros_like(a2_ref)
    a3_ref[...] = jnp.zeros_like(a3_ref)

    def banded_conv_relu(in_ref, w_ref, b_ref, out_ref):
        # in_ref : (>= R+2, n*Cin)  activation matrix + zero pad rows
        # w_ref  : (3, n*Cin, n*Cout) banded weights, one per height tap ki
        # writes rows [0, R) of out_ref with relu(conv + bias)
        acc = jnp.dot(in_ref[0:R, :], w_ref[0],
                      preferred_element_type=jnp.float32)
        for ki in range(1, 3):
            acc = acc + jnp.dot(in_ref[ki:ki + R, :], w_ref[ki],
                                preferred_element_type=jnp.float32)
        out_ref[0:R, :] = jnp.maximum(acc + b_ref[...], 0.0)   # bias hoisted out of tap loop

    banded_conv_relu(x_ref, w1_ref, b1_ref, a1_ref)     # -> (R, n*8)
    banded_conv_relu(a1_ref, w2_ref, b2_ref, a2_ref)    # -> (R, n*16)
    banded_conv_relu(a2_ref, w3_ref, b3_ref, a3_ref)    # -> (R, n*16)

    # fc4: height taps folded into `fc_taps` row-shifted GEMMs.  The packed w4
    # already encodes PyTorch's NCHW flatten order, so no transpose is needed.
    acc = jnp.dot(a3_ref[0:R, :], w4_ref[0], preferred_element_type=jnp.float32)
    for i in range(1, fc_taps):
        acc = acc + jnp.dot(a3_ref[i:i + R, :], w4_ref[i],
                            preferred_element_type=jnp.float32)
    h4 = jnp.maximum(acc + b4_ref[...], 0.0)            # (R, 20); row b*board_h is image b

    logits = jnp.dot(h4, w5_ref[...],
                     preferred_element_type=jnp.float32) + b5_ref[...]   # (R, 128)
    for b in range(batch):                              # lane-dense (1, 128) stores
        o_ref[b:b + 1, :] = logits[b * board_h:b * board_h + 1, :]


# ----------------------------------------------------------------------------
# One-time parameter packing (PyTorch layout -> kernel GEMM / lane layout)
# ----------------------------------------------------------------------------
def pack_params(p, m, n, num_actions):
    W0 = n
    f32 = jnp.float32

    def band(w_oihw):
        # (Cout, Cin, 3, 3) -> (3, W0*Cin, W0*Cout) banded GEMM weights:
        # M[ki][jin*Cin+ci, j*Cout+co] = w[co, ci, ki, jin-j] for 0 <= jin-j <= 2.
        cout, cin, kh, kw = w_oihw.shape
        mats = []
        for ki in range(kh):
            mk = jnp.zeros((W0 * cin, W0 * cout), f32)
            for kj in range(kw):
                tap = jnp.transpose(w_oihw[:, :, ki, kj]).astype(f32)   # (cin, cout)
                mk = mk + jnp.kron(jnp.eye(W0, k=-kj, dtype=f32), tap)
            mats.append(mk)
        return jnp.stack(mats, axis=0)

    def conv_bias(b):
        return jnp.tile(b.astype(f32), (W0,)).reshape(1, -1)   # lane = j*Cout + co

    H3, W3 = m - 2 * 3, n - 2 * 3
    n_pad = _round_up(num_actions, 128)

    # fc4: torch weight (20, 16*H3*W3), flat NCHW input index = c*H3*W3 + i*W3 + j.
    w4 = p["w4"].astype(f32).reshape(20, 16, H3, W3)           # (o, c, i, j)
    w4 = jnp.transpose(w4, (2, 3, 1, 0))                       # (i, j, c, o)
    w4 = jnp.pad(w4, ((0, 0), (0, W0 - W3), (0, 0), (0, 0)))   # pad j -> W0 (zeros)
    w4 = w4.reshape(H3, W0 * 16, 20)                           # lane index = j*16 + c

    w5 = jnp.pad(p["w5"].astype(f32).T, ((0, 0), (0, n_pad - num_actions)))
    b5 = jnp.pad(p["b5"].astype(f32), (0, n_pad - num_actions)).reshape(1, n_pad)

    return {
        "w1": band(p["w1"]), "b1": conv_bias(p["b1"]),
        "w2": band(p["w2"]), "b2": conv_bias(p["b2"]),
        "w3": band(p["w3"]), "b3": conv_bias(p["b3"]),
        "w4": w4, "b4": p["b4"].astype(f32).reshape(1, 20),
        "w5": w5, "b5": b5,
        "m": m, "n": n, "num_actions": num_actions, "n_pad": n_pad,
    }


# ----------------------------------------------------------------------------
# Forward wrapper (single pallas_call, tiny layout-only glue outside)
# ----------------------------------------------------------------------------
def dqn_conv2_forward(x_nchw, packed):
    m, n = packed["m"], packed["n"]
    num_actions, n_pad = packed["num_actions"], packed["n_pad"]
    B = x_nchw.shape[0]
    R = B * m
    fc_taps = m - 2 * 3

    # Layout-only glue: (B,1,m,n) -> (B*m, n) row stack, + zero rows for the
    # in-kernel height shifts (row b*m + i, col j  ==  x[b, 0, i, j]).
    a0 = jnp.pad(x_nchw.astype(jnp.float32).reshape(R, n), ((0, 8), (0, 0)))

    args = (a0, packed["w1"], packed["b1"], packed["w2"], packed["b2"],
            packed["w3"], packed["b3"], packed["w4"], packed["b4"],
            packed["w5"], packed["b5"])

    flops = 2 * R * (3 * (n * 1) * (n * 8) + 3 * (n * 8) * (n * 16)
                     + 3 * (n * 16) * (n * 16) + fc_taps * (n * 16) * 20
                     + 20 * n_pad)
    bytes_accessed = sum(int(a.size) * 4 for a in args) + B * n_pad * 4

    kernel = functools.partial(_fused_kernel, batch=B, board_h=m, fc_taps=fc_taps)
    out_pad = pl.pallas_call(
        kernel,
        out_shape=jax.ShapeDtypeStruct((B, n_pad), jnp.float32),
        in_specs=[pl.BlockSpec(memory_space=pltpu.MemorySpace.VMEM)] * len(args),
        out_specs=pl.BlockSpec(memory_space=pltpu.MemorySpace.VMEM),
        scratch_shapes=[
            pltpu.VMEM((R + 8, n * 8), jnp.float32),                        # conv1 out
            pltpu.VMEM((R + 8, n * 16), jnp.float32),                       # conv2 out
            pltpu.VMEM((R + _round_up(fc_taps, 8), n * 16), jnp.float32),   # conv3 out
        ],
        cost_estimate=pl.CostEstimate(flops=flops, transcendentals=0,
                                      bytes_accessed=bytes_accessed),
    )(*args)
    # TODO(synk): if batch grows, add a grid over the row axis with
    # dimension_semantics=("parallel",) so both v7x TensorCores are used.
    return out_pad[:, :num_actions]


# ----------------------------------------------------------------------------
# Pure-JAX reference (NCHW, same semantics as the PyTorch module)
# ----------------------------------------------------------------------------
def dqn_conv2_reference(x_nchw, p):
    def conv(x, w, b):
        y = lax.conv_general_dilated(
            x, w, window_strides=(1, 1), padding="VALID",
            dimension_numbers=("NCHW", "OIHW", "NCHW"))
        return y + b.reshape(1, -1, 1, 1)

    h = jax.nn.relu(conv(x_nchw, p["w1"], p["b1"]))
    h = jax.nn.relu(conv(h, p["w2"], p["b2"]))
    h = jax.nn.relu(conv(h, p["w3"], p["b3"]))
    h = h.reshape(h.shape[0], -1)
    h = jax.nn.relu(h @ p["w4"].T + p["b4"])
    return h @ p["w5"].T + p["b5"]


# ----------------------------------------------------------------------------
# Deterministic parameter init + smoke test
# ----------------------------------------------------------------------------
def init_params(key, m, n, num_actions):
    ks = jax.random.split(key, 10)
    flat = 16 * (n - 2 * 3) * (m - 2 * 3)
    s = 0.05
    return {
        "w1": jax.random.normal(ks[0], (8, 1, 3, 3), jnp.float32) * s,
        "b1": jax.random.normal(ks[1], (8,), jnp.float32) * s,
        "w2": jax.random.normal(ks[2], (16, 8, 3, 3), jnp.float32) * s,
        "b2": jax.random.normal(ks[3], (16,), jnp.float32) * s,
        "w3": jax.random.normal(ks[4], (16, 16, 3, 3), jnp.float32) * s,
        "b3": jax.random.normal(ks[5], (16,), jnp.float32) * s,
        "w4": jax.random.normal(ks[6], (20, flat), jnp.float32) * s,
        "b4": jax.random.normal(ks[7], (20,), jnp.float32) * s,
        "w5": jax.random.normal(ks[8], (num_actions, 20), jnp.float32) * s,
        "b5": jax.random.normal(ks[9], (num_actions,), jnp.float32) * s,
    }


if __name__ == "__main__":
    m = n = 16          # board size
    num_actions = 4
    batch = 2

    key = jax.random.PRNGKey(0)
    k_x, k_p = jax.random.split(key)
    x = jax.random.normal(k_x, (batch, 1, m, n), jnp.float32)   # NCHW like PyTorch
    params = init_params(k_p, m, n, num_actions)

    packed = pack_params(params, m, n, num_actions)             # one-time weight repack
    fwd = jax.jit(lambda inp: dqn_conv2_forward(inp, packed))

    out = jax.block_until_ready(fwd(x))
    ref = jax.block_until_ready(dqn_conv2_reference(x, params))

    assert out.shape == (batch, num_actions), out.shape
    assert jnp.allclose(out, ref, rtol=5e-4, atol=5e-4), (
        f"max abs err = {jnp.max(jnp.abs(out - ref))}")

    print("KERNEL_OK")
</pallas_src>

<mosaic_0001>
module attributes {stable_mosaic.version = 11 : i64} {
  func.func @_fused_kernel(%arg0: memref<40x16xf32, #tpu.memory_space<vmem>>, %arg1: memref<3x16x128xf32, #tpu.memory_space<vmem>>, %arg2: memref<1x128xf32, #tpu.memory_space<vmem>>, %arg3: memref<3x128x256xf32, #tpu.memory_space<vmem>>, %arg4: memref<1x256xf32, #tpu.memory_space<vmem>>, %arg5: memref<3x256x256xf32, #tpu.memory_space<vmem>>, %arg6: memref<1x256xf32, #tpu.memory_space<vmem>>, %arg7: memref<10x256x20xf32, #tpu.memory_space<vmem>>, %arg8: memref<1x20xf32, #tpu.memory_space<vmem>>, %arg9: memref<20x128xf32, #tpu.memory_space<vmem>>, %arg10: memref<1x128xf32, #tpu.memory_space<vmem>>, %arg11: memref<2x128xf32, #tpu.memory_space<vmem>>, %arg12: memref<40x128xf32, #tpu.memory_space<vmem>>, %arg13: memref<40x256xf32, #tpu.memory_space<vmem>>, %arg14: memref<48x256xf32, #tpu.memory_space<vmem>>) attributes {dimension_semantics = [], scalar_prefetch = 0 : i64, scratch_operands = 3 : i64, tpu.core_type = #tpu.core_type<tc>} {
    %cst = arith.constant 0.000000e+00 : f32
    %0 = vector.broadcast %cst : f32 to vector<40x128xf32>
    %c0 = arith.constant 0 : index
    %c0_0 = arith.constant 0 : index
    %1 = vector.load %arg12[%c0, %c0_0] : memref<40x128xf32, #tpu.memory_space<vmem>>, vector<40x128xf32>
    tpu.vector_store %arg12[%c0, %c0_0], %0 {strides = array<i32>} : memref<40x128xf32, #tpu.memory_space<vmem>>, vector<40x128xf32>,
    %cst_1 = arith.constant 0.000000e+00 : f32
    %2 = vector.broadcast %cst_1 : f32 to vector<40x256xf32>
    %c0_2 = arith.constant 0 : index
    %c0_3 = arith.constant 0 : index
    %3 = vector.load %arg13[%c0_2, %c0_3] : memref<40x256xf32, #tpu.memory_space<vmem>>, vector<40x256xf32>
    tpu.vector_store %arg13[%c0_2, %c0_3], %2 {strides = array<i32>} : memref<40x256xf32, #tpu.memory_space<vmem>>, vector<40x256xf32>,
    %cst_4 = arith.constant 0.000000e+00 : f32
    %4 = vector.broadcast %cst_4 : f32 to vector<48x256xf32>
    %c0_5 = arith.constant 0 : index
    %c0_6 = arith.constant 0 : index
    %5 = vector.load %arg14[%c0_5, %c0_6] : memref<48x256xf32, #tpu.memory_space<vmem>>, vector<48x256xf32>
    tpu.vector_store %arg14[%c0_5, %c0_6], %4 {strides = array<i32>} : memref<48x256xf32, #tpu.memory_space<vmem>>, vector<48x256xf32>,
    %c0_7 = arith.constant 0 : index
    %c0_8 = arith.constant 0 : index
    %6 = vector.load %arg0[%c0_7, %c0_8] : memref<40x16xf32, #tpu.memory_space<vmem>>, vector<32x16xf32>
    %c0_9 = arith.constant 0 : index
    %c0_10 = arith.constant 0 : index
    %c0_11 = arith.constant 0 : index
    %7 = vector.load %arg1[%c0_9, %c0_10, %c0_11] : memref<3x16x128xf32, #tpu.memory_space<vmem>>, vector<1x16x128xf32>
    %8 = vector.shape_cast %7 : vector<1x16x128xf32> to vector<16x128xf32>
    %cst_12 = arith.constant dense<0.000000e+00> : vector<32x128xf32>
    %9 = tpu.matmul %6, %8, %cst_12 {dimension_numbers = #tpu.dot_dimension_numbers<[1], [0], [0], [1], [0, 0, 1, 1], [], []>} : vector<32x16xf32>, vector<16x128xf32>, vector<32x128xf32> -> vector<32x128xf32>
    %c1 = arith.constant 1 : index
    %c0_13 = arith.constant 0 : index
    %10 = vector.load %arg0[%c1, %c0_13] : memref<40x16xf32, #tpu.memory_space<vmem>>, vector<32x16xf32>
    %c1_14 = arith.constant 1 : index
    %c0_15 = arith.constant 0 : index
    %c0_16 = arith.constant 0 : index
    %11 = vector.load %arg1[%c1_14, %c0_15, %c0_16] : memref<3x16x128xf32, #tpu.memory_space<vmem>>, vector<1x16x128xf32>
    %12 = vector.shape_cast %11 : vector<1x16x128xf32> to vector<16x128xf32>
    %cst_17 = arith.constant dense<0.000000e+00> : vector<32x128xf32>
    %13 = tpu.matmul %10, %12, %cst_17 {dimension_numbers = #tpu.dot_dimension_numbers<[1], [0], [0], [1], [0, 0, 1, 1], [], []>} : vector<32x16xf32>, vector<16x128xf32>, vector<32x128xf32> -> vector<32x128xf32>
    %14 = arith.addf %9, %13 : vector<32x128xf32>
    %c2 = arith.constant 2 : index
    %c0_18 = arith.constant 0 : index
    %15 = vector.load %arg0[%c2, %c0_18] : memref<40x16xf32, #tpu.memory_space<vmem>>, vector<32x16xf32>
    %c2_19 = arith.constant 2 : index
    %c0_20 = arith.constant 0 : index
    %c0_21 = arith.constant 0 : index
    %16 = vector.load %arg1[%c2_19, %c0_20, %c0_21] : memref<3x16x128xf32, #tpu.memory_space<vmem>>, vector<1x16x128xf32>
    %17 = vector.shape_cast %16 : vector<1x16x128xf32> to vector<16x128xf32>
    %cst_22 = arith.constant dense<0.000000e+00> : vector<32x128xf32>
    %18 = tpu.matmul %15, %17, %cst_22 {dimension_numbers = #tpu.dot_dimension_numbers<[1], [0], [0], [1], [0, 0, 1, 1], [], []>} : vector<32x16xf32>, vector<16x128xf32>, vector<32x128xf32> -> vector<32x128xf32>
    %19 = arith.addf %14, %18 : vector<32x128xf32>
    %c0_23 = arith.constant 0 : index
    %c0_24 = arith.constant 0 : index
    %20 = vector.load %arg2[%c0_23, %c0_24] : memref<1x128xf32, #tpu.memory_space<vmem>>, vector<1x128xf32>
    %21 = vector.broadcast %20 : vector<1x128xf32> to vector<32x128xf32>
    %22 = arith.addf %19, %21 : vector<32x128xf32>
    %cst_25 = arith.constant 0.000000e+00 : f32
    %23 = vector.broadcast %cst_25 : f32 to vector<32x128xf32>
    %24 = arith.maximumf %22, %23 : vector<32x128xf32>
    %c0_26 = arith.constant 0 : index
    %c0_27 = arith.constant 0 : index
    %25 = vector.load %arg12[%c0_26, %c0_27] : memref<40x128xf32, #tpu.memory_space<vmem>>, vector<32x128xf32>
    tpu.vector_store %arg12[%c0_26, %c0_27], %24 {strides = array<i32>} : memref<40x128xf32, #tpu.memory_space<vmem>>, vector<32x128xf32>,
    %c0_28 = arith.constant 0 : index
    %c0_29 = arith.constant 0 : index
    %26 = vector.load %arg12[%c0_28, %c0_29] : memref<40x128xf32, #tpu.memory_space<vmem>>, vector<32x128xf32>
    %c0_30 = arith.constant 0 : index
    %c0_31 = arith.constant 0 : index
    %c0_32 = arith.constant 0 : index
    %27 = vector.load %arg3[%c0_30, %c0_31, %c0_32] : memref<3x128x256xf32, #tpu.memory_space<vmem>>, vector<1x128x256xf32>
    %28 = vector.shape_cast %27 : vector<1x128x256xf32> to vector<128x256xf32>
    %cst_33 = arith.constant dense<0.000000e+00> : vector<32x256xf32>
    %29 = tpu.matmul %26, %28, %cst_33 {dimension_numbers = #tpu.dot_dimension_numbers<[1], [0], [0], [1], [0, 0, 1, 1], [], []>} : vector<32x128xf32>, vector<128x256xf32>, vector<32x256xf32> -> vector<32x256xf32>
    %c1_34 = arith.constant 1 : index
    %c0_35 = arith.constant 0 : index
    %30 = vector.load %arg12[%c1_34, %c0_35] : memref<40x128xf32, #tpu.memory_space<vmem>>, vector<32x128xf32>
    %c1_36 = arith.constant 1 : index
    %c0_37 = arith.constant 0 : index
    %c0_38 = arith.constant 0 : index
    %31 = vector.load %arg3[%c1_36, %c0_37, %c0_38] : memref<3x128x256xf32, #tpu.memory_space<vmem>>, vector<1x128x256xf32>
    %32 = vector.shape_cast %31 : vector<1x128x256xf32> to vector<128x256xf32>
    %cst_39 = arith.constant dense<0.000000e+00> : vector<32x256xf32>
    %33 = tpu.matmul %30, %32, %cst_39 {dimension_numbers = #tpu.dot_dimension_numbers<[1], [0], [0], [1], [0, 0, 1, 1], [], []>} : vector<32x128xf32>, vector<128x256xf32>, vector<32x256xf32> -> vector<32x256xf32>
    %34 = arith.addf %29, %33 : vector<32x256xf32>
    %c2_40 = arith.constant 2 : index
    %c0_41 = arith.constant 0 : index
    %35 = vector.load %arg12[%c2_40, %c0_41] : memref<40x128xf32, #tpu.memory_space<vmem>>, vector<32x128xf32>
    %c2_42 = arith.constant 2 : index
    %c0_43 = arith.constant 0 : index
    %c0_44 = arith.constant 0 : index
    %36 = vector.load %arg3[%c2_42, %c0_43, %c0_44] : memref<3x128x256xf32, #tpu.memory_space<vmem>>, vector<1x128x256xf32>
    %37 = vector.shape_cast %36 : vector<1x128x256xf32> to vector<128x256xf32>
    %cst_45 = arith.constant dense<0.000000e+00> : vector<32x256xf32>
    %38 = tpu.matmul %35, %37, %cst_45 {dimension_numbers = #tpu.dot_dimension_numbers<[1], [0], [0], [1], [0, 0, 1, 1], [], []>} : vector<32x128xf32>, vector<128x256xf32>, vector<32x256xf32> -> vector<32x256xf32>
    %39 = arith.addf %34, %38 : vector<32x256xf32>
    %c0_46 = arith.constant 0 : index
    %c0_47 = arith.constant 0 : index
    %40 = vector.load %arg4[%c0_46, %c0_47] : memref<1x256xf32, #tpu.memory_space<vmem>>, vector<1x256xf32>
    %41 = vector.broadcast %40 : vector<1x256xf32> to vector<32x256xf32>
    %42 = arith.addf %39, %41 : vector<32x256xf32>
    %cst_48 = arith.constant 0.000000e+00 : f32
    %43 = vector.broadcast %cst_48 : f32 to vector<32x256xf32>
    %44 = arith.maximumf %42, %43 : vector<32x256xf32>
    %c0_49 = arith.constant 0 : index
    %c0_50 = arith.constant 0 : index
    %45 = vector.load %arg13[%c0_49, %c0_50] : memref<40x256xf32, #tpu.memory_space<vmem>>, vector<32x256xf32>
    tpu.vector_store %arg13[%c0_49, %c0_50], %44 {strides = array<i32>} : memref<40x256xf32, #tpu.memory_space<vmem>>, vector<32x256xf32>,
    %c0_51 = arith.constant 0 : index
    %c0_52 = arith.constant 0 : index
    %46 = vector.load %arg13[%c0_51, %c0_52] : memref<40x256xf32, #tpu.memory_space<vmem>>, vector<32x256xf32>
    %c0_53 = arith.constant 0 : index
    %c0_54 = arith.constant 0 : index
    %c0_55 = arith.constant 0 : index
    %47 = vector.load %arg5[%c0_53, %c0_54, %c0_55] : memref<3x256x256xf32, #tpu.memory_space<vmem>>, vector<1x256x256xf32>
    %48 = vector.shape_cast %47 : vector<1x256x256xf32> to vector<256x256xf32>
    %cst_56 = arith.constant dense<0.000000e+00> : vector<32x256xf32>
    %49 = tpu.matmul %46, %48, %cst_56 {dimension_numbers = #tpu.dot_dimension_numbers<[1], [0], [0], [1], [0, 0, 1, 1], [], []>} : vector<32x256xf32>, vector<256x256xf32>, vector<32x256xf32> -> vector<32x256xf32>
    %c1_57 = arith.constant 1 : index
    %c0_58 = arith.constant 0 : index
    %50 = vector.load %arg13[%c1_57, %c0_58] : memref<40x256xf32, #tpu.memory_space<vmem>>, vector<32x256xf32>
    %c1_59 = arith.constant 1 : index
    %c0_60 = arith.constant 0 : index
    %c0_61 = arith.constant 0 : index
    %51 = vector.load %arg5[%c1_59, %c0_60, %c0_61] : memref<3x256x256xf32, #tpu.memory_space<vmem>>, vector<1x256x256xf32>
    %52 = vector.shape_cast %51 : vector<1x256x256xf32> to vector<256x256xf32>
    %cst_62 = arith.constant dense<0.000000e+00> : vector<32x256xf32>
    %53 = tpu.matmul %50, %52, %cst_62 {dimension_numbers = #tpu.dot_dimension_numbers<[1], [0], [0], [1], [0, 0, 1, 1], [], []>} : vector<32x256xf32>, vector<256x256xf32>, vector<32x256xf32> -> vector<32x256xf32>
    %54 = arith.addf %49, %53 : vector<32x256xf32>
    %c2_63 = arith.constant 2 : index
    %c0_64 = arith.constant 0 : index
    %55 = vector.load %arg13[%c2_63, %c0_64] : memref<40x256xf32, #tpu.memory_space<vmem>>, vector<32x256xf32>
    %c2_65 = arith.constant 2 : index
    %c0_66 = arith.constant 0 : index
    %c0_67 = arith.constant 0 : index
    %56 = vector.load %arg5[%c2_65, %c0_66, %c0_67] : memref<3x256x256xf32, #tpu.memory_space<vmem>>, vector<1x256x256xf32>
    %57 = vector.shape_cast %56 : vector<1x256x256xf32> to vector<256x256xf32>
    %cst_68 = arith.constant dense<0.000000e+00> : vector<32x256xf32>
    %58 = tpu.matmul %55, %57, %cst_68 {dimension_numbers = #tpu.dot_dimension_numbers<[1], [0], [0], [1], [0, 0, 1, 1], [], []>} : vector<32x256xf32>, vector<256x256xf32>, vector<32x256xf32> -> vector<32x256xf32>
    %59 = arith.addf %54, %58 : vector<32x256xf32>
    %c0_69 = arith.constant 0 : index
    %c0_70 = arith.constant 0 : index
    %60 = vector.load %arg6[%c0_69, %c0_70] : memref<1x256xf32, #tpu.memory_space<vmem>>, vector<1x256xf32>
    %61 = vector.broadcast %60 : vector<1x256xf32> to vector<32x256xf32>
    %62 = arith.addf %59, %61 : vector<32x256xf32>
    %cst_71 = arith.constant 0.000000e+00 : f32
    %63 = vector.broadcast %cst_71 : f32 to vector<32x256xf32>
    %64 = arith.maximumf %62, %63 : vector<32x256xf32>
    %c0_72 = arith.constant 0 : index
    %c0_73 = arith.constant 0 : index
    %65 = vector.load %arg14[%c0_72, %c0_73] : memref<48x256xf32, #tpu.memory_space<vmem>>, vector<32x256xf32>
    tpu.vector_store %arg14[%c0_72, %c0_73], %64 {strides = array<i32>} : memref<48x256xf32, #tpu.memory_space<vmem>>, vector<32x256xf32>,
    %c0_74 = arith.constant 0 : index
    %c0_75 = arith.constant 0 : index
    %66 = vector.load %arg14[%c0_74, %c0_75] : memref<48x256xf32, #tpu.memory_space<vmem>>, vector<32x256xf32>
    %c0_76 = arith.constant 0 : index
    %c0_77 = arith.constant 0 : index
    %c0_78 = arith.constant 0 : index
    %67 = vector.load %arg7[%c0_76, %c0_77, %c0_78] : memref<10x256x20xf32, #tpu.memory_space<vmem>>, vector<1x256x20xf32>
    %68 = vector.shape_cast %67 : vector<1x256x20xf32> to vector<256x20xf32>
    %cst_79 = arith.constant dense<0.000000e+00> : vector<32x20xf32>
    %69 = tpu.matmul %66, %68, %cst_79 {dimension_numbers = #tpu.dot_dimension_numbers<[1], [0], [0], [1], [0, 0, 1, 1], [], []>} : vector<32x256xf32>, vector<256x20xf32>, vector<32x20xf32> -> vector<32x20xf32>
    %c1_80 = arith.constant 1 : index
    %c0_81 = arith.constant 0 : index
    %70 = vector.load %arg14[%c1_80, %c0_81] : memref<48x256xf32, #tpu.memory_space<vmem>>, vector<32x256xf32>
    %c1_82 = arith.constant 1 : index
    %c0_83 = arith.constant 0 : index
    %c0_84 = arith.constant 0 : index
    %71 = vector.load %arg7[%c1_82, %c0_83, %c0_84] : memref<10x256x20xf32, #tpu.memory_space<vmem>>, vector<1x256x20xf32>
    %72 = vector.shape_cast %71 : vector<1x256x20xf32> to vector<256x20xf32>
    %cst_85 = arith.constant dense<0.000000e+00> : vector<32x20xf32>
    %73 = tpu.matmul %70, %72, %cst_85 {dimension_numbers = #tpu.dot_dimension_numbers<[1], [0], [0], [1], [0, 0, 1, 1], [], []>} : vector<32x256xf32>, vector<256x20xf32>, vector<32x20xf32> -> vector<32x20xf32>
    %74 = arith.addf %69, %73 : vector<32x20xf32>
    %c2_86 = arith.constant 2 : index
    %c0_87 = arith.constant 0 : index
    %75 = vector.load %arg14[%c2_86, %c0_87] : memref<48x256xf32, #tpu.memory_space<vmem>>, vector<32x256xf32>
    %c2_88 = arith.constant 2 : index
    %c0_89 = arith.constant 0 : index
    %c0_90 = arith.constant 0 : index
    %76 = vector.load %arg7[%c2_88, %c0_89, %c0_90] : memref<10x256x20xf32, #tpu.memory_space<vmem>>, vector<1x256x20xf32>
    %77 = vector.shape_cast %76 : vector<1x256x20xf32> to vector<256x20xf32>
    %cst_91 = arith.constant dense<0.000000e+00> : vector<32x20xf32>
    %78 = tpu.matmul %75, %77, %cst_91 {dimension_numbers = #tpu.dot_dimension_numbers<[1], [0], [0], [1], [0, 0, 1, 1], [], []>} : vector<32x256xf32>, vector<256x20xf32>, vector<32x20xf32> -> vector<32x20xf32>
    %79 = arith.addf %74, %78 : vector<32x20xf32>
    %c3 = arith.constant 3 : index
    %c0_92 = arith.constant 0 : index
    %80 = vector.load %arg14[%c3, %c0_92] : memref<48x256xf32, #tpu.memory_space<vmem>>, vector<32x256xf32>
    %c3_93 = arith.constant 3 : index
    %c0_94 = arith.constant 0 : index
    %c0_95 = arith.constant 0 : index
    %81 = vector.load %arg7[%c3_93, %c0_94, %c0_95] : memref<10x256x20xf32, #tpu.memory_space<vmem>>, vector<1x256x20xf32>
    %82 = vector.shape_cast %81 : vector<1x256x20xf32> to vector<256x20xf32>
    %cst_96 = arith.constant dense<0.000000e+00> : vector<32x20xf32>
    %83 = tpu.matmul %80, %82, %cst_96 {dimension_numbers = #tpu.dot_dimension_numbers<[1], [0], [0], [1], [0, 0, 1, 1], [], []>} : vector<32x256xf32>, vector<256x20xf32>, vector<32x20xf32> -> vector<32x20xf32>
    %84 = arith.addf %79, %83 : vector<32x20xf32>
    %c4 = arith.constant 4 : index
    %c0_97 = arith.constant 0 : index
    %85 = vector.load %arg14[%c4, %c0_97] : memref<48x256xf32, #tpu.memory_space<vmem>>, vector<32x256xf32>
    %c4_98 = arith.constant 4 : index
    %c0_99 = arith.constant 0 : index
    %c0_100 = arith.constant 0 : index
    %86 = vector.load %arg7[%c4_98, %c0_99, %c0_100] : memref<10x256x20xf32, #tpu.memory_space<vmem>>, vector<1x256x20xf32>
    %87 = vector.shape_cast %86 : vector<1x256x20xf32> to vector<256x20xf32>
    %cst_101 = arith.constant dense<0.000000e+00> : vector<32x20xf32>
    %88 = tpu.matmul %85, %87, %cst_101 {dimension_numbers = #tpu.dot_dimension_numbers<[1], [0], [0], [1], [0, 0, 1, 1], [], []>} : vector<32x256xf32>, vector<256x20xf32>, vector<32x20xf32> -> vector<32x20xf32>
    %89 = arith.addf %84, %88 : vector<32x20xf32>
    %c5 = arith.constant 5 : index
    %c0_102 = arith.constant 0 : index
    %90 = vector.load %arg14[%c5, %c0_102] : memref<48x256xf32, #tpu.memory_space<vmem>>, vector<32x256xf32>
    %c5_103 = arith.constant 5 : index
    %c0_104 = arith.constant 0 : index
    %c0_105 = arith.constant 0 : index
    %91 = vector.load %arg7[%c5_103, %c0_104, %c0_105] : memref<10x256x20xf32, #tpu.memory_space<vmem>>, vector<1x256x20xf32>
    %92 = vector.shape_cast %91 : vector<1x256x20xf32> to vector<256x20xf32>
    %cst_106 = arith.constant dense<0.000000e+00> : vector<32x20xf32>
    %93 = tpu.matmul %90, %92, %cst_106 {dimension_numbers = #tpu.dot_dimension_numbers<[1], [0], [0], [1], [0, 0, 1, 1], [], []>} : vector<32x256xf32>, vector<256x20xf32>, vector<32x20xf32> -> vector<32x20xf32>
    %94 = arith.addf %89, %93 : vector<32x20xf32>
    %c6 = arith.constant 6 : index
    %c0_107 = arith.constant 0 : index
    %95 = vector.load %arg14[%c6, %c0_107] : memref<48x256xf32, #tpu.memory_space<vmem>>, vector<32x256xf32>
    %c6_108 = arith.constant 6 : index
    %c0_109 = arith.constant 0 : index
    %c0_110 = arith.constant 0 : index
    %96 = vector.load %arg7[%c6_108, %c0_109, %c0_110] : memref<10x256x20xf32, #tpu.memory_space<vmem>>, vector<1x256x20xf32>
    %97 = vector.shape_cast %96 : vector<1x256x20xf32> to vector<256x20xf32>
    %cst_111 = arith.constant dense<0.000000e+00> : vector<32x20xf32>
    %98 = tpu.matmul %95, %97, %cst_111 {dimension_numbers = #tpu.dot_dimension_numbers<[1], [0], [0], [1], [0, 0, 1, 1], [], []>} : vector<32x256xf32>, vector<256x20xf32>, vector<32x20xf32> -> vector<32x20xf32>
    %99 = arith.addf %94, %98 : vector<32x20xf32>
    %c7 = arith.constant 7 : index
    %c0_112 = arith.constant 0 : index
    %100 = vector.load %arg14[%c7, %c0_112] : memref<48x256xf32, #tpu.memory_space<vmem>>, vector<32x256xf32>
    %c7_113 = arith.constant 7 : index
    %c0_114 = arith.constant 0 : index
    %c0_115 = arith.constant 0 : index
    %101 = vector.load %arg7[%c7_113, %c0_114, %c0_115] : memref<10x256x20xf32, #tpu.memory_space<vmem>>, vector<1x256x20xf32>
    %102 = vector.shape_cast %101 : vector<1x256x20xf32> to vector<256x20xf32>
    %cst_116 = arith.constant dense<0.000000e+00> : vector<32x20xf32>
    %103 = tpu.matmul %100, %102, %cst_116 {dimension_numbers = #tpu.dot_dimension_numbers<[1], [0], [0], [1], [0, 0, 1, 1], [], []>} : vector<32x256xf32>, vector<256x20xf32>, vector<32x20xf32> -> vector<32x20xf32>
    %104 = arith.addf %99, %103 : vector<32x20xf32>
    %c8 = arith.constant 8 : index
    %c0_117 = arith.constant 0 : index
    %105 = vector.load %arg14[%c8, %c0_117] : memref<48x256xf32, #tpu.memory_space<vmem>>, vector<32x256xf32>
    %c8_118 = arith.constant 8 : index
    %c0_119 = arith.constant 0 : index
    %c0_120 = arith.constant 0 : index
    %106 = vector.load %arg7[%c8_118, %c0_119, %c0_120] : memref<10x256x20xf32, #tpu.memory_space<vmem>>, vector<1x256x20xf32>
    %107 = vector.shape_cast %106 : vector<1x256x20xf32> to vector<256x20xf32>
    %cst_121 = arith.constant dense<0.000000e+00> : vector<32x20xf32>
    %108 = tpu.matmul %105, %107, %cst_121 {dimension_numbers = #tpu.dot_dimension_numbers<[1], [0], [0], [1], [0, 0, 1, 1], [], []>} : vector<32x256xf32>, vector<256x20xf32>, vector<32x20xf32> -> vector<32x20xf32>
    %109 = arith.addf %104, %108 : vector<32x20xf32>
    %c9 = arith.constant 9 : index
    %c0_122 = arith.constant 0 : index
    %110 = vector.load %arg14[%c9, %c0_122] : memref<48x256xf32, #tpu.memory_space<vmem>>, vector<32x256xf32>
    %c9_123 = arith.constant 9 : index
    %c0_124 = arith.constant 0 : index
    %c0_125 = arith.constant 0 : index
    %111 = vector.load %arg7[%c9_123, %c0_124, %c0_125] : memref<10x256x20xf32, #tpu.memory_space<vmem>>, vector<1x256x20xf32>
    %112 = vector.shape_cast %111 : vector<1x256x20xf32> to vector<256x20xf32>
    %cst_126 = arith.constant dense<0.000000e+00> : vector<32x20xf32>
    %113 = tpu.matmul %110, %112, %cst_126 {dimension_numbers = #tpu.dot_dimension_numbers<[1], [0], [0], [1], [0, 0, 1, 1], [], []>} : vector<32x256xf32>, vector<256x20xf32>, vector<32x20xf32> -> vector<32x20xf32>
    %114 = arith.addf %109, %113 : vector<32x20xf32>
    %c0_127 = arith.constant 0 : index
    %c0_128 = arith.constant 0 : index
    %115 = vector.load %arg8[%c0_127, %c0_128] : memref<1x20xf32, #tpu.memory_space<vmem>>, vector<1x20xf32>
    %116 = vector.broadcast %115 : vector<1x20xf32> to vector<32x20xf32>
    %117 = arith.addf %114, %116 : vector<32x20xf32>
    %cst_129 = arith.constant 0.000000e+00 : f32
    %118 = vector.broadcast %cst_129 : f32 to vector<32x20xf32>
    %119 = arith.maximumf %117, %118 : vector<32x20xf32>
    %c0_130 = arith.constant 0 : index
    %c0_131 = arith.constant 0 : index
    %120 = vector.load %arg9[%c0_130, %c0_131] : memref<20x128xf32, #tpu.memory_space<vmem>>, vector<20x128xf32>
    %cst_132 = arith.constant dense<0.000000e+00> : vector<32x128xf32>
    %121 = tpu.matmul %119, %120, %cst_132 {dimension_numbers = #tpu.dot_dimension_numbers<[1], [0], [0], [1], [0, 0, 1, 1], [], []>} : vector<32x20xf32>, vector<20x128xf32>, vector<32x128xf32> -> vector<32x128xf32>
    %c0_133 = arith.constant 0 : index
    %c0_134 = arith.constant 0 : index
    %122 = vector.load %arg10[%c0_133, %c0_134] : memref<1x128xf32, #tpu.memory_space<vmem>>, vector<1x128xf32>
    %123 = vector.broadcast %122 : vector<1x128xf32> to vector<32x128xf32>
    %124 = arith.addf %121, %123 : vector<32x128xf32>
    %125 = vector.extract_strided_slice %124 {offsets = [0, 0], sizes = [1, 128], strides = [1, 1]} : vector<32x128xf32> to vector<1x128xf32>
    %c0_135 = arith.constant 0 : index
    %c0_136 = arith.constant 0 : index
    %126 = vector.load %arg11[%c0_135, %c0_136] : memref<2x128xf32, #tpu.memory_space<vmem>>, vector<1x128xf32>
    tpu.vector_store %arg11[%c0_135, %c0_136], %125 {strides = array<i32>} : memref<2x128xf32, #tpu.memory_space<vmem>>, vector<1x128xf32>,
    %127 = vector.extract_strided_slice %124 {offsets = [16, 0], sizes = [1, 128], strides = [1, 1]} : vector<32x128xf32> to vector<1x128xf32>
    %c1_137 = arith.constant 1 : index
    %c0_138 = arith.constant 0 : index
    %128 = vector.load %arg11[%c1_137, %c0_138] : memref<2x128xf32, #tpu.memory_space<vmem>>, vector<1x128xf32>
    tpu.vector_store %arg11[%c1_137, %c0_138], %127 {strides = array<i32>} : memref<2x128xf32, #tpu.memory_space<vmem>>, vector<1x128xf32>,
    return
  }
}

</mosaic_0001>

<bundles_post_ra>
// kernel: _lambda_.1
= control target key start
LH: loop header
LB: loop body
LE: loop exit
PB: predicated region body
PF: predicated region fallthrough
CT: control target
= control target key end

     0   :  { %16 = vsyncpa [#allocation6], 0  ;;  %s5299_s0 = inlined_call_operand.vmem [shape: f32[40,16], index: 0, kind: input, shape index: {}]   ;;  %s5300_s1 = inlined_call_operand.hbm [shape: f32[3,16,128], index: 1, kind: input, shape index: {}]   ;;  %s5301_s2 = inlined_call_operand.hbm [shape: f32[1,128], index: 2, kind: input, shape index: {}]   ;;  %s5302_s3 = inlined_call_operand.hbm [shape: f32[3,128,256], index: 3, kind: input, shape index: {}]   ;;  %s5303_s4 = inlined_call_operand.hbm [shape: f32[1,256], index: 4, kind: input, shape index: {}]   ;;  %s5304_s5 = inlined_call_operand.hbm [shape: f32[3,256,256], index: 5, kind: input, shape index: {}]   ;;  %s5305_s6 = inlined_call_operand.hbm [shape: f32[1,256], index: 6, kind: input, shape index: {}]   ;;  %s5306_s7 = inlined_call_operand.hbm [shape: f32[10,256,20], index: 7, kind: input, shape index: {}]   ;;  %s5307_s8 = inlined_call_operand.hbm [shape: f32[1,20], index: 8, kind: input, shape index: {}]   ;;  %s5308_s9 = inlined_call_operand.hbm [shape: f32[20,128], index: 9, kind: input, shape index: {}]   ;;  %s5309_s10 = inlined_call_operand.hbm [shape: f32[1,128], index: 10, kind: input, shape index: {}]   ;;  %s5310_s11 = inlined_call_operand.hbm [shape: f32[2,128], index: 11, kind: output, shape index: {}]  }
   0x1   :  { %17 = vsyncpa [#allocation9], 0 }
   0x2   :  { %18 = vsyncpa [#allocation12], 0 }
   0x3   :  { %19 = vsyncpa [#allocation15], 0 }
   0x4   :  { %20 = vsyncpa [#allocation18], 0 }
   0x5   :  { %21 = vsyncpa [#allocation21], 0 }
   0x6   :  { %22 = vsyncpa [#allocation7], 0  ;;  %s4675_s17 = smov [#allocation8]   ;;  %s4676_s19 = smov [#allocation11]  }
   0x7   :  { %s43_s18 = sshll.u32 %s4675_s17, 4  ;;  %s65_s20 = sshll.u32 %s4676_s19, 4  ;;  %s44_s18 = int_to_ptr.vmem [resolvable:$true] %s43_s18  ;;  %s66_s20 = int_to_ptr.vmem [resolvable:$true] %s65_s20 }
   0x8   :  { %s4419_s23 = scalar_lea.hbm %s5301_s2, 16 }
   0x9   :  { %p4420_p0 = scmp.ne.s32.totalorder %s5301_s2, %s4419_s23  ;;  %p4423_p1 = scmp.lt.u32.totalorder %s4419_s23, %s5301_s2 }
   0xb   :  { %p4425_p2 = pnand %p4423_p1, %p4420_p0 }
   0xd   :  { %4428 = shalt.err (!%p4425_p2)
}
   0xe   :  { %s4429_s28 = scalar_lea.vmem %s44_s18, 16  ;;  %s4433_s29 = scalar_lea.vmem %s44_s18, 32 }
   0xf   :  { %p4430_p3 = scmp.ne.s32.totalorder %s44_s18, %s4429_s28  ;;  %p4434_p4 = scmp.lt.s32.totalorder %s44_s18, %s44_s18 }
  0x10   :  { %p4435_p5 = scmp.lt.s32.totalorder %s4433_s29, %s4429_s28 }
  0x12   :  { %p4436_p6 = por %p4435_p5, %p4434_p4 }
  0x14   :  { %p4437_p7 = pnand %p4436_p6, %p4430_p3 }
  0x16   :  { %4440 = shalt.err (!%p4437_p7)
}
  0x17   :  { %46 = dma.hbm_to_vmem [thread:$0]  %s5301_s2, 16, %s44_s18, [#allocation9]  }
  0x18   :  { %s4441_s15 = scalar_lea.hbm %s5303_s4, 32 }
  0x19   :  { %p4442_p8 = scmp.ne.s32.totalorder %s5303_s4, %s4441_s15  ;;  %p4445_p9 = scmp.lt.u32.totalorder %s4441_s15, %s5303_s4 }
  0x1b   :  { %p4447_p10 = pnand %p4445_p9, %p4442_p8 }
  0x1d   :  { %4450 = shalt.err (!%p4447_p10)
}
  0x1e   :  { %s4451_s22 = scalar_lea.vmem %s66_s20, 32  ;;  %p4456_p12 = scmp.lt.s32.totalorder %s66_s20, %s66_s20 }
  0x1f   :  { %p4452_p11 = scmp.ne.s32.totalorder %s66_s20, %s4451_s22  ;;  %p4457_p13 = scmp.lt.s32.totalorder %s4451_s22, %s4451_s22 }
  0x21   :  { %p4458_p0 = por %p4457_p13, %p4456_p12 }
  0x23   :  { %p4459_p1 = pnand %p4458_p0, %p4452_p11 }
  0x25   :  { %4462 = shalt.err (!%p4459_p1)
}
  0x26   :  { %68 = dma.hbm_to_vmem [thread:$0]  %s5303_s4, 32, %s66_s20, [#allocation12]  }
  0x27   :  { %s4677_s23 = smov [#allocation14]   ;;  %s4678_s25 = smov [#allocation17]  }
  0x28   :  { %s87_s24 = sshll.u32 %s4677_s23, 4  ;;  %s109_s26 = sshll.u32 %s4678_s25, 4  ;;  %s88_s24 = int_to_ptr.vmem [resolvable:$true] %s87_s24  ;;  %s110_s26 = int_to_ptr.vmem [resolvable:$true] %s109_s26 }
  0x29   :  { %s4463_s29 = scalar_lea.hbm %s5305_s6, 32 }
  0x2a   :  { %p4464_p2 = scmp.ne.s32.totalorder %s5305_s6, %s4463_s29  ;;  %p4467_p3 = scmp.lt.u32.totalorder %s4463_s29, %s5305_s6 }
  0x2c   :  { %p4469_p4 = pnand %p4467_p3, %p4464_p2 }
  0x2e   :  { %4472 = shalt.err (!%p4469_p4)
}
  0x2f   :  { %s4473_s4 = scalar_lea.vmem %s88_s24, 32  ;;  %p4478_p6 = scmp.lt.s32.totalorder %s88_s24, %s88_s24 }
  0x30   :  { %p4474_p5 = scmp.ne.s32.totalorder %s88_s24, %s4473_s4  ;;  %p4479_p7 = scmp.lt.s32.totalorder %s4473_s4, %s4473_s4 }
  0x32   :  { %p4480_p8 = por %p4479_p7, %p4478_p6 }
  0x34   :  { %p4481_p9 = pnand %p4480_p8, %p4474_p5 }
  0x36   :  { %4484 = shalt.err (!%p4481_p9)
}
  0x37   :  { %90 = dma.hbm_to_vmem [thread:$0]  %s5305_s6, 32, %s88_s24, [#allocation15]  }
  0x38   :  { %s4485_s19 = scalar_lea.hbm %s5307_s8, 16 }
  0x39   :  { %p4486_p10 = scmp.ne.s32.totalorder %s5307_s8, %s4485_s19  ;;  %p4489_p11 = scmp.lt.u32.totalorder %s4485_s19, %s5307_s8 }
  0x3b   :  { %p4491_p12 = pnand %p4489_p11, %p4486_p10 }
  0x3d   :  { %4494 = shalt.err (!%p4491_p12)
}
  0x3e   :  { %s4495_s23 = scalar_lea.vmem %s110_s26, 16  ;;  %s4499_s25 = scalar_lea.vmem %s110_s26, 32 }
  0x3f   :  { %p4496_p13 = scmp.ne.s32.totalorder %s110_s26, %s4495_s23  ;;  %p4500_p0 = scmp.lt.s32.totalorder %s110_s26, %s110_s26 }
  0x40   :  { %p4501_p1 = scmp.lt.s32.totalorder %s4499_s25, %s4495_s23 }
  0x42   :  { %p4502_p2 = por %p4501_p1, %p4500_p0 }
  0x44   :  { %p4503_p3 = pnand %p4502_p2, %p4496_p13 }
  0x46   :  { %4506 = shalt.err (!%p4503_p3)
}
  0x47   :  { %112 = dma.hbm_to_vmem [thread:$0]  %s5307_s8, 16, %s110_s26, [#allocation18]  }
  0x48   :  { %s4679_s27 = smov [#allocation5]   ;;  %s4507_s12 = scalar_lea.hbm %s5300_s1, 768 }
  0x49   :  { %s30_s28 = sshll.u32 %s4679_s27, 4  ;;  %p4508_p4 = scmp.ne.s32.totalorder %s5300_s1, %s4507_s12  ;;  %s31_s28 = int_to_ptr.vmem [resolvable:$true] %s30_s28 }
  0x4a   :  { %p4511_p5 = scmp.lt.u32.totalorder %s4507_s12, %s5300_s1 }
  0x4c   :  { %p4513_p6 = pnand %p4511_p5, %p4508_p4 }
  0x4e   :  { %4516 = shalt.err (!%p4513_p6)
}
  0x4f   :  { %s4517_s15 = scalar_lea.vmem %s31_s28, 768  ;;  %p4522_p8 = scmp.lt.s32.totalorder %s31_s28, %s31_s28 }
  0x50   :  { %p4518_p7 = scmp.ne.s32.totalorder %s31_s28, %s4517_s15  ;;  %p4523_p9 = scmp.lt.s32.totalorder %s4517_s15, %s4517_s15 }
  0x52   :  { %p4524_p10 = por %p4523_p9, %p4522_p8 }
  0x54   :  { %p4525_p11 = pnand %p4524_p10, %p4518_p7 }
  0x56   :  { %4528 = shalt.err (!%p4525_p11)
}
  0x57   :  { %s4680_s8 = smov 128   ;;  %s4681_s26 = smov 8  }
  0x58   :  { %36 = dma.hbm_to_vmem [thread:$0]  %s5300_s1, 768, %s31_s28, [#allocation6], %s4680_s8, %s4680_s8, %s4681_s26  }
  0x59   :  { %s4682_s19 = smov [#allocation10]   ;;  %s4529_s18 = scalar_lea.hbm %s5302_s3, 12288 }
  0x5a   :  { %s52_s21 = sshll.u32 %s4682_s19, 4  ;;  %p4530_p12 = scmp.ne.s32.totalorder %s5302_s3, %s4529_s18  ;;  %s53_s21 = int_to_ptr.vmem [resolvable:$true] %s52_s21 }
  0x5b   :  { %p4533_p13 = scmp.lt.u32.totalorder %s4529_s18, %s5302_s3 }
  0x5d   :  { %p4535_p0 = pnand %p4533_p13, %p4530_p12 }
  0x5f   :  { %4538 = shalt.err (!%p4535_p0)
}
  0x60   :  { %s4539_s27 = scalar_lea.vmem %s53_s21, 12288  ;;  %p4544_p2 = scmp.lt.s32.totalorder %s53_s21, %s53_s21 }
  0x61   :  { %p4540_p1 = scmp.ne.s32.totalorder %s53_s21, %s4539_s27  ;;  %p4545_p3 = scmp.lt.s32.totalorder %s4539_s27, %s4539_s27 }
  0x63   :  { %p4546_p4 = por %p4545_p3, %p4544_p2 }
  0x65   :  { %p4547_p5 = pnand %p4546_p4, %p4540_p1 }
  0x67   :  { %4550 = shalt.err (!%p4547_p5)
}
  0x68   :  { %s4683_s1 = smov 256   ;;  %s4684_s28 = smov 16  }
  0x69   :  { %58 = dma.hbm_to_vmem [thread:$0]  %s5302_s3, 12288, %s53_s21, [#allocation9], %s4683_s1, %s4683_s1, %s4684_s28  }
  0x6a   :  { %s4685_s12 = smov [#allocation13]   ;;  %s4686_s14 = smov [#allocation16]  }
  0x6b   :  { %s74_s13 = sshll.u32 %s4685_s12, 4  ;;  %s96_s4 = sshll.u32 %s4686_s14, 4  ;;  %s75_s13 = int_to_ptr.vmem [resolvable:$true] %s74_s13  ;;  %s4826_s4 = int_to_ptr.vmem [resolvable:$true] %s96_s4 }
  0x6c   :  { %s4551_s16 = scalar_lea.hbm %s5304_s5, 24576 }
  0x6d   :  { %p4552_p6 = scmp.ne.s32.totalorder %s5304_s5, %s4551_s16  ;;  %p4555_p7 = scmp.lt.u32.totalorder %s4551_s16, %s5304_s5 }
  0x6f   :  { %p4557_p8 = pnand %p4555_p7, %p4552_p6 }
  0x71   :  { %4560 = shalt.err (!%p4557_p8)
}
  0x72   :  { %s4561_s3 = scalar_lea.vmem %s75_s13, 24576  ;;  %p4566_p10 = scmp.lt.s32.totalorder %s75_s13, %s75_s13 }
  0x73   :  { %p4562_p9 = scmp.ne.s32.totalorder %s75_s13, %s4561_s3  ;;  %p4567_p11 = scmp.lt.s32.totalorder %s4561_s3, %s4561_s3 }
  0x75   :  { %p4568_p12 = por %p4567_p11, %p4566_p10 }
  0x77   :  { %p4569_p13 = pnand %p4568_p12, %p4562_p9 }
  0x79   :  { %4572 = shalt.err (!%p4569_p13)
}
  0x7a   :  { %80 = dma.hbm_to_vmem [thread:$0]  %s5304_s5, 24576, %s75_s13, [#allocation12], %s4683_s1, %s4683_s1, %s4684_s28  }
  0x7b   :  { %s4573_s6 = scalar_lea.hbm %s5306_s7, 40960 }
  0x7c   :  { %p4574_p0 = scmp.ne.s32.totalorder %s5306_s7, %s4573_s6  ;;  %p4577_p1 = scmp.lt.u32.totalorder %s4573_s6, %s5306_s7 }
  0x7e   :  { %p4579_p2 = pnand %p4577_p1, %p4574_p0 }
  0x80   :  { %4582 = shalt.err (!%p4579_p2)
}
  0x81   :  { %s4583_s12 = scalar_lea.vmem %s4826_s4, 40960  ;;  %p4588_p4 = scmp.lt.s32.totalorder %s4826_s4, %s4826_s4 }
  0x82   :  { %p4584_p3 = scmp.ne.s32.totalorder %s4826_s4, %s4583_s12  ;;  %p4589_p5 = scmp.lt.s32.totalorder %s4583_s12, %s4583_s12 }
  0x84   :  { %p4590_p6 = por %p4589_p5, %p4588_p4 }
  0x86   :  { %p4591_p7 = pnand %p4590_p6, %p4584_p3 }
  0x88   :  { %4594 = shalt.err (!%p4591_p7)
}
  0x89   :  { %102 = dma.hbm_to_vmem [thread:$0]  %s5306_s7, 40960, %s4826_s4, [#allocation15], %s4680_s8, %s4680_s8, %s4681_s26  }
  0x8a   :  { %s4687_s28 = smov [#allocation19]   ;;  %s4688_s14 = smov [#allocation20]  }
  0x8b   :  { %s118_s13 = sshll.u32 %s4687_s28, 4  ;;  %s131_s20 = sshll.u32 %s4688_s14, 4  ;;  %s119_s13 = int_to_ptr.vmem [resolvable:$true] %s118_s13  ;;  %s132_s20 = int_to_ptr.vmem [resolvable:$true] %s131_s20 }
  0x8c   :  { %s4595_s17 = scalar_lea.hbm %s5308_s9, 384 }
  0x8d   :  { %p4596_p8 = scmp.ne.s32.totalorder %s5308_s9, %s4595_s17  ;;  %p4599_p9 = scmp.lt.u32.totalorder %s4595_s17, %s5308_s9 }
  0x8f   :  { %p4601_p10 = pnand %p4599_p9, %p4596_p8 }
  0x91   :  { %4604 = shalt.err (!%p4601_p10)
}
  0x92   :  { %s4605_s7 = scalar_lea.vmem %s119_s13, 384  ;;  %p4610_p12 = scmp.lt.s32.totalorder %s119_s13, %s119_s13 }
  0x93   :  { %p4606_p11 = scmp.ne.s32.totalorder %s119_s13, %s4605_s7  ;;  %p4611_p13 = scmp.lt.s32.totalorder %s4605_s7, %s4605_s7 }
  0x95   :  { %p4612_p0 = por %p4611_p13, %p4610_p12 }
  0x97   :  { %p4613_p1 = pnand %p4612_p0, %p4606_p11 }
  0x99   :  { %4616 = shalt.err (!%p4613_p1)
}
  0x9a   :  { %124 = dma.hbm_to_vmem [thread:$0]  %s5308_s9, 384, %s119_s13, [#allocation18], %s4680_s8, %s4680_s8, %s4681_s26  }
  0x9b   :  { %s4617_s25 = scalar_lea.hbm %s5309_s10, 16 }
  0x9c   :  { %p4618_p2 = scmp.ne.s32.totalorder %s5309_s10, %s4617_s25  ;;  %p4621_p3 = scmp.lt.u32.totalorder %s4617_s25, %s5309_s10 }
  0x9e   :  { %p4623_p4 = pnand %p4621_p3, %p4618_p2 }
  0xa0   :  { %4626 = shalt.err (!%p4623_p4)
}
  0xa1   :  { %s4627_s30 = scalar_lea.vmem %s132_s20, 16  ;;  %s4631_s12 = scalar_lea.vmem %s132_s20, 32 }
  0xa2   :  { %p4628_p5 = scmp.ne.s32.totalorder %s132_s20, %s4627_s30  ;;  %p4632_p6 = scmp.lt.s32.totalorder %s132_s20, %s132_s20 }
  0xa3   :  { %p4633_p7 = scmp.lt.s32.totalorder %s4631_s12, %s4627_s30 }
  0xa5   :  { %p4634_p8 = por %p4633_p7, %p4632_p6 }
  0xa7   :  { %p4635_p9 = pnand %p4634_p8, %p4628_p5 }
  0xa9   :  { %4638 = shalt.err (!%p4635_p9)
}
  0xaa   :  { %134 = dma.hbm_to_vmem [thread:$0]  %s5309_s10, 16, %s132_s20, [#allocation21]  }
  0xab   :  { %4661 = dma.done.wait [#allocation6], 768  }
  0xac   :  { %4662 = vsyncadd [#allocation6], 4294966528 }
  0xad   :  { %4663 = dma.done.wait [#allocation9], 12304  }
  0xae   :  { %4664 = vsyncadd [#allocation9], 4294954992 }
  0xaf   :  { %4665 = dma.done.wait [#allocation12], 24608  }
  0xb0   :  { %4666 = vsyncadd [#allocation12], 4294942688 }
  0xb1   :  { %4667 = dma.done.wait [#allocation15], 40992  }
  0xb2   :  { %4668 = vsyncadd [#allocation15], 4294926304 }
  0xb3   :  { %4669 = dma.done.wait [#allocation18], 400  }
  0xb4   :  { %4670 = vsyncadd [#allocation18], 4294966896 }
  0xb5   :  { %4671 = dma.done.wait [#allocation21], 16  }
  0xb6   :  { %4672 = vsyncadd [#allocation21], 4294967280  ;;  %v4689_v0 = vmov 0.0   ;;  %vm205_vm0 = vcmask 130048   ;;  %v203_v1 = vld [vmem:[#allocation5 + $0x10] sm:$0xff]  ;;  %v204_v2 = vld [vmem:[#allocation5 + $0x18] sm:$0xff] }
  0xb7   :  { %169 = vst [vmem:[#allocation2 + $0x20] sm:$0xff] %v4689_v0  ;;  %178 = vst [vmem:[#allocation3 + $0x40] sm:$0xff] %v4689_v0  ;;  %664 = vmatprep.mubr.f32.mxu1 %v4689_v0  ;;  %v198_v3 = vld [vmem:[%s5299_s0 + $0x1] sm:$0xff]  ;;  %v3732_v4 = vpack.c.bf16 %v204_v2, %v203_v1  ;;  %v196_v5 = vld [vmem:[#allocation5] sm:$0xff]  ;;  %vm1105_vm1 = vcmask 1046528   ;;  %vm1383_vm2 = vcmask 1045504  }
  0xb8   :  { %179 = vst [vmem:[#allocation3 + $0x48] sm:$0xff] %v4689_v0  ;;  %188 = vst [vmem:[#allocation4 + $0x40] sm:$0xff] %v4689_v0  ;;  %3694 = vmatprep.mubr.msk.f32.mxu0 %vm205_vm0, %v198_v3  ;;  %v197_v6 = vld [vmem:[#allocation5 + $0x8] sm:$0xff]  ;;  %v405_v8 = vld [vmem:[#allocation5 + $0x20] sm:$0xff]  ;;  %vm2180_vm3 = vcmask 1043456   ;;  %vm2494_vm4 = vcmask 1041408  }
  0xb9   :  { %189 = vst [vmem:[#allocation4 + $0x48] sm:$0xff] %v4689_v0  ;;  %190 = vst [vmem:[#allocation4 + $0x50] sm:$0xff] %v4689_v0  ;;  %v3736_v7 = vpack.c.bf16 %v197_v6, %v196_v5  ;;  %3733 = vmatprep.subr.bf16.mxu0 %v3732_v4  ;;  %v406_v9 = vld [vmem:[#allocation5 + $0x28] sm:$0xff]  ;;  %v199_v10 = vld [vmem:[%s5299_s0 + $0x9] sm:$0xff]  ;;  %vm2023_vm5 = vcmask 1044480   ;;  %vm2337_vm6 = vcmask 1042432  }
  0xba   :  { %191 = vst [vmem:[#allocation4 + $0x58] sm:$0xff] %v4689_v0  ;;  %3735 = vmatpush3.bf16.msra.mxu0 %v3732_v4  ;;  %v200_v11 = vld [vmem:[%s5299_s0 + $0x11] sm:$0xff]  ;;  %v3740_v12 = vpack.c.bf16 %v406_v9, %v405_v8  ;;  %v201_v13 = vld [vmem:[%s5299_s0 + $0x19] sm:$0xff]  ;;  %v571_v15 = vld [vmem:[#allocation10 + $0x118] sm:$0xff]  ;;  %vm2651_vm7 = vcmask 1040384   ;;  %vm3084_vm8 = vcmask 162816  }
  0xbb   :  { %3737 = vmatprep.subr.bf16.mxu0 %v3736_v7  ;;  %v569_v14 = vld [vmem:[#allocation10 + $0x108] sm:$0xff]  ;;  %v568_v16 = vld [vmem:[#allocation10 + $0x100] sm:$0xff]  ;;  %v570_v18 = vld [vmem:[#allocation10 + $0x110] sm:$0xff] }
  0xbc   :  { %v3744_v17 = vpack.c.bf16 %v571_v15, %v569_v14  ;;  %v573_v19 = vld [vmem:[#allocation10 + $0x128] sm:$0xff]  ;;  %v575_v20 = vld [vmem:[#allocation10 + $0x138] sm:$0xff]  ;;  %v3746_v21 = vpack.c.bf16 %v570_v18, %v568_v16  ;;  %v572_v23 = vld [vmem:[#allocation10 + $0x120] sm:$0xff] }
  0xbd   :  { %3695 = vmatmul.mubr.msk.f32.vlgmr.msra.gmra.mrb[0].mxu0 %vm205_vm0, %v199_v10  ;;  %v3748_v22 = vpack.c.bf16 %v575_v20, %v573_v19  ;;  %v574_v24 = vld [vmem:[#allocation10 + $0x130] sm:$0xff]  ;;  %v577_v25 = vld [vmem:[#allocation10 + $0x148] sm:$0xff]  ;;  %v579_v27 = vld [vmem:[#allocation10 + $0x158] sm:$0xff] }
  0xbe   :  { %3739 = vmatpush3.bf16.msra.mxu0 %v3736_v7  ;;  %3697 = vmatprep.mubr.msk.f32.mxu0 %vm205_vm0, %v200_v11  ;;  %v192_v26 = vld [vmem:[%s5299_s0] sm:$0xff]  ;;  %v3750_v28 = vpack.c.bf16 %v574_v24, %v572_v23  ;;  %v3752_v29 = vpack.c.bf16 %v579_v27, %v577_v25  ;;  %v576_v30 = vld [vmem:[#allocation10 + $0x140] sm:$0xff]  ;;  %v581_v33 = vld [vmem:[#allocation10 + $0x168] sm:$0xff] }
  0xbf   :  { %3741 = vmatprep.subr.bf16.mxu0 %v3740_v12  ;;  %3745 = vmatprep.subr.bf16.mxu1 %v3744_v17  ;;  %v578_v31 = vld [vmem:[#allocation10 + $0x150] sm:$0xff]  ;;  %v193_v32 = vld [vmem:[%s5299_s0 + $0x8] sm:$0xff]  ;;  %v194_v35 = vld [vmem:[%s5299_s0 + $0x10] sm:$0xff] }
  0xc0   :  { %3747 = vmatpush1.bf16.msra.mxu1 %v3746_v21  ;;  %v583_v34 = vld [vmem:[#allocation10 + $0x178] sm:$0xff]  ;;  %v3754_v36 = vpack.c.bf16 %v578_v31, %v576_v30  ;;  %v580_v38 = vld [vmem:[#allocation10 + $0x160] sm:$0xff]  ;;  %v582_v39 = vld [vmem:[#allocation10 + $0x170] sm:$0xff] }
  0xc1   :  { %3698 = vmatmul.mubr.msk.f32.gmra.mrb[2].mxu0 %vm205_vm0, %v201_v13  ;;  %3749 = vmatprep.subr.bf16.mxu1 %v3748_v22  ;;  %v3756_v37 = vpack.c.bf16 %v583_v34, %v581_v33  ;;  %v195_v40 = vld [vmem:[%s5299_s0 + $0x18] sm:$0xff]  ;;  %v587_v42 = vld [vmem:[#allocation10 + $0x198] sm:$0xff]  ;;  %v3758_v44 = vpack.c.bf16 %v582_v39, %v580_v38  ;;  %v584_v46 = vld [vmem:[#allocation10 + $0x180] sm:$0xff] }
  0xc2   :  { %3704 = vmatprep.mubr.msk.f32.mxu0 %vm205_vm0, %v192_v26  ;;  %v585_v41 = vld [vmem:[#allocation10 + $0x188] sm:$0xff]  ;;  %v400_v43 = vld [vmem:[%s5299_s0 + $0x2] sm:$0xff]  ;;  %v586_v47 = vld [vmem:[#allocation10 + $0x190] sm:$0xff] }
  0xc3   :  { %v3760_v45 = vpack.c.bf16 %v587_v42, %v585_v41  ;;  %v401_v48 = vld [vmem:[%s5299_s0 + $0xa] sm:$0xff]  ;;  %v402_v49 = vld [vmem:[%s5299_s0 + $0x12] sm:$0xff]  ;;  %v3762_v50 = vpack.c.bf16 %v586_v47, %v584_v46  ;;  %v403_v51 = vld [vmem:[%s5299_s0 + $0x1a] sm:$0xff]  ;;  %s4690_s0 = smov [#allocation22]  }
  0xc4   :  { %3751 = vmatpush1.bf16.msra.mxu1 %v3750_v28  ;;  %v589_v52 = vld [vmem:[#allocation10 + $0x1a8] sm:$0xff]  ;;  %v591_v53 = vld [vmem:[#allocation10 + $0x1b8] sm:$0xff]  ;;  %v588_v55 = vld [vmem:[#allocation10 + $0x1a0] sm:$0xff]  ;;  %s3191_s29 = sshll.u32 %s4690_s0, 4  ;;  %s3192_s29 = int_to_ptr.vmem [resolvable:$true] %s3191_s29 }
  0xc5   :  { %3705 = vmatmul.mubr.msk.f32.vlgmr.msra.gmra.mrb[0].mxu0 %vm205_vm0, %v193_v32  ;;  %3753 = vmatprep.subr.bf16.mxu1 %v3752_v29  ;;  %v3764_v54 = vpack.c.bf16 %v591_v53, %v589_v52  ;;  %v590_v56 = vld [vmem:[#allocation10 + $0x1b0] sm:$0xff]  ;;  %v593_v58 = vld [vmem:[#allocation10 + $0x1c8] sm:$0xff]  ;;  %v595_v59 = vld [vmem:[#allocation10 + $0x1d8] sm:$0xff]  ;;  %s4639_s30 = scalar_lea.vmem %s3192_s29, 32  ;;  %p4644_p11 = scmp.lt.s32.totalorder %s3192_s29, %s3192_s29 }
  0xc6   :  { %3743 = vmatpush3.bf16.msra.mxu0 %v3740_v12  ;;  %3707 = vmatprep.mubr.msk.f32.mxu0 %vm205_vm0, %v194_v35  ;;  %v3766_v57 = vpack.c.bf16 %v590_v56, %v588_v55  ;;  %v3768_v60 = vpack.c.bf16 %v595_v59, %v593_v58  ;;  %v592_v61 = vld [vmem:[#allocation10 + $0x1c0] sm:$0xff]  ;;  %v594_v62 = vld [vmem:[#allocation10 + $0x1d0] sm:$0xff]  ;;  %v597_v1 = vld [vmem:[#allocation10 + $0x1e8] sm:$0xff]  ;;  %p4640_p10 = scmp.ne.s32.totalorder %s3192_s29, %s4639_s30  ;;  %p4645_p12 = scmp.lt.s32.totalorder %s4639_s30, %s4639_s30 }
  0xc7   :  { %v3770_v63 = vpack.c.bf16 %v594_v62, %v592_v61  ;;  %v599_v2 = vld [vmem:[#allocation10 + $0x1f8] sm:$0xff]  ;;  %v596_v4 = vld [vmem:[#allocation10 + $0x1e0] sm:$0xff]  ;;  %v598_v5 = vld [vmem:[#allocation10 + $0x1f0] sm:$0xff] }
  0xc8   :  { %3755 = vmatpush1.bf16.msra.mxu1 %v3754_v36  ;;  %v3772_v3 = vpack.c.bf16 %v599_v2, %v597_v1  ;;  %v3774_v6 = vpack.c.bf16 %v598_v5, %v596_v4  ;;  %v532_v7 = vld [vmem:[#allocation10 + $0x8] sm:$0xff]  ;;  %v534_v8 = vld [vmem:[#allocation10 + $0x18] sm:$0xff]  ;;  %p4646_p13 = por %p4645_p12, %p4644_p11 }
  0xc9   :  { %3708 = vmatmul.mubr.msk.f32.gmra.mrb[2].mxu0 %vm205_vm0, %v195_v40  ;;  %3757 = vmatprep.subr.bf16.mxu1 %v3756_v37  ;;  %v3776_v9 = vpack.c.bf16 %v534_v8, %v532_v7  ;;  %v1032_v10 = vld [vmem:[#allocation13 + $0x208] sm:$0xff]  ;;  %v1034_v11 = vld [vmem:[#allocation13 + $0x218] sm:$0xff]  ;;  %v1031_v12 = vld [vmem:[#allocation13 + $0x200] sm:$0xff] }
  0xca   :  { %3714 = vmatprep.mubr.msk.f32.mxu0 %vm205_vm0, %v400_v43  ;;  %v3840_v13 = vpack.c.bf16 %v1034_v11, %v1032_v10  ;;  %v1033_v14 = vld [vmem:[#allocation13 + $0x210] sm:$0xff]  ;;  %v1036_v15 = vld [vmem:[#allocation13 + $0x228] sm:$0xff]  ;;  %v1038_v16 = vld [vmem:[#allocation13 + $0x238] sm:$0xff]  ;;  %p4647_p0 = pnand %p4646_p13, %p4640_p10 }
  0xcb   :  { %v3842_v17 = vpack.c.bf16 %v1033_v14, %v1031_v12  ;;  %v3844_v18 = vpack.c.bf16 %v1038_v16, %v1036_v15  ;;  %v1035_v19 = vld [vmem:[#allocation13 + $0x220] sm:$0xff]  ;;  %v1037_v20 = vld [vmem:[#allocation13 + $0x230] sm:$0xff]  ;;  %v1040_v21 = vld [vmem:[#allocation13 + $0x248] sm:$0xff] }
  0xcc   :  { %3759 = vmatpush1.bf16.msra.mxu1 %v3758_v44  ;;  %3841 = vmatprep.subr.bf16.mxu0 %v3840_v13  ;;  %v1042_v22 = vld [vmem:[#allocation13 + $0x258] sm:$0xff]  ;;  %v3846_v23 = vpack.c.bf16 %v1037_v20, %v1035_v19  ;;  %v1039_v25 = vld [vmem:[#allocation13 + $0x240] sm:$0xff]  ;;  %v1041_v26 = vld [vmem:[#allocation13 + $0x250] sm:$0xff] }
  0xcd   :  { %3715 = vmatmul.mubr.msk.f32.vlgmr.msra.gmra.mrb[0].mxu0 %vm205_vm0, %v401_v48  ;;  %3761 = vmatprep.subr.bf16.mxu1 %v3760_v45  ;;  %v3848_v24 = vpack.c.bf16 %v1042_v22, %v1040_v21  ;;  %v1044_v27 = vld [vmem:[#allocation13 + $0x268] sm:$0xff]  ;;  %v1046_v28 = vld [vmem:[#allocation13 + $0x278] sm:$0xff]  ;;  %v3850_v29 = vpack.c.bf16 %v1041_v26, %v1039_v25  ;;  %v1043_v31 = vld [vmem:[#allocation13 + $0x260] sm:$0xff] }
  0xce   :  { %3717 = vmatprep.mubr.msk.f32.mxu0 %vm205_vm0, %v402_v49  ;;  %3843 = vmatpush1.bf16.msra.mxu0 %v3842_v17  ;;  %v3852_v30 = vpack.c.bf16 %v1046_v28, %v1044_v27  ;;  %v1045_v32 = vld [vmem:[#allocation13 + $0x270] sm:$0xff]  ;;  %v1048_v33 = vld [vmem:[#allocation13 + $0x288] sm:$0xff]  ;;  %v1050_v34 = vld [vmem:[#allocation13 + $0x298] sm:$0xff] }
  0xcf   :  { %3845 = vmatprep.subr.bf16.mxu0 %v3844_v18  ;;  %v3854_v35 = vpack.c.bf16 %v1045_v32, %v1043_v31  ;;  %v3856_v36 = vpack.c.bf16 %v1050_v34, %v1048_v33  ;;  %v1047_v37 = vld [vmem:[#allocation13 + $0x280] sm:$0xff]  ;;  %v1049_v38 = vld [vmem:[#allocation13 + $0x290] sm:$0xff]  ;;  %v1052_v39 = vld [vmem:[#allocation13 + $0x2a8] sm:$0xff] }
  0xd0   :  { %3763 = vmatpush1.bf16.msra.mxu1 %v3762_v50  ;;  %v1054_v40 = vld [vmem:[#allocation13 + $0x2b8] sm:$0xff]  ;;  %v3858_v41 = vpack.c.bf16 %v1049_v38, %v1047_v37  ;;  %v1051_v43 = vld [vmem:[#allocation13 + $0x2a0] sm:$0xff]  ;;  %v1053_v44 = vld [vmem:[#allocation13 + $0x2b0] sm:$0xff] }
  0xd1   :  { %3718 = vmatmul.mubr.msk.f32.gmra.mrb[2].mxu0 %vm205_vm0, %v403_v51  ;;  %3765 = vmatprep.subr.bf16.mxu1 %v3764_v54  ;;  %v3860_v42 = vpack.c.bf16 %v1054_v40, %v1052_v39  ;;  %v1056_v45 = vld [vmem:[#allocation13 + $0x2c8] sm:$0xff]  ;;  %v1058_v46 = vld [vmem:[#allocation13 + $0x2d8] sm:$0xff]  ;;  %v3862_v47 = vpack.c.bf16 %v1053_v44, %v1051_v43  ;;  %v1055_v49 = vld [vmem:[#allocation13 + $0x2c0] sm:$0xff] }
  0xd2   :  { %3847 = vmatpush1.bf16.msra.mxu0 %v3846_v23  ;;  %v3864_v48 = vpack.c.bf16 %v1058_v46, %v1056_v45  ;;  %v1057_v50 = vld [vmem:[#allocation13 + $0x2d0] sm:$0xff]  ;;  %v1060_v51 = vld [vmem:[#allocation13 + $0x2e8] sm:$0xff]  ;;  %v1062_v52 = vld [vmem:[#allocation13 + $0x2f8] sm:$0xff] }
  0xd3   :  { %3849 = vmatprep.subr.bf16.mxu0 %v3848_v24  ;;  %v3866_v53 = vpack.c.bf16 %v1057_v50, %v1055_v49  ;;  %v3868_v54 = vpack.c.bf16 %v1062_v52, %v1060_v51  ;;  %v1059_v55 = vld [vmem:[#allocation13 + $0x2e0] sm:$0xff]  ;;  %v1061_v56 = vld [vmem:[#allocation13 + $0x2f0] sm:$0xff]  ;;  %v1066_v58 = vld [vmem:[#allocation13 + $0x318] sm:$0xff] }
  0xd4   :  { %3767 = vmatpush1.bf16.msra.mxu1 %v3766_v57  ;;  %v1064_v57 = vld [vmem:[#allocation13 + $0x308] sm:$0xff]  ;;  %v3870_v59 = vpack.c.bf16 %v1061_v56, %v1059_v55  ;;  %v1063_v61 = vld [vmem:[#allocation13 + $0x300] sm:$0xff]  ;;  %v1065_v62 = vld [vmem:[#allocation13 + $0x310] sm:$0xff] }
  0xd5   :  { %3769 = vmatprep.subr.bf16.mxu1 %v3768_v60  ;;  %v3872_v60 = vpack.c.bf16 %v1066_v58, %v1064_v57  ;;  %v1070_v1 = vld [vmem:[#allocation13 + $0x338] sm:$0xff]  ;;  %v3874_v2 = vpack.c.bf16 %v1065_v62, %v1063_v61  ;;  %v1067_v4 = vld [vmem:[#allocation13 + $0x320] sm:$0xff]  ;;  %v1069_v5 = vld [vmem:[#allocation13 + $0x330] sm:$0xff] }
  0xd6   :  { %3851 = vmatpush1.bf16.msra.mxu0 %v3850_v29  ;;  %v1074_v7 = vld [vmem:[#allocation13 + $0x358] sm:$0xff]  ;;  %v1071_v11 = vld [vmem:[#allocation13 + $0x340] sm:$0xff]  ;;  %v1073_v12 = vld [vmem:[#allocation13 + $0x350] sm:$0xff] }
  0xd7   :  { %3853 = vmatprep.subr.bf16.mxu0 %v3852_v30  ;;  %v3217_v8 = vld [vmem:[#allocation8] ss:$0 sm:$0xff]  ;;  %v3882_v17 = vpack.c.bf16 %v1073_v12, %v1071_v11  ;;  %v531_v26 = vld [vmem:[#allocation10] sm:$0xff]  ;;  %v533_v27 = vld [vmem:[#allocation10 + $0x10] sm:$0xff] }
  0xd8   :  { %3771 = vmatpush1.bf16.msra.mxu1 %v3770_v63  ;;  %v1068_v63 = vld [vmem:[#allocation13 + $0x328] sm:$0xff]  ;;  %v538_v29 = vld [vmem:[#allocation10 + $0x38] sm:$0xff]  ;;  %v3778_v30 = vpack.c.bf16 %v533_v27, %v531_v26  ;;  %v535_v32 = vld [vmem:[#allocation10 + $0x20] sm:$0xff] }
  0xd9   :  { %3773 = vmatprep.subr.bf16.mxu1 %v3772_v3  ;;  %v3876_v3 = vpack.c.bf16 %v1070_v1, %v1068_v63  ;;  %v536_v28 = vld [vmem:[#allocation10 + $0x28] sm:$0xff]  ;;  %v537_v33 = vld [vmem:[#allocation10 + $0x30] sm:$0xff]  ;;  %v539_v39 = vld [vmem:[#allocation10 + $0x40] sm:$0xff] }
  0xda   :  { %3855 = vmatpush1.bf16.msra.mxu0 %v3854_v35  ;;  %v3780_v31 = vpack.c.bf16 %v538_v29, %v536_v28  ;;  %v540_v35 = vld [vmem:[#allocation10 + $0x48] sm:$0xff]  ;;  %v3782_v37 = vpack.c.bf16 %v537_v33, %v535_v32  ;;  %v541_v40 = vld [vmem:[#allocation10 + $0x50] sm:$0xff]  ;;  %v546_v43 = vld [vmem:[#allocation10 + $0x78] sm:$0xff] }
  0xdb   :  { %3857 = vmatprep.subr.bf16.mxu0 %v3856_v36  ;;  %v542_v36 = vld [vmem:[#allocation10 + $0x58] sm:$0xff]  ;;  %v3786_v44 = vpack.c.bf16 %v541_v40, %v539_v39  ;;  %v543_v46 = vld [vmem:[#allocation10 + $0x60] sm:$0xff]  ;;  %v548_v49 = vld [vmem:[#allocation10 + $0x88] sm:$0xff] }
  0xdc   :  { %3775 = vmatpush1.bf16.msra.mxu1 %v3774_v6  ;;  %v1072_v6 = vld [vmem:[#allocation13 + $0x348] sm:$0xff]  ;;  %v3784_v38 = vpack.c.bf16 %v542_v36, %v540_v35  ;;  %v550_v50 = vld [vmem:[#allocation10 + $0x98] sm:$0xff]  ;;  %v787_v29 = vld [vmem:[#allocation10 + $0x220] sm:$0xff] }
  0xdd   :  { %3777 = vmatprep.subr.bf16.mxu1 %v3776_v9  ;;  %v3878_v9 = vpack.c.bf16 %v1069_v5, %v1067_v4  ;;  %v3880_v10 = vpack.c.bf16 %v1074_v7, %v1072_v6  ;;  %v3792_v52 = vpack.c.bf16 %v550_v50, %v548_v49  ;;  %v552_v56 = vld [vmem:[#allocation10 + $0xa8] sm:$0xff]  ;;  %v554_v57 = vld [vmem:[#allocation10 + $0xb8] sm:$0xff]  ;;  %v553_v61 = vld [vmem:[#allocation10 + $0xb0] sm:$0xff] }
  0xde   :  { %3859 = vmatpush1.bf16.msra.mxu0 %v3858_v41  ;;  %v556_v62 = vld [vmem:[#allocation10 + $0xc8] sm:$0xff]  ;;  %v558_v63 = vld [vmem:[#allocation10 + $0xd8] sm:$0xff]  ;;  %v557_v4 = vld [vmem:[#allocation10 + $0xd0] sm:$0xff] }
  0xdf   :  { %3861 = vmatprep.subr.bf16.mxu0 %v3860_v42  ;;  %v544_v42 = vld [vmem:[#allocation10 + $0x68] sm:$0xff]  ;;  %v562_v6 = vld [vmem:[#allocation10 + $0xf8] sm:$0xff]  ;;  %v791_v35 = vld [vmem:[#allocation10 + $0x240] sm:$0xff] }
  0xe0   :  { %v3788_v45 = vpack.c.bf16 %v546_v43, %v544_v42  ;;  %v560_v5 = vld [vmem:[#allocation10 + $0xe8] sm:$0xff]  ;;  %v786_v12 = vld [vmem:[#allocation10 + $0x218] sm:$0xff]  ;;  %v793_v36 = vld [vmem:[#allocation10 + $0x250] sm:$0xff] }
  0xe1   :  { %v784_v11 = vld [vmem:[#allocation10 + $0x208] sm:$0xff]  ;;  %v790_v26 = vld [vmem:[#allocation10 + $0x238] sm:$0xff]  ;;  %v3818_v39 = vpack.c.bf16 %v793_v36, %v791_v35  ;;  %v797_v40 = vld [vmem:[#allocation10 + $0x270] sm:$0xff] }
  0xe2   :  { %3863 = vmatpush1.bf16.msra.mxu0 %v3862_v47  ;;  %v545_v47 = vld [vmem:[#allocation10 + $0x70] sm:$0xff]  ;;  %v794_v32 = vld [vmem:[#allocation10 + $0x258] sm:$0xff]  ;;  %v808_v49 = vld [vmem:[#allocation10 + $0x2c8] sm:$0xff] }
  0xe3   :  { %3865 = vmatprep.subr.bf16.mxu0 %v3864_v48  ;;  %v3790_v51 = vpack.c.bf16 %v545_v47, %v543_v46  ;;  %v802_v42 = vld [vmem:[#allocation10 + $0x298] sm:$0xff]  ;;  %v1091_v35 = vld [vmem:[#allocation13 + $0x3e0] sm:$0xff] }
  0xe4   :  { %v806_v46 = vld [vmem:[#allocation10 + $0x2b8] sm:$0xff] }
  0xe5   :  { %v810_v50 = vld [vmem:[#allocation10 + $0x2d8] sm:$0xff] }
  0xe6   :  { %3867 = vmatpush1.bf16.msra.mxu0 %v3866_v53  ;;  %v547_v53 = vld [vmem:[#allocation10 + $0x80] sm:$0xff]  ;;  %v1093_v36 = vld [vmem:[#allocation13 + $0x3f0] sm:$0xff] }
  0xe7   :  { %3869 = vmatprep.subr.bf16.mxu0 %v3868_v54  ;;  %v549_v54 = vld [vmem:[#allocation10 + $0x90] sm:$0xff] }
  0xe8   :  { %v3794_v58 = vpack.c.bf16 %v549_v54, %v547_v53  ;;  %v807_v53 = vld [vmem:[#allocation10 + $0x2c0] sm:$0xff]  ;;  %v809_v54 = vld [vmem:[#allocation10 + $0x2d0] sm:$0xff] }
  0xea   :  { %3871 = vmatpush1.bf16.msra.mxu0 %v3870_v59  ;;  %v3796_v59 = vpack.c.bf16 %v554_v57, %v552_v56  ;;  %v814_v56 = vld [vmem:[#allocation10 + $0x2f8] sm:$0xff]  ;;  %v811_v57 = vld [vmem:[#allocation10 + $0x2e0] sm:$0xff] }
  0xeb   :  { %3873 = vmatprep.subr.bf16.mxu0 %v3872_v60  ;;  %v551_v60 = vld [vmem:[#allocation10 + $0xa0] sm:$0xff] }
  0xec   :  { %v3798_v1 = vpack.c.bf16 %v553_v61, %v551_v60 }
  0xee   :  { %3875 = vmatpush1.bf16.msra.mxu0 %v3874_v2  ;;  %v3800_v2 = vpack.c.bf16 %v558_v63, %v556_v62 }
  0xef   :  { %3877 = vmatprep.subr.bf16.mxu0 %v3876_v3  ;;  %v555_v3 = vld [vmem:[#allocation10 + $0xc0] sm:$0xff] }
  0xf0   :  { %v3802_v7 = vpack.c.bf16 %v557_v4, %v555_v3  ;;  %v1075_v4 = vld [vmem:[#allocation13 + $0x360] sm:$0xff] }
  0xf2   :  { %3879 = vmatpush1.bf16.msra.mxu0 %v3878_v9  ;;  %v559_v9 = vld [vmem:[#allocation10 + $0xe0] sm:$0xff] }
  0xf3   :  { %3881 = vmatprep.subr.bf16.mxu0 %v3880_v10  ;;  %v561_v10 = vld [vmem:[#allocation10 + $0xf0] sm:$0xff] }
  0xf6   :  { %3883 = vmatpush1.bf16.msra.mxu0 %v3882_v17  ;;  %v783_v17 = vld [vmem:[#allocation10 + $0x200] sm:$0xff] }
 0x1a0   :  { %v3716_v13 = vpop.f32.mrb[0].mxu0 }
 0x1a1   :  { %v4943_v14 = vadd.f32 %v3716_v13, %v3217_v8  ;;  %v485_v15 = vpop.f32.mrb[1].mxu0  ;;  %v3806_v13 = vpack.c.bf16 %v561_v10, %v559_v9  ;;  %v1079_v10 = vld [vmem:[#allocation13 + $0x380] sm:$0xff] }
 0x1a2   :  { %v4945_v16 = vadd.f32 %v3217_v8, %v485_v15  ;;  %v3808_v15 = vpack.c.bf16 %v786_v12, %v784_v11  ;;  %v1081_v11 = vld [vmem:[#allocation13 + $0x390] sm:$0xff] }
 0x1a3   :  { %v520_v18 = vmax.f32 %v4943_v14, 0.0  ;;  %v3890_v12 = vpack.c.bf16 %v1081_v11, %v1079_v10 }
 0x1a4   :  { %v519_v19 = vmax.f32 %v4945_v16, 0.0  ;;  %v3719_v20 = vpop.f32.mrb[2].mxu0 }
 0x1a5   :  { %524 = vst [vmem:[#allocation2 + $0x8] sm:$0xff] %v520_v18  ;;  %v4951_v21 = vadd.f32 %v3719_v20, %v3217_v8  ;;  %v495_v22 = vpop.f32.mrb[3].mxu0  ;;  %v785_v20 = vld [vmem:[#allocation10 + $0x210] sm:$0xff] }
 0x1a6   :  { %523 = vst [vmem:[#allocation2] sm:$0xff] %v519_v19  ;;  %v4955_v23 = vadd.f32 %v3217_v8, %v495_v22  ;;  %v3804_v8 = vpack.c.bf16 %v562_v6, %v560_v5  ;;  %v788_v22 = vld [vmem:[#allocation10 + $0x228] sm:$0xff]  ;;  %v3810_v27 = vpack.c.bf16 %v785_v20, %v783_v17  ;;  %v1077_v5 = vld [vmem:[#allocation13 + $0x370] sm:$0xff] }
 0x1a7   :  { %v522_v24 = vmax.f32 %v4951_v21, 0.0  ;;  %v3812_v28 = vpack.c.bf16 %v790_v26, %v788_v22  ;;  %v3834_v21 = vpack.c.bf16 %v809_v54, %v807_v53  ;;  %v3886_v6 = vpack.c.bf16 %v1077_v5, %v1075_v4  ;;  %v1083_v17 = vld [vmem:[#allocation13 + $0x3a0] sm:$0xff]  ;;  %v1085_v20 = vld [vmem:[#allocation13 + $0x3b0] sm:$0xff]  ;;  %v1088_v26 = vld [vmem:[#allocation13 + $0x3c8] sm:$0xff] }
 0x1a8   :  { %v521_v25 = vmax.f32 %v4955_v23, 0.0  ;;  %v3894_v22 = vpack.c.bf16 %v1085_v20, %v1083_v17  ;;  %v963_v4 = vld [vmem:[#allocation13 + $0x38] sm:$0xff]  ;;  %v962_v17 = vld [vmem:[#allocation13 + $0x30] sm:$0xff] }
 0x1a9   :  { %526 = vst [vmem:[#allocation2 + $0x18] sm:$0xff] %v522_v24 }
 0x1aa   :  { %525 = vst [vmem:[#allocation2 + $0x10] sm:$0xff] %v521_v25 }
 0x1ad   :  { %v563_v34 = vld [vmem:[#allocation2 + $0x1] sm:$0xff] }
 0x1ae   :  { %665 = vmatmul.mubr.f32.vlgmr.msra.gmra.mrb[0].mxu1 %v563_v34  ;;  %v778_v60 = vld [vmem:[#allocation2 + $0x2] sm:$0xff] }
 0x1af   :  { %3779 = vmatpush1.bf16.msra.mxu1 %v3778_v30  ;;  %670 = vmatprep.mubr.f32.mxu1 %v4689_v0  ;;  %v789_v30 = vld [vmem:[#allocation10 + $0x230] sm:$0xff] }
 0x1b0   :  { %3781 = vmatprep.subr.bf16.mxu1 %v3780_v31  ;;  %v566_v55 = vld [vmem:[#allocation2 + $0x19] sm:$0xff]  ;;  %v3814_v33 = vpack.c.bf16 %v789_v30, %v787_v29  ;;  %v1087_v29 = vld [vmem:[#allocation13 + $0x3c0] sm:$0xff] }
 0x1b1   :  { %v564_v41 = vld [vmem:[#allocation2 + $0x9] sm:$0xff]  ;;  %v565_v48 = vld [vmem:[#allocation2 + $0x11] sm:$0xff]  ;;  %v781_v63 = vld [vmem:[#allocation2 + $0x1a] sm:$0xff] }
 0x1b2   :  { %671 = vmatmul.mubr.f32.gmra.mrb[2].mxu1 %v564_v41  ;;  %v792_v31 = vld [vmem:[#allocation10 + $0x248] sm:$0xff]  ;;  %v779_v61 = vld [vmem:[#allocation2 + $0xa] sm:$0xff]  ;;  %v1089_v30 = vld [vmem:[#allocation13 + $0x3d0] sm:$0xff] }
 0x1b3   :  { %3783 = vmatpush1.bf16.msra.mxu1 %v3782_v37  ;;  %676 = vmatprep.mubr.f32.mxu1 %v4689_v0  ;;  %v3816_v34 = vpack.c.bf16 %v794_v32, %v792_v31  ;;  %v796_v37 = vld [vmem:[#allocation10 + $0x268] sm:$0xff]  ;;  %v3898_v31 = vpack.c.bf16 %v1089_v30, %v1087_v29 }
 0x1b4   :  { %3785 = vmatprep.subr.bf16.mxu1 %v3784_v38  ;;  %v798_v38 = vld [vmem:[#allocation10 + $0x278] sm:$0xff]  ;;  %v800_v41 = vld [vmem:[#allocation10 + $0x288] sm:$0xff] }
 0x1b5   :  { %v3820_v16 = vpack.c.bf16 %v798_v38, %v796_v37  ;;  %v3824_v14 = vpack.c.bf16 %v802_v42, %v800_v41  ;;  %v780_v62 = vld [vmem:[#allocation2 + $0x12] sm:$0xff]  ;;  %v3902_v37 = vpack.c.bf16 %v1093_v36, %v1091_v35  ;;  %v912_v42 = vld [vmem:[#allocation11] sm:$0x3] }
 0x1b6   :  { %677 = vmatmul.mubr.f32.gmra.mrb[4].mxu1 %v565_v48  ;;  %v805_v48 = vld [vmem:[#allocation10 + $0x2b0] sm:$0xff] }
 0x1b7   :  { %3787 = vmatpush1.bf16.msra.mxu1 %v3786_v44  ;;  %682 = vmatprep.mubr.f32.mxu1 %v4689_v0  ;;  %v801_v44 = vld [vmem:[#allocation10 + $0x290] sm:$0xff] }
 0x1b8   :  { %3789 = vmatprep.subr.bf16.mxu1 %v3788_v45  ;;  %v804_v45 = vld [vmem:[#allocation10 + $0x2a8] sm:$0xff] }
 0x1b9   :  { %v3828_v23 = vpack.c.bf16 %v806_v46, %v804_v45  ;;  %v1092_v32 = vld [vmem:[#allocation13 + $0x3e8] sm:$0xff] }
 0x1ba   :  { %683 = vmatmul.mubr.f32.gmra.mrb[6].mxu1 %v566_v55  ;;  %v812_v55 = vld [vmem:[#allocation10 + $0x2e8] sm:$0xff] }
 0x1bb   :  { %3791 = vmatpush1.bf16.msra.mxu1 %v3790_v51  ;;  %753 = vmatprep.mubr.f32.mxu1 %v4689_v0  ;;  %v957_v38 = vld [vmem:[#allocation13 + $0x8] sm:$0xff] }
 0x1bc   :  { %3793 = vmatprep.subr.bf16.mxu1 %v3792_v52  ;;  %v3832_v52 = vpack.c.bf16 %v810_v50, %v808_v49 }
 0x1bf   :  { %3795 = vmatpush1.bf16.msra.mxu1 %v3794_v58  ;;  %v813_v58 = vld [vmem:[#allocation10 + $0x2f0] sm:$0xff] }
 0x1c0   :  { %3797 = vmatprep.subr.bf16.mxu1 %v3796_v59  ;;  %v3838_v59 = vpack.c.bf16 %v813_v58, %v811_v57 }
 0x1c3   :  { %3799 = vmatpush1.bf16.msra.mxu1 %v3798_v1  ;;  %v1076_v1 = vld [vmem:[#allocation13 + $0x368] sm:$0xff] }
 0x1c4   :  { %3801 = vmatprep.subr.bf16.mxu1 %v3800_v2  ;;  %v1078_v2 = vld [vmem:[#allocation13 + $0x378] sm:$0xff] }
 0x1c5   :  { %v3884_v3 = vpack.c.bf16 %v1078_v2, %v1076_v1 }
 0x1c7   :  { %3803 = vmatpush1.bf16.msra.mxu1 %v3802_v7  ;;  %3885 = vmatprep.subr.bf16.mxu0 %v3884_v3  ;;  %v1080_v7 = vld [vmem:[#allocation13 + $0x388] sm:$0xff] }
 0x1c8   :  { %3805 = vmatprep.subr.bf16.mxu1 %v3804_v8  ;;  %3887 = vmatpush1.bf16.msra.mxu0 %v3886_v6  ;;  %v1082_v8 = vld [vmem:[#allocation13 + $0x398] sm:$0xff]  ;;  %v961_v3 = vld [vmem:[#allocation13 + $0x28] sm:$0xff] }
 0x1c9   :  { %v3888_v9 = vpack.c.bf16 %v1082_v8, %v1080_v7 }
 0x1cb   :  { %3807 = vmatpush1.bf16.msra.mxu1 %v3806_v13  ;;  %3889 = vmatprep.subr.bf16.mxu0 %v3888_v9  ;;  %v1084_v13 = vld [vmem:[#allocation13 + $0x3a8] sm:$0xff] }
 0x1cc   :  { %3809 = vmatprep.subr.bf16.mxu1 %v3808_v15  ;;  %3891 = vmatpush1.bf16.msra.mxu0 %v3890_v12 }
 0x1ce   :  { %754 = vmatmul.mubr.f32.vlgmr.msra.gmra.mrb[0].mxu1 %v519_v19  ;;  %v795_v19 = vld [vmem:[#allocation10 + $0x260] sm:$0xff] }
 0x1cf   :  { %3811 = vmatpush1.bf16.msra.mxu1 %v3810_v27  ;;  %759 = vmatprep.mubr.f32.mxu1 %v4689_v0  ;;  %v3822_v43 = vpack.c.bf16 %v797_v40, %v795_v19  ;;  %v1090_v27 = vld [vmem:[#allocation13 + $0x3d8] sm:$0xff]  ;;  %v914_v19 = vlaneseq }
 0x1d0   :  { %3813 = vmatprep.subr.bf16.mxu1 %v3812_v28  ;;  %v3896_v28 = vpack.c.bf16 %v1090_v27, %v1088_v26  ;;  %v965_v26 = vld [vmem:[#allocation13 + $0x48] sm:$0xff]  ;;  %v967_v27 = vld [vmem:[#allocation13 + $0x58] sm:$0xff] }
 0x1d1   :  { %v4982_v40 = vshrl.u32 %v914_v19, 7  ;;  %v1028_v19 = vld [vmem:[#allocation3 + $0x40] sm:$0x1] }
 0x1d2   :  { %760 = vmatmul.mubr.f32.gmra.mrb[2].mxu1 %v520_v18  ;;  %v799_v18 = vld [vmem:[#allocation10 + $0x280] sm:$0xff] }
 0x1d3   :  { %3815 = vmatpush1.bf16.msra.mxu1 %v3814_v33  ;;  %765 = vmatprep.mubr.f32.mxu1 %v4689_v0  ;;  %v3826_v47 = vpack.c.bf16 %v801_v44, %v799_v18  ;;  %v1094_v33 = vld [vmem:[#allocation13 + $0x3f8] sm:$0xff]  ;;  %v916_v41 = vsub.s32 0, %v4982_v40 }
 0x1d4   :  { %3817 = vmatprep.subr.bf16.mxu1 %v3816_v34  ;;  %v3900_v34 = vpack.c.bf16 %v1094_v33, %v1092_v32  ;;  %v3912_v32 = vpack.c.bf16 %v967_v27, %v965_v26  ;;  %v964_v33 = vld [vmem:[#allocation13 + $0x40] sm:$0xff] }
 0x1d5   :  { %v980_v27 = vld [vmem:[#allocation13 + $0xc0] sm:$0xff] }
 0x1d6   :  { %766 = vmatmul.mubr.f32.gmra.mrb[4].mxu1 %v521_v25  ;;  %v803_v25 = vld [vmem:[#allocation10 + $0x2a0] sm:$0xff] }
 0x1d7   :  { %3819 = vmatpush1.bf16.msra.mxu1 %v3818_v39  ;;  %771 = vmatprep.mubr.f32.mxu1 %v4689_v0  ;;  %v3830_v51 = vpack.c.bf16 %v805_v48, %v803_v25  ;;  %v959_v39 = vld [vmem:[#allocation13 + $0x18] sm:$0xff] }
 0x1d8   :  { %3821 = vmatprep.subr.bf16.mxu1 %v3820_v16  ;;  %v3904_v16 = vpack.c.bf16 %v959_v39, %v957_v38  ;;  %v971_v38 = vld [vmem:[#allocation13 + $0x78] sm:$0xff] }
 0x1da   :  { %772 = vmatmul.mubr.f32.gmra.mrb[6].mxu1 %v522_v24  ;;  %v3836_v24 = vpack.c.bf16 %v814_v56, %v812_v55 }
 0x1db   :  { %3823 = vmatpush1.bf16.msra.mxu1 %v3822_v43  ;;  %879 = vmatprep.mubr.f32.mxu1 %v4689_v0  ;;  %v920_v43 = vsub.s32 1, %v4982_v40 }
 0x1dc   :  { %3825 = vmatprep.subr.bf16.mxu1 %v3824_v14  ;;  %v917_v14 = vrot.slane %v912_v42, %v916_v41 }
 0x1dd   :  { %v921_v18 = vrot.slane %v912_v42, %v920_v43 }
 0x1df   :  { %3827 = vmatpush1.bf16.msra.mxu1 %v3826_v47 }
 0x1e0   :  { %3829 = vmatprep.subr.bf16.mxu1 %v3828_v23 }
 0x1e3   :  { %3831 = vmatpush1.bf16.msra.mxu1 %v3830_v51 }
 0x1e4   :  { %3833 = vmatprep.subr.bf16.mxu1 %v3832_v52 }
 0x1e7   :  { %3835 = vmatpush1.bf16.msra.mxu1 %v3834_v21 }
 0x1e8   :  { %3837 = vmatprep.subr.bf16.mxu1 %v3836_v24 }
 0x1eb   :  { %3839 = vmatpush1.bf16.msra.mxu1 %v3838_v59 }
 0x1ee   :  { %880 = vmatmul.mubr.f32.vlgmr.msra.gmra.mrb[0].mxu1 %v778_v60  ;;  %v956_v60 = vld [vmem:[#allocation13] sm:$0xff] }
 0x1ef   :  { %885 = vmatprep.mubr.f32.mxu1 %v4689_v0 }
 0x1f2   :  { %886 = vmatmul.mubr.f32.gmra.mrb[2].mxu1 %v779_v61  ;;  %v958_v61 = vld [vmem:[#allocation13 + $0x10] sm:$0xff] }
 0x1f3   :  { %891 = vmatprep.mubr.f32.mxu1 %v4689_v0  ;;  %v3906_v11 = vpack.c.bf16 %v958_v61, %v956_v60  ;;  %v979_v60 = vld [vmem:[#allocation13 + $0xb8] sm:$0xff]  ;;  %v1604_v61 = vld [vmem:[#allocation16 + $0x180] sm:$0xff] }
 0x1f6   :  { %892 = vmatmul.mubr.f32.gmra.mrb[4].mxu1 %v780_v62 }
 0x1f7   :  { %897 = vmatprep.mubr.f32.mxu1 %v4689_v0  ;;  %v1086_v0 = vld [vmem:[#allocation13 + $0x3b8] sm:$0xff] }
 0x1f8   :  { %v3892_v15 = vpack.c.bf16 %v1086_v0, %v1084_v13  ;;  %v3908_v0 = vpack.c.bf16 %v963_v4, %v961_v3  ;;  %v1589_v3 = vld [vmem:[#allocation16 + $0x108] sm:$0xff] }
 0x1fa   :  { %898 = vmatmul.mubr.f32.gmra.mrb[6].mxu1 %v781_v63  ;;  %3893 = vmatprep.subr.bf16.mxu0 %v3892_v15  ;;  %v960_v15 = vld [vmem:[#allocation13 + $0x20] sm:$0xff] }
 0x1fb   :  { %3895 = vmatpush1.bf16.msra.mxu0 %v3894_v22  ;;  %v3910_v30 = vpack.c.bf16 %v962_v17, %v960_v15  ;;  %v1590_v15 = vld [vmem:[#allocation16 + $0x110] sm:$0xff]  ;;  %v1591_v17 = vld [vmem:[#allocation16 + $0x118] sm:$0xff] }
 0x1fc   :  { %3897 = vmatprep.subr.bf16.mxu0 %v3896_v28 }
 0x1ff   :  { %3899 = vmatpush1.bf16.msra.mxu0 %v3898_v31  ;;  %v1029_v31 = vld [vmem:[#allocation3 + $0x48] sm:$0x1] }
 0x200   :  { %3901 = vmatprep.subr.bf16.mxu0 %v3900_v34  ;;  %v966_v34 = vld [vmem:[#allocation13 + $0x50] sm:$0xff] }
 0x201   :  { %v3914_v42 = vpack.c.bf16 %v966_v34, %v964_v33  ;;  %v1593_v33 = vld [vmem:[#allocation16 + $0x128] sm:$0xff] }
 0x203   :  { %3903 = vmatpush1.bf16.msra.mxu0 %v3902_v37  ;;  %v969_v37 = vld [vmem:[#allocation13 + $0x68] sm:$0xff] }
 0x204   :  { %3905 = vmatprep.subr.bf16.mxu0 %v3904_v16  ;;  %v1122_v16 = vrot.slane %v1029_v31, 1  ;;  %v985_v31 = vld [vmem:[#allocation13 + $0xe8] sm:$0xff] }
 0x2c1   :  { %v881_v44 = vpop.f32.mrb[0].mxu1 }
 0x2c2   :  { %v4990_v45 = vadd.f32 %v917_v14, %v881_v44  ;;  %v883_v46 = vpop.f32.mrb[1].mxu1  ;;  %v970_v44 = vld [vmem:[#allocation13 + $0x70] sm:$0xff] }
 0x2c3   :  { %v4992_v47 = vadd.f32 %v921_v18, %v883_v46 }
 0x2c4   :  { %v932_v23 = vmax.f32 %v4990_v45, 0.0 }
 0x2c5   :  { %v933_v25 = vmax.f32 %v4992_v47, 0.0  ;;  %v887_v48 = vpop.f32.mrb[2].mxu1 }
 0x2c6   :  { %940 = vst [vmem:[#allocation3] sm:$0xff] %v932_v23  ;;  %v926_v49 = vadd.f32 %v917_v14, %v887_v48  ;;  %v889_v50 = vpop.f32.mrb[3].mxu1  ;;  %v1120_v48 = vrot.slane %v1028_v19, 1 }
 0x2c7   :  { %941 = vst [vmem:[#allocation3 + $0x8] sm:$0xff] %v933_v25  ;;  %v927_v51 = vadd.f32 %v921_v18, %v889_v50  ;;  %v975_v50 = vld [vmem:[#allocation13 + $0x98] sm:$0xff] }
 0x2c8   :  { %v5000_v52 = vmax.f32 %v926_v49, 0.0  ;;  %v973_v49 = vld [vmem:[#allocation13 + $0x88] sm:$0xff] }
 0x2c9   :  { %v5002_v53 = vmax.f32 %v927_v51, 0.0  ;;  %v893_v54 = vpop.f32.mrb[4].mxu1 }
 0x2ca   :  { %v928_v55 = vadd.f32 %v917_v14, %v893_v54  ;;  %v895_v56 = vpop.f32.mrb[5].mxu1  ;;  %v1107_v10 = vrot.slane %v5000_v52, 1 }
 0x2cb   :  { %v929_v21 = vadd.f32 %v921_v18, %v895_v56  ;;  %v1110_v7 = vrot.slane %v5002_v53, 1  ;;  %v972_v56 = vld [vmem:[#allocation13 + $0x80] sm:$0xff] }
 0x2cc   :  { %v5004_v24 = vmax.f32 %v928_v55, 0.0  ;;  %v3920_v55 = vpack.c.bf16 %v975_v50, %v973_v49  ;;  %v992_v50 = vld [vmem:[#allocation13 + $0x120] sm:$0xff] }
 0x2cd   :  { %v5006_v57 = vmax.f32 %v929_v21, 0.0  ;;  %v899_v58 = vpop.f32.mrb[6].mxu1  ;;  %v1020_v59 = vld [vmem:[#allocation3] sm:$0xfe]  ;;  %v974_v21 = vld [vmem:[#allocation13 + $0x90] sm:$0xff] }
 0x2ce   :  { %v930_v62 = vadd.f32 %v917_v14, %v899_v58  ;;  %v901_v63 = vpop.f32.mrb[7].mxu1  ;;  %v1021_v1 = vld [vmem:[#allocation3 + $0x8] sm:$0xfe]  ;;  %v1106_v2 = vrot.slane %v1020_v59, 1  ;;  %v1112_v22 = vrot.slane %v5004_v24, 1  ;;  %v3916_v14 = vpack.c.bf16 %v971_v38, %v969_v37  ;;  %v986_v38 = vld [vmem:[#allocation13 + $0xf0] sm:$0xff] }
 0x2cf   :  { %v931_v5 = vadd.f32 %v921_v18, %v901_v63  ;;  %v1109_v6 = vrot.slane %v1021_v1, 1  ;;  %v1114_v8 = vrot.slane %v5006_v57, 1  ;;  %v968_v18 = vld [vmem:[#allocation13 + $0x60] sm:$0xff]  ;;  %v977_v59 = vld [vmem:[#allocation13 + $0xa8] sm:$0xff]  ;;  %v3922_v63 = vpack.c.bf16 %v974_v21, %v972_v56 }
 0x2d0   :  { %v5010_v9 = vmax.f32 %v930_v62, 0.0  ;;  %v1108_v20 = vsel %vm1105_vm1, %v1106_v2, %v1107_v10  ;;  %v1113_v35 = vsel %vm1105_vm1, %v1107_v10, %v1112_v22  ;;  %v3918_v54 = vpack.c.bf16 %v970_v44, %v968_v18  ;;  %v1605_v62 = vld [vmem:[#allocation16 + $0x188] sm:$0xff]  ;;  %v1588_v2 = vld [vmem:[#allocation16 + $0x100] sm:$0xff] }
 0x2d1   :  { %v5013_v12 = vmax.f32 %v931_v5, 0.0  ;;  %v1111_v13 = vsel %vm1105_vm1, %v1109_v6, %v1110_v7  ;;  %v1115_v28 = vsel %vm1105_vm1, %v1110_v7, %v1114_v8  ;;  %v4032_v1 = vpack.c.bf16 %v1605_v62, %v1604_v61  ;;  %v976_v5 = vld [vmem:[#allocation13 + $0xa0] sm:$0xff]  ;;  %v978_v6 = vld [vmem:[#allocation13 + $0xb0] sm:$0xff]  ;;  %v981_v10 = vld [vmem:[#allocation13 + $0xc8] sm:$0xff] }
 0x2d2   :  { %1196 = vmatprep.mubr.f32.mxu0 %v1111_v13  ;;  %v1116_v36 = vrot.slane %v5010_v9, 1  ;;  %v3924_v4 = vpack.c.bf16 %v979_v60, %v977_v59  ;;  %v4034_v7 = vpack.c.bf16 %v1589_v3, %v1588_v2  ;;  %v1607_v13 = vld [vmem:[#allocation16 + $0x198] sm:$0xff]  ;;  %v3926_v47 = vpack.c.bf16 %v978_v6, %v976_v5  ;;  %v990_v18 = vld [vmem:[#allocation13 + $0x110] sm:$0xff]  ;;  %v993_v44 = vld [vmem:[#allocation13 + $0x128] sm:$0xff] }
 0x2d3   :  { %1197 = vmatmul.mubr.f32.vlgmr.msra.gmra.mrb[4].mxu0 %v1108_v20  ;;  %v1118_v29 = vrot.slane %v5013_v12, 1  ;;  %4033 = vmatprep.subr.bf16.mxu1 %v4032_v1  ;;  %v1608_v20 = vld [vmem:[#allocation16 + $0x1a0] sm:$0xff]  ;;  %v998_v59 = vld [vmem:[#allocation13 + $0x150] sm:$0xff]  ;;  %v1003_v61 = vld [vmem:[#allocation13 + $0x178] sm:$0xff] }
 0x2d4   :  { %3907 = vmatpush1.bf16.msra.mxu0 %v3906_v11  ;;  %1202 = vmatprep.mubr.f32.mxu0 %v1115_v28  ;;  %v1117_v46 = vsel %vm1105_vm1, %v1112_v22, %v1116_v36  ;;  %v1121_v58 = vsel %vm1105_vm1, %v1116_v36, %v1120_v48  ;;  %v983_v11 = vld [vmem:[#allocation13 + $0xd8] sm:$0xff]  ;;  %v1609_v22 = vld [vmem:[#allocation16 + $0x1a8] sm:$0xff]  ;;  %v984_v37 = vld [vmem:[#allocation13 + $0xe0] sm:$0xff] }
 0x2d5   :  { %3909 = vmatprep.subr.bf16.mxu0 %v3908_v0  ;;  %v1119_v39 = vsel %vm1105_vm1, %v1114_v8, %v1118_v29  ;;  %v1123_v51 = vsel %vm1105_vm1, %v1118_v29, %v1122_v16  ;;  %v1606_v8 = vld [vmem:[#allocation16 + $0x190] sm:$0xff]  ;;  %4035 = vmatpush3.bf16.msra.mxu1 %v4034_v7  ;;  %v3928_v26 = vpack.c.bf16 %v983_v11, %v981_v10  ;;  %v1001_v60 = vld [vmem:[#allocation13 + $0x168] sm:$0xff]  ;;  %v1000_v1 = vld [vmem:[#allocation13 + $0x160] sm:$0xff] }
 0x2d6   :  { %v4036_v0 = vpack.c.bf16 %v1607_v13, %v1606_v8  ;;  %v982_v28 = vld [vmem:[#allocation13 + $0xd0] sm:$0xff]  ;;  %v4040_v29 = vpack.c.bf16 %v1609_v22, %v1608_v20  ;;  %v991_v16 = vld [vmem:[#allocation13 + $0x118] sm:$0xff]  ;;  %v3934_v19 = vpack.c.bf16 %v986_v38, %v984_v37  ;;  %v1005_v3 = vld [vmem:[#allocation13 + $0x188] sm:$0xff] }
 0x2d7   :  { %1203 = vmatmul.mubr.f32.gmra.mrb[6].mxu0 %v1113_v35  ;;  %v3930_v35 = vpack.c.bf16 %v982_v28, %v980_v27  ;;  %v1002_v2 = vld [vmem:[#allocation13 + $0x170] sm:$0xff]  ;;  %v1004_v7 = vld [vmem:[#allocation13 + $0x180] sm:$0xff]  ;;  %v1009_v10 = vld [vmem:[#allocation13 + $0x1a8] sm:$0xff] }
 0x2d8   :  { %3911 = vmatpush1.bf16.msra.mxu0 %v3910_v30  ;;  %1208 = vmatprep.mubr.f32.mxu0 %v1119_v39  ;;  %v1592_v30 = vld [vmem:[#allocation16 + $0x120] sm:$0xff]  ;;  %v3950_v5 = vpack.c.bf16 %v1002_v2, %v1000_v1  ;;  %v1006_v8 = vld [vmem:[#allocation13 + $0x190] sm:$0xff]  ;;  %v1011_v11 = vld [vmem:[#allocation13 + $0x1b8] sm:$0xff]  ;;  %v1388_v1 = vrot.slane %v5002_v53, 2 }
 0x2d9   :  { %3913 = vmatprep.subr.bf16.mxu0 %v3912_v32  ;;  %4037 = vmatprep.subr.bf16.mxu1 %v4036_v0  ;;  %v987_v32 = vld [vmem:[#allocation13 + $0xf8] sm:$0xff]  ;;  %v4042_v34 = vpack.c.bf16 %v1593_v33, %v1592_v30  ;;  %v989_v39 = vld [vmem:[#allocation13 + $0x108] sm:$0xff]  ;;  %v3954_v13 = vpack.c.bf16 %v1006_v8, %v1004_v7  ;;  %v3956_v0 = vpack.c.bf16 %v1011_v11, %v1009_v10  ;;  %v1014_v27 = vld [vmem:[#allocation13 + $0x1d0] sm:$0xff] }
 0x2da   :  { %v3932_v36 = vpack.c.bf16 %v987_v32, %v985_v31  ;;  %v1017_v28 = vld [vmem:[#allocation13 + $0x1e8] sm:$0xff]  ;;  %v1016_v32 = vld [vmem:[#allocation13 + $0x1e0] sm:$0xff]  ;;  %v1018_v33 = vld [vmem:[#allocation13 + $0x1f0] sm:$0xff] }
 0x2db   :  { %1209 = vmatmul.mubr.f32.gmra.mrb[8].mxu0 %v1117_v46  ;;  %v995_v46 = vld [vmem:[#allocation13 + $0x138] sm:$0xff]  ;;  %v1315_v38 = vld [vmem:[#allocation13 + $0x400] sm:$0xff] }
 0x2dc   :  { %3915 = vmatpush1.bf16.msra.mxu0 %v3914_v42  ;;  %1214 = vmatprep.mubr.f32.mxu0 %v1123_v51  ;;  %v3936_v42 = vpack.c.bf16 %v991_v16, %v989_v39  ;;  %v3940_v49 = vpack.c.bf16 %v995_v46, %v993_v44  ;;  %v994_v51 = vld [vmem:[#allocation13 + $0x130] sm:$0xff]  ;;  %v1320_v16 = vld [vmem:[#allocation13 + $0x428] sm:$0xff]  ;;  %v1335_v11 = vld [vmem:[#allocation13 + $0x4a0] sm:$0xff] }
 0x2dd   :  { %3917 = vmatprep.subr.bf16.mxu0 %v3916_v14  ;;  %v988_v14 = vld [vmem:[#allocation13 + $0x100] sm:$0xff]  ;;  %v3942_v56 = vpack.c.bf16 %v994_v51, %v992_v50  ;;  %v1317_v39 = vld [vmem:[#allocation13 + $0x410] sm:$0xff]  ;;  %v1324_v46 = vld [vmem:[#allocation13 + $0x448] sm:$0xff] }
 0x2de   :  { %v3938_v48 = vpack.c.bf16 %v990_v18, %v988_v14  ;;  %v1319_v18 = vld [vmem:[#allocation13 + $0x420] sm:$0xff]  ;;  %v1321_v44 = vld [vmem:[#allocation13 + $0x430] sm:$0xff] }
 0x2df   :  { %1215 = vmatmul.mubr.f32.gmra.mrb[10].mxu0 %v1121_v58  ;;  %v996_v58 = vld [vmem:[#allocation13 + $0x140] sm:$0xff] }
 0x2e0   :  { %3919 = vmatpush1.bf16.msra.mxu0 %v3918_v54  ;;  %1285 = vmatprep.mubr.f32.mxu0 %v933_v25  ;;  %v4038_v25 = vpack.c.bf16 %v1591_v17, %v1590_v15  ;;  %v997_v54 = vld [vmem:[#allocation13 + $0x148] sm:$0xff]  ;;  %v3946_v62 = vpack.c.bf16 %v998_v59, %v996_v58  ;;  %v1008_v15 = vld [vmem:[#allocation13 + $0x1a0] sm:$0xff]  ;;  %v1010_v17 = vld [vmem:[#allocation13 + $0x1b0] sm:$0xff] }
 0x2e1   :  { %3921 = vmatprep.subr.bf16.mxu0 %v3920_v55  ;;  %v999_v55 = vld [vmem:[#allocation13 + $0x158] sm:$0xff]  ;;  %v3958_v20 = vpack.c.bf16 %v1010_v17, %v1008_v15  ;;  %v1323_v51 = vld [vmem:[#allocation13 + $0x440] sm:$0xff]  ;;  %v1329_v59 = vld [vmem:[#allocation13 + $0x470] sm:$0xff] }
 0x2e2   :  { %4039 = vmatpush3.bf16.msra.mxu1 %v4038_v25  ;;  %v3944_v21 = vpack.c.bf16 %v999_v55, %v997_v54  ;;  %v1015_v25 = vld [vmem:[#allocation13 + $0x1d8] sm:$0xff]  ;;  %v1325_v54 = vld [vmem:[#allocation13 + $0x450] sm:$0xff]  ;;  %v1328_v55 = vld [vmem:[#allocation13 + $0x468] sm:$0xff] }
 0x2e3   :  { %4041 = vmatprep.subr.bf16.mxu1 %v4040_v29  ;;  %v1019_v29 = vld [vmem:[#allocation13 + $0x1f8] sm:$0xff]  ;;  %v1311_v58 = vld [vmem:[#allocation3 + $0x8] sm:$0xfc] }
 0x2e4   :  { %3923 = vmatpush1.bf16.msra.mxu0 %v3922_v63  ;;  %v3948_v63 = vpack.c.bf16 %v1003_v61, %v1001_v60  ;;  %v3964_v31 = vpack.c.bf16 %v1019_v29, %v1017_v28  ;;  %v1332_v60 = vld [vmem:[#allocation13 + $0x488] sm:$0xff]  ;;  %v1334_v61 = vld [vmem:[#allocation13 + $0x498] sm:$0xff]  ;;  %v1343_v29 = vld [vmem:[#allocation13 + $0x4e0] sm:$0xff] }
 0x2e5   :  { %3925 = vmatprep.subr.bf16.mxu0 %v3924_v4  ;;  %v1007_v4 = vld [vmem:[#allocation13 + $0x198] sm:$0xff]  ;;  %v3984_v2 = vpack.c.bf16 %v1334_v61, %v1332_v60  ;;  %v1363_v60 = vld [vmem:[#allocation13 + $0x580] sm:$0xff]  ;;  %v1365_v61 = vld [vmem:[#allocation13 + $0x590] sm:$0xff] }
 0x2e6   :  { %4043 = vmatpush3.bf16.msra.mxu1 %v4042_v34  ;;  %v3952_v6 = vpack.c.bf16 %v1007_v4, %v1005_v3  ;;  %v1316_v34 = vld [vmem:[#allocation13 + $0x408] sm:$0xff]  ;;  %v1331_v3 = vld [vmem:[#allocation13 + $0x480] sm:$0xff]  ;;  %v1333_v4 = vld [vmem:[#allocation13 + $0x490] sm:$0xff] }
 0x2e7   :  { %v3986_v8 = vpack.c.bf16 %v1333_v4, %v1331_v3  ;;  %v1342_v15 = vld [vmem:[#allocation13 + $0x4d8] sm:$0xff]  ;;  %v1367_v4 = vld [vmem:[#allocation13 + $0x5a0] sm:$0xff] }
 0x2e8   :  { %3927 = vmatpush1.bf16.msra.mxu0 %v3926_v47  ;;  %v1013_v47 = vld [vmem:[#allocation13 + $0x1c8] sm:$0xff] }
 0x2e9   :  { %3929 = vmatprep.subr.bf16.mxu0 %v3928_v26  ;;  %v3960_v22 = vpack.c.bf16 %v1015_v25, %v1013_v47  ;;  %v1012_v26 = vld [vmem:[#allocation13 + $0x1c0] sm:$0xff] }
 0x2ea   :  { %v3962_v30 = vpack.c.bf16 %v1014_v27, %v1012_v26  ;;  %v1339_v25 = vld [vmem:[#allocation13 + $0x4c0] sm:$0xff]  ;;  %v1346_v26 = vld [vmem:[#allocation13 + $0x4f8] sm:$0xff] }
 0x2ec   :  { %3931 = vmatpush1.bf16.msra.mxu0 %v3930_v35  ;;  %v1318_v35 = vld [vmem:[#allocation13 + $0x418] sm:$0xff] }
 0x2ed   :  { %3933 = vmatprep.subr.bf16.mxu0 %v3932_v36  ;;  %v3966_v36 = vpack.c.bf16 %v1018_v33, %v1016_v32  ;;  %v3968_v37 = vpack.c.bf16 %v1318_v35, %v1316_v34  ;;  %v1350_v32 = vld [vmem:[#allocation13 + $0x518] sm:$0xff]  ;;  %v1347_v35 = vld [vmem:[#allocation13 + $0x500] sm:$0xff] }
 0x2f0   :  { %3935 = vmatpush1.bf16.msra.mxu0 %v3934_v19  ;;  %v1322_v19 = vld [vmem:[#allocation13 + $0x438] sm:$0xff] }
 0x2f1   :  { %3937 = vmatprep.subr.bf16.mxu0 %v3936_v42  ;;  %v3970_v42 = vpack.c.bf16 %v1317_v39, %v1315_v38  ;;  %v3972_v14 = vpack.c.bf16 %v1322_v19, %v1320_v16  ;;  %v1354_v38 = vld [vmem:[#allocation13 + $0x538] sm:$0xff]  ;;  %v1351_v19 = vld [vmem:[#allocation13 + $0x520] sm:$0xff] }
 0x2f4   :  { %3939 = vmatpush1.bf16.msra.mxu0 %v3938_v48  ;;  %v1326_v48 = vld [vmem:[#allocation13 + $0x458] sm:$0xff] }
 0x2f5   :  { %3941 = vmatprep.subr.bf16.mxu0 %v3940_v49  ;;  %v3974_v49 = vpack.c.bf16 %v1321_v44, %v1319_v18  ;;  %v3976_v50 = vpack.c.bf16 %v1326_v48, %v1324_v46  ;;  %v1358_v18 = vld [vmem:[#allocation13 + $0x558] sm:$0xff]  ;;  %v1355_v48 = vld [vmem:[#allocation13 + $0x540] sm:$0xff] }
 0x2f8   :  { %3943 = vmatpush1.bf16.msra.mxu0 %v3942_v56  ;;  %v1330_v56 = vld [vmem:[#allocation13 + $0x478] sm:$0xff] }
 0x2f9   :  { %3945 = vmatprep.subr.bf16.mxu0 %v3944_v21  ;;  %v3978_v21 = vpack.c.bf16 %v1325_v54, %v1323_v51  ;;  %v3980_v45 = vpack.c.bf16 %v1330_v56, %v1328_v55  ;;  %v1362_v51 = vld [vmem:[#allocation13 + $0x578] sm:$0xff]  ;;  %v1359_v56 = vld [vmem:[#allocation13 + $0x560] sm:$0xff] }
 0x2fc   :  { %3947 = vmatpush1.bf16.msra.mxu0 %v3946_v62  ;;  %v1387_v62 = vrot.slane %v1311_v58, 2  ;;  %v1364_v58 = vld [vmem:[#allocation13 + $0x588] sm:$0xff] }
 0x2fd   :  { %3949 = vmatprep.subr.bf16.mxu0 %v3948_v63 }
 0x2fe   :  { %v1389_v7 = vsel %vm1383_vm2, %v1387_v62, %v1388_v1  ;;  %v1368_v62 = vld [vmem:[#allocation13 + $0x5a8] sm:$0xff] }
 0x300   :  { %3951 = vmatpush1.bf16.msra.mxu0 %v3950_v5  ;;  %v1336_v5 = vld [vmem:[#allocation13 + $0x4a8] sm:$0xff] }
 0x301   :  { %3953 = vmatprep.subr.bf16.mxu0 %v3952_v6  ;;  %v1338_v6 = vld [vmem:[#allocation13 + $0x4b8] sm:$0xff] }
 0x302   :  { %v3988_v10 = vpack.c.bf16 %v1338_v6, %v1336_v5  ;;  %v1369_v5 = vld [vmem:[#allocation13 + $0x5b0] sm:$0xff]  ;;  %v1372_v6 = vld [vmem:[#allocation13 + $0x5c8] sm:$0xff] }
 0x304   :  { %3955 = vmatpush1.bf16.msra.mxu0 %v3954_v13  ;;  %v1337_v13 = vld [vmem:[#allocation13 + $0x4b0] sm:$0xff] }
 0x305   :  { %3957 = vmatprep.subr.bf16.mxu0 %v3956_v0  ;;  %v1340_v0 = vld [vmem:[#allocation13 + $0x4c8] sm:$0xff]  ;;  %v3990_v17 = vpack.c.bf16 %v1337_v13, %v1335_v11  ;;  %v1371_v11 = vld [vmem:[#allocation13 + $0x5c0] sm:$0xff]  ;;  %v1373_v13 = vld [vmem:[#allocation13 + $0x5d0] sm:$0xff] }
 0x306   :  { %v3992_v47 = vpack.c.bf16 %v1342_v15, %v1340_v0  ;;  %v1376_v0 = vld [vmem:[#allocation13 + $0x5e8] sm:$0xff]  ;;  %v1378_v15 = vld [vmem:[#allocation13 + $0x5f8] sm:$0xff] }
 0x308   :  { %3959 = vmatpush1.bf16.msra.mxu0 %v3958_v20  ;;  %v1341_v20 = vld [vmem:[#allocation13 + $0x4d0] sm:$0xff] }
 0x309   :  { %3961 = vmatprep.subr.bf16.mxu0 %v3960_v22  ;;  %v1344_v22 = vld [vmem:[#allocation13 + $0x4e8] sm:$0xff]  ;;  %v3994_v27 = vpack.c.bf16 %v1341_v20, %v1339_v25  ;;  %v1375_v25 = vld [vmem:[#allocation13 + $0x5e0] sm:$0xff]  ;;  %v1377_v20 = vld [vmem:[#allocation13 + $0x5f0] sm:$0xff] }
 0x30a   :  { %v3996_v28 = vpack.c.bf16 %v1346_v26, %v1344_v22  ;;  %v2160_v22 = vld [vmem:[#allocation16 + $0x480] sm:$0xff]  ;;  %v2161_v26 = vld [vmem:[#allocation16 + $0x488] sm:$0xff] }
 0x30c   :  { %3963 = vmatpush1.bf16.msra.mxu0 %v3962_v30  ;;  %v1345_v30 = vld [vmem:[#allocation13 + $0x4f0] sm:$0xff] }
 0x30d   :  { %3965 = vmatprep.subr.bf16.mxu0 %v3964_v31  ;;  %v1348_v31 = vld [vmem:[#allocation13 + $0x508] sm:$0xff]  ;;  %v3998_v33 = vpack.c.bf16 %v1345_v30, %v1343_v29  ;;  %v4160_v29 = vpack.c.bf16 %v2161_v26, %v2160_v22  ;;  %v1614_v22 = vld [vmem:[#allocation16 + $0x1d0] sm:$0xff]  ;;  %v1615_v26 = vld [vmem:[#allocation16 + $0x1d8] sm:$0xff] }
 0x30e   :  { %v4000_v34 = vpack.c.bf16 %v1350_v32, %v1348_v31  ;;  %v2144_v30 = vld [vmem:[#allocation16 + $0x400] sm:$0xff]  ;;  %v2145_v31 = vld [vmem:[#allocation16 + $0x408] sm:$0xff] }
 0x310   :  { %3967 = vmatpush1.bf16.msra.mxu0 %v3966_v36  ;;  %v1349_v36 = vld [vmem:[#allocation13 + $0x510] sm:$0xff] }
 0x311   :  { %3969 = vmatprep.subr.bf16.mxu0 %v3968_v37  ;;  %v1352_v37 = vld [vmem:[#allocation13 + $0x528] sm:$0xff]  ;;  %v4002_v39 = vpack.c.bf16 %v1349_v36, %v1347_v35  ;;  %v1392_v35 = vrot.slane %v5006_v57, 2  ;;  %v1385_v36 = vrot.slane %v5000_v52, 2 }
 0x312   :  { %v4004_v16 = vpack.c.bf16 %v1354_v38, %v1352_v37  ;;  %v4162_v37 = vpack.c.bf16 %v2145_v31, %v2144_v30  ;;  %v1598_v30 = vld [vmem:[#allocation16 + $0x150] sm:$0xff]  ;;  %v1599_v31 = vld [vmem:[#allocation16 + $0x158] sm:$0xff] }
 0x313   :  { %1286 = vmatmul.mubr.f32.vlgmr.msra.gmra.mrb[4].mxu0 %v932_v23  ;;  %v1327_v23 = vld [vmem:[#allocation13 + $0x460] sm:$0xff] }
 0x314   :  { %1291 = vmatprep.mubr.f32.mxu0 %v5002_v53  ;;  %3971 = vmatpush1.bf16.msra.mxu0 %v3970_v42  ;;  %v3982_v63 = vpack.c.bf16 %v1329_v59, %v1327_v23  ;;  %v1353_v42 = vld [vmem:[#allocation13 + $0x530] sm:$0xff] }
 0x315   :  { %3973 = vmatprep.subr.bf16.mxu0 %v3972_v14  ;;  %v1356_v14 = vld [vmem:[#allocation13 + $0x548] sm:$0xff]  ;;  %v4006_v44 = vpack.c.bf16 %v1353_v42, %v1351_v19  ;;  %v1390_v42 = vrot.slane %v5004_v24, 2 }
 0x316   :  { %v4008_v46 = vpack.c.bf16 %v1358_v18, %v1356_v14  ;;  %v2164_v14 = vld [vmem:[#allocation16 + $0x4a0] sm:$0xff]  ;;  %v2165_v18 = vld [vmem:[#allocation16 + $0x4a8] sm:$0xff] }
 0x317   :  { %1292 = vmatmul.mubr.f32.gmra.mrb[6].mxu0 %v5000_v52  ;;  %v1313_v52 = vld [vmem:[#allocation3 + $0x48] sm:$0x3] }
 0x318   :  { %1297 = vmatprep.mubr.f32.mxu0 %v5006_v57  ;;  %3975 = vmatpush1.bf16.msra.mxu0 %v3974_v49  ;;  %v1357_v49 = vld [vmem:[#allocation13 + $0x550] sm:$0xff]  ;;  %v1396_v57 = vrot.slane %v5013_v12, 2  ;;  %v1400_v53 = vrot.slane %v1313_v52, 2 }
 0x319   :  { %3977 = vmatprep.subr.bf16.mxu0 %v3976_v50  ;;  %v1360_v50 = vld [vmem:[#allocation13 + $0x568] sm:$0xff]  ;;  %v4010_v54 = vpack.c.bf16 %v1357_v49, %v1355_v48  ;;  %v4168_v48 = vpack.c.bf16 %v2165_v18, %v2164_v14 }
 0x31a   :  { %v4012_v55 = vpack.c.bf16 %v1362_v51, %v1360_v50  ;;  %v2148_v49 = vld [vmem:[#allocation16 + $0x420] sm:$0xff]  ;;  %v2149_v50 = vld [vmem:[#allocation16 + $0x428] sm:$0xff]  ;;  %v1391_v51 = vsel %vm1383_vm2, %v1385_v36, %v1390_v42 }
 0x31b   :  { %1298 = vmatmul.mubr.f32.gmra.mrb[8].mxu0 %v5004_v24  ;;  %v1394_v24 = vrot.slane %v5010_v9, 2  ;;  %v1601_v14 = vld [vmem:[#allocation16 + $0x168] sm:$0xff] }
 0x31c   :  { %1303 = vmatprep.mubr.f32.mxu0 %v5013_v12  ;;  %3979 = vmatpush1.bf16.msra.mxu0 %v3978_v21  ;;  %v1361_v21 = vld [vmem:[#allocation13 + $0x570] sm:$0xff]  ;;  %v4170_v12 = vpack.c.bf16 %v2149_v50, %v2148_v49  ;;  %v1619_v49 = vld [vmem:[#allocation16 + $0x1f8] sm:$0xff] }
 0x31d   :  { %3981 = vmatprep.subr.bf16.mxu0 %v3980_v45  ;;  %v1366_v45 = vld [vmem:[#allocation13 + $0x598] sm:$0xff]  ;;  %v4014_v23 = vpack.c.bf16 %v1361_v21, %v1359_v56  ;;  %v1401_v21 = vsel %vm1383_vm2, %v1396_v57, %v1400_v53  ;;  %v2157_v52 = vld [vmem:[#allocation16 + $0x468] sm:$0xff] }
 0x31e   :  { %v4016_v59 = vpack.c.bf16 %v1366_v45, %v1364_v58  ;;  %v1611_v45 = vld [vmem:[#allocation16 + $0x1b8] sm:$0xff]  ;;  %v2174_v50 = vld [vmem:[#allocation16 + $0x4f0] sm:$0xff] }
 0x31f   :  { %1304 = vmatmul.mubr.f32.gmra.mrb[10].mxu0 %v5010_v9  ;;  %v1610_v9 = vld [vmem:[#allocation16 + $0x1b0] sm:$0xff]  ;;  %v1603_v53 = vld [vmem:[#allocation16 + $0x178] sm:$0xff] }
 0x320   :  { %3983 = vmatpush1.bf16.msra.mxu0 %v3982_v63  ;;  %1474 = vmatprep.mubr.f32.mxu0 %v1389_v7  ;;  %v1370_v63 = vld [vmem:[#allocation13 + $0x5b8] sm:$0xff] }
 0x321   :  { %3985 = vmatprep.subr.bf16.mxu0 %v3984_v2  ;;  %v4018_v2 = vpack.c.bf16 %v1365_v61, %v1363_v60  ;;  %v4020_v3 = vpack.c.bf16 %v1370_v63, %v1368_v62  ;;  %v1374_v7 = vld [vmem:[#allocation13 + $0x5d8] sm:$0xff] }
 0x322   :  { %v2167_v60 = vld [vmem:[#allocation16 + $0x4b8] sm:$0xff]  ;;  %v1594_v61 = vld [vmem:[#allocation16 + $0x130] sm:$0xff] }
 0x323   :  { %v1595_v62 = vld [vmem:[#allocation16 + $0x138] sm:$0xff] }
 0x324   :  { %3987 = vmatpush1.bf16.msra.mxu0 %v3986_v8  ;;  %v4022_v8 = vpack.c.bf16 %v1369_v5, %v1367_v4  ;;  %v2151_v4 = vld [vmem:[#allocation16 + $0x438] sm:$0xff] }
 0x325   :  { %3989 = vmatprep.subr.bf16.mxu0 %v3988_v10  ;;  %v4024_v10 = vpack.c.bf16 %v1374_v7, %v1372_v6  ;;  %v1612_v6 = vld [vmem:[#allocation16 + $0x1c0] sm:$0xff]  ;;  %v1613_v7 = vld [vmem:[#allocation16 + $0x1c8] sm:$0xff] }
 0x328   :  { %3991 = vmatpush1.bf16.msra.mxu0 %v3990_v17  ;;  %v4026_v17 = vpack.c.bf16 %v1373_v13, %v1371_v11  ;;  %v2169_v11 = vld [vmem:[#allocation16 + $0x4c8] sm:$0xff]  ;;  %v1596_v13 = vld [vmem:[#allocation16 + $0x140] sm:$0xff] }
 0x329   :  { %3993 = vmatprep.subr.bf16.mxu0 %v3992_v47  ;;  %v4028_v47 = vpack.c.bf16 %v1378_v15, %v1376_v0  ;;  %v1597_v0 = vld [vmem:[#allocation16 + $0x148] sm:$0xff] }
 0x32c   :  { %3995 = vmatpush1.bf16.msra.mxu0 %v3994_v27  ;;  %v1310_v27 = vld [vmem:[#allocation3] sm:$0xfc] }
 0x32d   :  { %3997 = vmatprep.subr.bf16.mxu0 %v3996_v28  ;;  %v4030_v28 = vpack.c.bf16 %v1377_v20, %v1375_v25  ;;  %v1384_v32 = vrot.slane %v1310_v27, 2  ;;  %v2153_v25 = vld [vmem:[#allocation16 + $0x448] sm:$0xff]  ;;  %v2170_v27 = vld [vmem:[#allocation16 + $0x4d0] sm:$0xff] }
 0x32f   :  { %v1386_v19 = vsel %vm1383_vm2, %v1384_v32, %v1385_v36 }
 0x330   :  { %3999 = vmatpush1.bf16.msra.mxu0 %v3998_v33  ;;  %v2162_v33 = vld [vmem:[#allocation16 + $0x490] sm:$0xff] }
 0x331   :  { %4001 = vmatprep.subr.bf16.mxu0 %v4000_v34  ;;  %v2163_v34 = vld [vmem:[#allocation16 + $0x498] sm:$0xff] }
 0x332   :  { %v4164_v38 = vpack.c.bf16 %v2163_v34, %v2162_v33  ;;  %v4054_v33 = vpack.c.bf16 %v1599_v31, %v1598_v30  ;;  %v2154_v34 = vld [vmem:[#allocation16 + $0x450] sm:$0xff] }
 0x334   :  { %4003 = vmatpush1.bf16.msra.mxu0 %v4002_v39  ;;  %v2146_v39 = vld [vmem:[#allocation16 + $0x410] sm:$0xff] }
 0x335   :  { %4005 = vmatprep.subr.bf16.mxu0 %v4004_v16  ;;  %v2147_v16 = vld [vmem:[#allocation16 + $0x418] sm:$0xff] }
 0x338   :  { %4007 = vmatpush1.bf16.msra.mxu0 %v4006_v44  ;;  %v1393_v44 = vsel %vm1383_vm2, %v1388_v1, %v1392_v35  ;;  %v1395_v1 = vsel %vm1383_vm2, %v1390_v42, %v1394_v24  ;;  %v1600_v42 = vld [vmem:[#allocation16 + $0x160] sm:$0xff] }
 0x339   :  { %4009 = vmatprep.subr.bf16.mxu0 %v4008_v46  ;;  %v4166_v46 = vpack.c.bf16 %v2147_v16, %v2146_v39  ;;  %v2172_v39 = vld [vmem:[#allocation16 + $0x4e0] sm:$0xff] }
 0x33c   :  { %4011 = vmatpush1.bf16.msra.mxu0 %v4010_v54  ;;  %v1397_v54 = vsel %vm1383_vm2, %v1392_v35, %v1396_v57  ;;  %v2155_v35 = vld [vmem:[#allocation16 + $0x458] sm:$0xff]  ;;  %v2156_v57 = vld [vmem:[#allocation16 + $0x460] sm:$0xff] }
 0x33d   :  { %4013 = vmatprep.subr.bf16.mxu0 %v4012_v55  ;;  %v1312_v55 = vld [vmem:[#allocation3 + $0x40] sm:$0x3]  ;;  %v4182_v36 = vpack.c.bf16 %v2155_v35, %v2154_v34 }
 0x33e   :  { %v1398_v56 = vrot.slane %v1312_v55, 2 }
 0x340   :  { %4015 = vmatpush1.bf16.msra.mxu0 %v4014_v23  ;;  %v1399_v58 = vsel %vm1383_vm2, %v1394_v24, %v1398_v56  ;;  %v2166_v23 = vld [vmem:[#allocation16 + $0x4b0] sm:$0xff]  ;;  %v2175_v24 = vld [vmem:[#allocation16 + $0x4f8] sm:$0xff] }
 0x341   :  { %4017 = vmatprep.subr.bf16.mxu0 %v4016_v59  ;;  %v4044_v59 = vpack.c.bf16 %v1611_v45, %v1610_v9  ;;  %v4172_v63 = vpack.c.bf16 %v2167_v60, %v2166_v23  ;;  %v4188_v55 = vpack.c.bf16 %v2175_v24, %v2174_v50  ;;  %v2159_v56 = vld [vmem:[#allocation16 + $0x478] sm:$0xff]  ;;  %v1568_v9 = vld [vmem:[#allocation16 + $0x88] sm:$0xff]  ;;  %v2474_v45 = vld [vmem:[#allocation16 + $0x680] sm:$0xff] }
 0x343   :  { %4045 = vmatprep.subr.bf16.mxu1 %v4044_v59  ;;  %v2475_v59 = vld [vmem:[#allocation16 + $0x688] sm:$0xff] }
 0x344   :  { %4019 = vmatpush1.bf16.msra.mxu0 %v4018_v2  ;;  %v4046_v2 = vpack.c.bf16 %v1595_v62, %v1594_v61  ;;  %v4224_v60 = vpack.c.bf16 %v2475_v59, %v2474_v45  ;;  %v1507_v61 = vld [vmem:[#allocation14] sm:$0x3] }
 0x345   :  { %4021 = vmatprep.subr.bf16.mxu0 %v4020_v3  ;;  %v2150_v3 = vld [vmem:[#allocation16 + $0x430] sm:$0xff]  ;;  %v1512_v62 = vrot.slane %v1507_v61, %v916_v41 }
 0x346   :  { %v4174_v5 = vpack.c.bf16 %v2151_v4, %v2150_v3  ;;  %4047 = vmatpush3.bf16.msra.mxu1 %v4046_v2 }
 0x348   :  { %4023 = vmatpush1.bf16.msra.mxu0 %v4022_v8  ;;  %v2168_v8 = vld [vmem:[#allocation16 + $0x4c0] sm:$0xff] }
 0x349   :  { %4025 = vmatprep.subr.bf16.mxu0 %v4024_v10  ;;  %v4048_v10 = vpack.c.bf16 %v1613_v7, %v1612_v6  ;;  %v4176_v15 = vpack.c.bf16 %v2169_v11, %v2168_v8 }
 0x34b   :  { %4049 = vmatprep.subr.bf16.mxu1 %v4048_v10 }
 0x34c   :  { %4027 = vmatpush1.bf16.msra.mxu0 %v4026_v17  ;;  %v4050_v17 = vpack.c.bf16 %v1597_v0, %v1596_v13  ;;  %v1551_v0 = vld [vmem:[#allocation16] sm:$0xff] }
 0x34d   :  { %4029 = vmatprep.subr.bf16.mxu0 %v4028_v47  ;;  %v2152_v47 = vld [vmem:[#allocation16 + $0x440] sm:$0xff] }
 0x34e   :  { %v4178_v20 = vpack.c.bf16 %v2153_v25, %v2152_v47  ;;  %4051 = vmatpush3.bf16.msra.mxu1 %v4050_v17  ;;  %v2458_v25 = vld [vmem:[#allocation16 + $0x600] sm:$0xff] }
 0x350   :  { %4031 = vmatpush1.bf16.msra.mxu0 %v4030_v28  ;;  %v4052_v28 = vpack.c.bf16 %v1615_v26, %v1614_v22  ;;  %v5073_v22 = vld [vmem:[#allocation16 + $0x90] sm:$0xff] }
 0x351   :  { %4161 = vmatprep.subr.bf16.mxu0 %v4160_v29  ;;  %v2171_v29 = vld [vmem:[#allocation16 + $0x4d8] sm:$0xff] }
 0x352   :  { %v4180_v32 = vpack.c.bf16 %v2171_v29, %v2170_v27  ;;  %4053 = vmatprep.subr.bf16.mxu1 %v4052_v28  ;;  %v1570_v27 = vld [vmem:[#allocation16 + $0x98] sm:$0xff]  ;;  %v5076_v28 = vld [vmem:[#allocation16 + $0x690] sm:$0xff] }
 0x353   :  { %1475 = vmatmul.mubr.f32.vlgmr.msra.gmra.mrb[4].mxu0 %v1386_v19  ;;  %4055 = vmatpush3.bf16.msra.mxu1 %v4054_v33  ;;  %v2173_v19 = vld [vmem:[#allocation16 + $0x4e8] sm:$0xff]  ;;  %v5078_v29 = vld [vmem:[#allocation16 + $0x698] sm:$0xff] }
 0x354   :  { %1480 = vmatprep.mubr.f32.mxu0 %v1393_v44  ;;  %4163 = vmatpush3.bf16.msra.mxu0 %v4162_v37  ;;  %v1616_v37 = vld [vmem:[#allocation16 + $0x1e0] sm:$0xff]  ;;  %v4184_v18 = vpack.c.bf16 %v2173_v19, %v2172_v39  ;;  %v4058_v44 = vpack.c.bf16 %v1601_v14, %v1600_v42 }
 0x355   :  { %4165 = vmatprep.subr.bf16.mxu0 %v4164_v38  ;;  %v1617_v38 = vld [vmem:[#allocation16 + $0x1e8] sm:$0xff] }
 0x356   :  { %v4056_v16 = vpack.c.bf16 %v1617_v38, %v1616_v37 }
 0x357   :  { %1481 = vmatmul.mubr.f32.gmra.mrb[6].mxu0 %v1391_v51 }
 0x358   :  { %1486 = vmatprep.mubr.f32.mxu0 %v1397_v54  ;;  %4167 = vmatpush3.bf16.msra.mxu0 %v4166_v46  ;;  %v4186_v46 = vpack.c.bf16 %v2157_v52, %v2156_v57  ;;  %v1602_v54 = vld [vmem:[#allocation16 + $0x170] sm:$0xff] }
 0x359   :  { %4169 = vmatprep.subr.bf16.mxu0 %v4168_v48  ;;  %4057 = vmatprep.subr.bf16.mxu1 %v4056_v16  ;;  %v1618_v48 = vld [vmem:[#allocation16 + $0x1f0] sm:$0xff] }
 0x35a   :  { %4059 = vmatpush3.bf16.msra.mxu1 %v4058_v44  ;;  %v4060_v51 = vpack.c.bf16 %v1619_v49, %v1618_v48  ;;  %v4228_v44 = vpack.c.bf16 %v5078_v29, %v5076_v28 }
 0x35b   :  { %1487 = vmatmul.mubr.f32.gmra.mrb[8].mxu0 %v1395_v1  ;;  %v2158_v1 = vld [vmem:[#allocation16 + $0x470] sm:$0xff] }
 0x35c   :  { %1492 = vmatprep.mubr.f32.mxu0 %v1401_v21  ;;  %4171 = vmatpush3.bf16.msra.mxu0 %v4170_v12  ;;  %v4062_v12 = vpack.c.bf16 %v1603_v53, %v1602_v54  ;;  %v4190_v21 = vpack.c.bf16 %v2159_v56, %v2158_v1  ;;  %v1553_v54 = vld [vmem:[#allocation16 + $0x10] sm:$0xff]  ;;  %v1554_v53 = vld [vmem:[#allocation16 + $0x18] sm:$0xff] }
 0x35d   :  { %4173 = vmatprep.subr.bf16.mxu0 %v4172_v63  ;;  %4061 = vmatprep.subr.bf16.mxu1 %v4060_v51  ;;  %v1516_v63 = vrot.slane %v1507_v61, %v920_v43  ;;  %v1572_v61 = vld [vmem:[#allocation16 + $0xa8] sm:$0xff] }
 0x35e   :  { %4063 = vmatpush3.bf16.msra.mxu1 %v4062_v12 }
 0x35f   :  { %1493 = vmatmul.mubr.f32.gmra.mrb[10].mxu0 %v1399_v58  ;;  %v1567_v58 = vld [vmem:[#allocation16 + $0x80] sm:$0xff] }
 0x360   :  { %4175 = vmatpush3.bf16.msra.mxu0 %v4174_v5  ;;  %v4064_v23 = vpack.c.bf16 %v1568_v9, %v1567_v58  ;;  %v2461_v58 = vld [vmem:[#allocation16 + $0x618] sm:$0xff]  ;;  %v1571_v9 = vld [vmem:[#allocation16 + $0xa0] sm:$0xff] }
 0x361   :  { %4177 = vmatprep.subr.bf16.mxu0 %v4176_v15  ;;  %v1552_v15 = vld [vmem:[#allocation16 + $0x8] sm:$0xff] }
 0x362   :  { %4065 = vmatprep.subr.bf16.mxu1 %v4064_v23 }
 0x364   :  { %4179 = vmatpush3.bf16.msra.mxu0 %v4178_v20  ;;  %v2459_v20 = vld [vmem:[#allocation16 + $0x608] sm:$0xff] }
 0x365   :  { %4181 = vmatprep.subr.bf16.mxu0 %v4180_v32  ;;  %v4226_v38 = vpack.c.bf16 %v2459_v20, %v2458_v25  ;;  %v1556_v25 = vld [vmem:[#allocation16 + $0x28] sm:$0xff]  ;;  %v2462_v20 = vld [vmem:[#allocation16 + $0x620] sm:$0xff] }
 0x368   :  { %4183 = vmatpush3.bf16.msra.mxu0 %v4182_v36  ;;  %v4066_v36 = vpack.c.bf16 %v1552_v15, %v1551_v0  ;;  %v4072_v15 = vpack.c.bf16 %v1572_v61, %v1571_v9 }
 0x369   :  { %4185 = vmatprep.subr.bf16.mxu0 %v4184_v18  ;;  %v4068_v18 = vpack.c.bf16 %v1570_v27, %v5073_v22  ;;  %v2463_v22 = vld [vmem:[#allocation16 + $0x628] sm:$0xff] }
 0x36c   :  { %4187 = vmatpush3.bf16.msra.mxu0 %v4186_v46 }
 0x36d   :  { %4189 = vmatprep.subr.bf16.mxu0 %v4188_v55 }
 0x370   :  { %4191 = vmatpush3.bf16.msra.mxu0 %v4190_v21  ;;  %v2460_v21 = vld [vmem:[#allocation16 + $0x610] sm:$0xff] }
 0x371   :  { %4225 = vmatprep.subr.bf16.mxu0 %v4224_v60 }
 0x426   :  { %v1476_v2 = vpop.f32.mrb[4].mxu0 }
 0x427   :  { %v5058_v3 = vadd.f32 %v1512_v62, %v1476_v2  ;;  %v1478_v4 = vpop.f32.mrb[5].mxu0 }
 0x428   :  { %v5060_v5 = vadd.f32 %v1516_v63, %v1478_v4  ;;  %v4070_v4 = vpack.c.bf16 %v1554_v53, %v1553_v54 }
 0x429   :  { %v1527_v6 = vmax.f32 %v5058_v3, 0.0  ;;  %v1835_v3 = vld [vmem:[#allocation16 + $0x220] sm:$0xff] }
 0x42a   :  { %v1528_v7 = vmax.f32 %v5060_v5, 0.0  ;;  %v1482_v8 = vpop.f32.mrb[6].mxu0 }
 0x42b   :  { %1535 = vst [vmem:[#allocation4] sm:$0xff] %v1527_v6  ;;  %v1521_v10 = vadd.f32 %v1512_v62, %v1482_v8  ;;  %v1484_v11 = vpop.f32.mrb[7].mxu0  ;;  %v4230_v8 = vpack.c.bf16 %v2461_v58, %v2460_v21  ;;  %v2482_v58 = vld [vmem:[#allocation16 + $0x6c0] sm:$0xff] }
 0x42c   :  { %1536 = vst [vmem:[#allocation4 + $0x8] sm:$0xff] %v1528_v7  ;;  %v1522_v40 = vadd.f32 %v1516_v63, %v1484_v11  ;;  %v1555_v11 = vld [vmem:[#allocation16 + $0x20] sm:$0xff] }
 0x42d   :  { %v5068_v41 = vmax.f32 %v1521_v10, 0.0 }
 0x42e   :  { %v5070_v43 = vmax.f32 %v1522_v40, 0.0  ;;  %v1488_v13 = vpop.f32.mrb[8].mxu0  ;;  %v1586_v40 = vld [vmem:[#allocation4 + $0x48] sm:$0x1] }
 0x42f   :  { %1537 = vst [vmem:[#allocation4 + $0x10] sm:$0xff] %v5068_v41  ;;  %v1523_v17 = vadd.f32 %v1512_v62, %v1488_v13  ;;  %v1490_v47 = vpop.f32.mrb[9].mxu0  ;;  %v1631_v50 = vrot.slane %v5068_v41, 1  ;;  %v2182_v51 = vrot.slane %v5068_v41, 4  ;;  %v2142_v13 = vld [vmem:[#allocation4 + $0x48] sm:$0xf] }
 0x430   :  { %1538 = vst [vmem:[#allocation4 + $0x18] sm:$0xff] %v5070_v43  ;;  %v1524_v26 = vadd.f32 %v1516_v63, %v1490_v47  ;;  %v1634_v31 = vrot.slane %v5070_v43, 1  ;;  %v2185_v32 = vrot.slane %v5070_v43, 4 }
 0x431   :  { %v5080_v30 = vmax.f32 %v1523_v17, 0.0 }
 0x432   :  { %v5084_v33 = vmax.f32 %v1524_v26, 0.0  ;;  %v1494_v34 = vpop.f32.mrb[10].mxu0  ;;  %v1583_v35 = vld [vmem:[#allocation4] sm:$0xfe] }
 0x433   :  { %v2139_v37 = vld [vmem:[#allocation4] sm:$0xf0]  ;;  %1539 = vst [vmem:[#allocation4 + $0x20] sm:$0xff] %v5080_v30  ;;  %v1525_v39 = vadd.f32 %v1512_v62, %v1494_v34  ;;  %v1496_v16 = vpop.f32.mrb[11].mxu0  ;;  %v1584_v19 = vld [vmem:[#allocation4 + $0x8] sm:$0xfe] }
 0x434   :  { %v2140_v42 = vld [vmem:[#allocation4 + $0x8] sm:$0xf0]  ;;  %v1630_v14 = vrot.slane %v1583_v35, 1  ;;  %1540 = vst [vmem:[#allocation4 + $0x28] sm:$0xff] %v5084_v33  ;;  %v1526_v57 = vadd.f32 %v1516_v63, %v1496_v16  ;;  %v1633_v52 = vrot.slane %v1584_v19, 1  ;;  %v2181_v48 = vrot.slane %v2139_v37, 4 }
 0x435   :  { %v2184_v46 = vrot.slane %v2140_v42, 4  ;;  %v5091_v49 = vmax.f32 %v1525_v39, 0.0  ;;  %v1638_v24 = vrot.slane %v5084_v33, 1  ;;  %v2189_v56 = vrot.slane %v5084_v33, 4  ;;  %v2478_v62 = vld [vmem:[#allocation16 + $0x6a0] sm:$0xff]  ;;  %v2479_v63 = vld [vmem:[#allocation16 + $0x6a8] sm:$0xff] }
 0x436   :  { %v5096_v55 = vmax.f32 %v1526_v57, 0.0  ;;  %v1635_v12 = vsel %vm1105_vm1, %v1633_v52, %v1634_v31  ;;  %v1632_v45 = vsel %vm1105_vm1, %v1630_v14, %v1631_v50  ;;  %v2183_v23 = vsel %vm2180_vm3, %v2181_v48, %v2182_v51  ;;  %v1574_v34 = vld [vmem:[#allocation16 + $0xb8] sm:$0xff]  ;;  %v1557_v14 = vld [vmem:[#allocation16 + $0x30] sm:$0xff] }
 0x437   :  { %v2186_v1 = vsel %vm2180_vm3, %v2184_v46, %v2185_v32  ;;  %1541 = vst [vmem:[#allocation4 + $0x30] sm:$0xff] %v5091_v49  ;;  %1720 = vmatprep.mubr.f32.mxu1 %v1635_v12  ;;  %v1636_v59 = vrot.slane %v5080_v30, 1  ;;  %v2187_v60 = vrot.slane %v5080_v30, 4  ;;  %v1639_v2 = vsel %vm1105_vm1, %v1634_v31, %v1638_v24  ;;  %v1573_v31 = vld [vmem:[#allocation16 + $0xb0] sm:$0xff]  ;;  %v2481_v37 = vld [vmem:[#allocation16 + $0x6b8] sm:$0xff]  ;;  %v1575_v12 = vld [vmem:[#allocation16 + $0xc0] sm:$0xff] }
 0x438   :  { %2271 = vmatprep.mubr.f32.mxu0 %v2186_v1  ;;  %1542 = vst [vmem:[#allocation4 + $0x38] sm:$0xff] %v5096_v55  ;;  %1721 = vmatmul.mubr.f32.vlgmr.msra.gmra.mrb[8].mxu1 %v1632_v45  ;;  %v1642_v10 = vrot.slane %v5096_v55, 1  ;;  %v2190_v0 = vsel %vm2180_vm3, %v2185_v32, %v2189_v56  ;;  %v2193_v17 = vrot.slane %v5096_v55, 4  ;;  %v4232_v47 = vpack.c.bf16 %v2479_v63, %v2478_v62  ;;  %v1585_v32 = vld [vmem:[#allocation4 + $0x40] sm:$0x1]  ;;  %v2464_v46 = vld [vmem:[#allocation16 + $0x630] sm:$0xff] }
 0x439   :  { %2272 = vmatmul.mubr.f32.vlgmr.msra.gmra.mrb[12].mxu0 %v2183_v23  ;;  %4067 = vmatpush3.bf16.msra.mxu1 %v4066_v36  ;;  %v1637_v26 = vsel %vm1105_vm1, %v1631_v50, %v1636_v59  ;;  %v2188_v27 = vsel %vm2180_vm3, %v2182_v51, %v2187_v60  ;;  %v1640_v28 = vrot.slane %v5091_v49, 1  ;;  %v2191_v29 = vrot.slane %v5091_v49, 4  ;;  %v2480_v36 = vld [vmem:[#allocation16 + $0x6b0] sm:$0xff]  ;;  %v2465_v48 = vld [vmem:[#allocation16 + $0x638] sm:$0xff]  ;;  %v1576_v1 = vld [vmem:[#allocation16 + $0xc8] sm:$0xff] }
 0x43a   :  { %4227 = vmatpush3.bf16.msra.mxu0 %v4226_v38  ;;  %1725 = vmatprep.mubr.f32.mxu1 %v1639_v2  ;;  %v1646_v35 = vrot.slane %v1586_v40, 1  ;;  %v2141_v38 = vld [vmem:[#allocation4 + $0x40] sm:$0xf]  ;;  %v1643_v39 = vsel %vm1105_vm1, %v1638_v24, %v1642_v10  ;;  %v4074_v16 = vpack.c.bf16 %v1556_v25, %v1555_v11  ;;  %v4234_v19 = vpack.c.bf16 %v2463_v22, %v2462_v20  ;;  %v2454_v50 = vld [vmem:[#allocation4 + $0x8] sm:$0xc0]  ;;  %v2466_v63 = vld [vmem:[#allocation16 + $0x640] sm:$0xff] }
 0x43b   :  { %4069 = vmatprep.subr.bf16.mxu1 %v4068_v18  ;;  %2276 = vmatprep.mubr.f32.mxu0 %v2190_v0  ;;  %v2197_v42 = vrot.slane %v2142_v13, 4  ;;  %v1558_v18 = vld [vmem:[#allocation16 + $0x38] sm:$0xff]  ;;  %v4076_v57 = vpack.c.bf16 %v1574_v34, %v1573_v31  ;;  %v1644_v52 = vrot.slane %v1585_v32, 1  ;;  %v1641_v51 = vsel %vm1105_vm1, %v1636_v59, %v1640_v28  ;;  %v1559_v59 = vld [vmem:[#allocation16 + $0x40] sm:$0xff]  ;;  %v1560_v62 = vld [vmem:[#allocation16 + $0x48] sm:$0xff] }
 0x43c   :  { %4229 = vmatprep.subr.bf16.mxu0 %v4228_v44  ;;  %1726 = vmatmul.mubr.f32.gmra.mrb[10].mxu1 %v1637_v26  ;;  %v2194_v44 = vsel %vm2180_vm3, %v2189_v56, %v2193_v17  ;;  %v2192_v24 = vsel %vm2180_vm3, %v2187_v60, %v2191_v29  ;;  %v4236_v54 = vpack.c.bf16 %v2481_v37, %v2480_v36  ;;  %v2195_v53 = vrot.slane %v2141_v38, 4  ;;  %v2483_v56 = vld [vmem:[#allocation16 + $0x6c8] sm:$0xff]  ;;  %v1578_v13 = vld [vmem:[#allocation16 + $0xd8] sm:$0xff]  ;;  %v2484_v0 = vld [vmem:[#allocation16 + $0x6d0] sm:$0xff] }
 0x43d   :  { %2277 = vmatmul.mubr.f32.gmra.mrb[14].mxu0 %v2188_v27  ;;  %4071 = vmatpush3.bf16.msra.mxu1 %v4070_v4  ;;  %v4078_v21 = vpack.c.bf16 %v1558_v18, %v1557_v14  ;;  %v1647_v9 = vsel %vm1105_vm1, %v1642_v10, %v1646_v35  ;;  %v2198_v45 = vsel %vm2180_vm3, %v2193_v17, %v2197_v42  ;;  %v2498_v61 = vrot.slane %v2454_v50, 6  ;;  %v2467_v2 = vld [vmem:[#allocation16 + $0x648] sm:$0xff]  ;;  %v1577_v4 = vld [vmem:[#allocation16 + $0xd0] sm:$0xff]  ;;  %v1562_v22 = vld [vmem:[#allocation16 + $0x58] sm:$0xff] }
 0x43e   :  { %4231 = vmatpush3.bf16.msra.mxu0 %v4230_v8  ;;  %1730 = vmatprep.mubr.f32.mxu1 %v1643_v39  ;;  %v4238_v23 = vpack.c.bf16 %v2465_v48, %v2464_v46  ;;  %v4080_v60 = vpack.c.bf16 %v1576_v1, %v1575_v12  ;;  %v1645_v8 = vsel %vm1105_vm1, %v1640_v28, %v1644_v52  ;;  %v2499_v10 = vrot.slane %v5070_v43, 6  ;;  %v1561_v20 = vld [vmem:[#allocation16 + $0x50] sm:$0xff]  ;;  %v1579_v31 = vld [vmem:[#allocation16 + $0xe0] sm:$0xff]  ;;  %v1580_v34 = vld [vmem:[#allocation16 + $0xe8] sm:$0xff] }
 0x43f   :  { %4073 = vmatprep.subr.bf16.mxu1 %v4072_v15  ;;  %2281 = vmatprep.mubr.f32.mxu0 %v2194_v44  ;;  %v2196_v11 = vsel %vm2180_vm3, %v2191_v29, %v2195_v53  ;;  %v4240_v40 = vpack.c.bf16 %v2483_v56, %v2482_v58  ;;  %v2485_v15 = vld [vmem:[#allocation16 + $0x6d8] sm:$0xff]  ;;  %v4242_v25 = vpack.c.bf16 %v2467_v2, %v2466_v63  ;;  %v2468_v28 = vld [vmem:[#allocation16 + $0x650] sm:$0xff]  ;;  %v2486_v32 = vld [vmem:[#allocation16 + $0x6e0] sm:$0xff] }
 0x440   :  { %4233 = vmatprep.subr.bf16.mxu0 %v4232_v47  ;;  %1731 = vmatmul.mubr.f32.gmra.mrb[12].mxu1 %v1641_v51  ;;  %v2500_v17 = vsel %vm2494_vm4, %v2498_v61, %v2499_v10  ;;  %v4082_v47 = vpack.c.bf16 %v1560_v62, %v1559_v59  ;;  %v4084_v26 = vpack.c.bf16 %v1578_v13, %v1577_v4  ;;  %v2469_v29 = vld [vmem:[#allocation16 + $0x658] sm:$0xff]  ;;  %v2487_v35 = vld [vmem:[#allocation16 + $0x6e8] sm:$0xff]  ;;  %v1563_v38 = vld [vmem:[#allocation16 + $0x60] sm:$0xff] }
 0x441   :  { %2282 = vmatmul.mubr.f32.gmra.mrb[16].mxu0 %v2192_v24  ;;  %4075 = vmatpush3.bf16.msra.mxu1 %v4074_v16  ;;  %v4244_v27 = vpack.c.bf16 %v2485_v15, %v2484_v0  ;;  %v4086_v36 = vpack.c.bf16 %v1562_v22, %v1561_v20  ;;  %v4246_v37 = vpack.c.bf16 %v2469_v29, %v2468_v28  ;;  %v1564_v39 = vld [vmem:[#allocation16 + $0x68] sm:$0xff]  ;;  %v2470_v16 = vld [vmem:[#allocation16 + $0x660] sm:$0xff]  ;;  %v1581_v42 = vld [vmem:[#allocation16 + $0xf0] sm:$0xff]  ;;  %v2503_v0 = vrot.slane %v5084_v33, 6 }
 0x442   :  { %4235 = vmatpush3.bf16.msra.mxu0 %v4234_v19  ;;  %1735 = vmatprep.mubr.f32.mxu1 %v1647_v9  ;;  %v4088_v5 = vpack.c.bf16 %v1580_v34, %v1579_v31  ;;  %v2471_v19 = vld [vmem:[#allocation16 + $0x668] sm:$0xff]  ;;  %v1582_v14 = vld [vmem:[#allocation16 + $0xf8] sm:$0xff]  ;;  %v2488_v18 = vld [vmem:[#allocation16 + $0x6f0] sm:$0xff]  ;;  %v2501_v22 = vrot.slane %v5080_v30, 6 }
 0x443   :  { %2286 = vmatprep.mubr.f32.mxu0 %v2198_v45  ;;  %4077 = vmatprep.subr.bf16.mxu1 %v4076_v57  ;;  %v2489_v44 = vld [vmem:[#allocation16 + $0x6f8] sm:$0xff]  ;;  %v4090_v57 = vpack.c.bf16 %v1564_v39, %v1563_v38  ;;  %v4250_v52 = vpack.c.bf16 %v2471_v19, %v2470_v16  ;;  %v1565_v46 = vld [vmem:[#allocation16 + $0x70] sm:$0xff]  ;;  %v4092_v50 = vpack.c.bf16 %v1582_v14, %v1581_v42  ;;  %v1847_v53 = vld [vmem:[#allocation16 + $0x280] sm:$0xff]  ;;  %v2505_v19 = vrot.slane %v5091_v49, 6 }
 0x444   :  { %4237 = vmatprep.subr.bf16.mxu0 %v4236_v54  ;;  %1736 = vmatmul.mubr.f32.gmra.mrb[14].mxu1 %v1645_v8  ;;  %v1566_v48 = vld [vmem:[#allocation16 + $0x78] sm:$0xff]  ;;  %v4252_v51 = vpack.c.bf16 %v2489_v44, %v2488_v18  ;;  %v2472_v24 = vld [vmem:[#allocation16 + $0x670] sm:$0xff]  ;;  %v1848_v12 = vld [vmem:[#allocation16 + $0x288] sm:$0xff] }
 0x445   :  { %2287 = vmatmul.mubr.f32.gmra.mrb[18].mxu0 %v2196_v11  ;;  %4079 = vmatpush3.bf16.msra.mxu1 %v4078_v21  ;;  %v2473_v54 = vld [vmem:[#allocation16 + $0x678] sm:$0xff]  ;;  %v2786_v1 = vld [vmem:[#allocation16 + $0x880] sm:$0xff]  ;;  %v2787_v21 = vld [vmem:[#allocation16 + $0x888] sm:$0xff]  ;;  %v4094_v56 = vpack.c.bf16 %v1566_v48, %v1565_v46  ;;  %v4096_v45 = vpack.c.bf16 %v1848_v12, %v1847_v53  ;;  %v2506_v12 = vsel %vm2494_vm4, %v2501_v22, %v2505_v19 }
 0x446   :  { %4239 = vmatpush3.bf16.msra.mxu0 %v4238_v23  ;;  %1805 = vmatprep.mubr.f32.mxu1 %v1528_v7  ;;  %v4248_v7 = vpack.c.bf16 %v2487_v35, %v2486_v32  ;;  %v2453_v58 = vld [vmem:[#allocation4] sm:$0xc0]  ;;  %v4254_v9 = vpack.c.bf16 %v2473_v54, %v2472_v24  ;;  %v4288_v23 = vpack.c.bf16 %v2787_v21, %v2786_v1  ;;  %v1831_v61 = vld [vmem:[#allocation16 + $0x200] sm:$0xff]  ;;  %v1832_v59 = vld [vmem:[#allocation16 + $0x208] sm:$0xff] }
 0x447   :  { %2585 = vmatprep.mubr.f32.mxu0 %v2500_v17  ;;  %4081 = vmatprep.subr.bf16.mxu1 %v4080_v60  ;;  %v2495_v62 = vrot.slane %v2453_v58, 6  ;;  %v2770_v60 = vld [vmem:[#allocation16 + $0x800] sm:$0xff]  ;;  %v2771_v63 = vld [vmem:[#allocation16 + $0x808] sm:$0xff]  ;;  %v1849_v2 = vld [vmem:[#allocation16 + $0x290] sm:$0xff]  ;;  %v4098_v13 = vpack.c.bf16 %v1832_v59, %v1831_v61  ;;  %v2504_v35 = vsel %vm2494_vm4, %v2499_v10, %v2503_v0 }
 0x448   :  { %4241 = vmatprep.subr.bf16.mxu0 %v4240_v40  ;;  %v1850_v4 = vld [vmem:[#allocation16 + $0x298] sm:$0xff]  ;;  %v2788_v8 = vld [vmem:[#allocation16 + $0x890] sm:$0xff]  ;;  %v2496_v40 = vrot.slane %v5068_v41, 6  ;;  %v4290_v15 = vpack.c.bf16 %v2771_v63, %v2770_v60  ;;  %v1851_v29 = vld [vmem:[#allocation16 + $0x2a0] sm:$0xff] }
 0x449   :  { %4083 = vmatpush3.bf16.msra.mxu1 %v4082_v47  ;;  %v2789_v11 = vld [vmem:[#allocation16 + $0x898] sm:$0xff]  ;;  %v1833_v17 = vld [vmem:[#allocation16 + $0x210] sm:$0xff]  ;;  %v4100_v20 = vpack.c.bf16 %v1850_v4, %v1849_v2  ;;  %v1852_v31 = vld [vmem:[#allocation16 + $0x2a8] sm:$0xff]  ;;  %v1871_v2 = vrot.slane %v5070_v43, 2 }
 0x44a   :  { %4243 = vmatpush3.bf16.msra.mxu0 %v4242_v25  ;;  %4085 = vmatprep.subr.bf16.mxu1 %v4084_v26  ;;  %v1834_v47 = vld [vmem:[#allocation16 + $0x218] sm:$0xff]  ;;  %v2497_v25 = vsel %vm2494_vm4, %v2495_v62, %v2496_v40  ;;  %v4292_v26 = vpack.c.bf16 %v2789_v11, %v2788_v8  ;;  %v2790_v34 = vld [vmem:[#allocation16 + $0x8a0] sm:$0xff]  ;;  %v2791_v32 = vld [vmem:[#allocation16 + $0x8a8] sm:$0xff]  ;;  %v4104_v16 = vpack.c.bf16 %v1852_v31, %v1851_v29 }
 0x44b   :  { %4245 = vmatprep.subr.bf16.mxu0 %v4244_v27  ;;  %v2772_v27 = vld [vmem:[#allocation16 + $0x810] sm:$0xff]  ;;  %v2773_v28 = vld [vmem:[#allocation16 + $0x818] sm:$0xff]  ;;  %v4296_v42 = vpack.c.bf16 %v2791_v32, %v2790_v34  ;;  %v2774_v14 = vld [vmem:[#allocation16 + $0x820] sm:$0xff] }
 0x44c   :  { %v2456_v38 = vld [vmem:[#allocation4 + $0x48] sm:$0x3f]  ;;  %v4294_v39 = vpack.c.bf16 %v2773_v28, %v2772_v27  ;;  %v2775_v10 = vld [vmem:[#allocation16 + $0x828] sm:$0xff]  ;;  %v1854_v44 = vld [vmem:[#allocation16 + $0x2b8] sm:$0xff] }
 0x44d   :  { %4087 = vmatpush3.bf16.msra.mxu1 %v4086_v36  ;;  %v4102_v36 = vpack.c.bf16 %v1834_v47, %v1833_v17  ;;  %v1853_v18 = vld [vmem:[#allocation16 + $0x2b0] sm:$0xff]  ;;  %v4298_v24 = vpack.c.bf16 %v2775_v10, %v2774_v14  ;;  %v1838_v53 = vld [vmem:[#allocation16 + $0x238] sm:$0xff]  ;;  %v1856_v61 = vld [vmem:[#allocation16 + $0x2c8] sm:$0xff] }
 0x44e   :  { %4247 = vmatpush3.bf16.msra.mxu0 %v4246_v37  ;;  %4089 = vmatprep.subr.bf16.mxu1 %v4088_v5  ;;  %v2507_v37 = vrot.slane %v5096_v55, 6  ;;  %v2455_v5 = vld [vmem:[#allocation4 + $0x40] sm:$0x3f]  ;;  %v1837_v54 = vld [vmem:[#allocation16 + $0x230] sm:$0xff]  ;;  %v4108_v1 = vpack.c.bf16 %v1854_v44, %v1853_v18  ;;  %v2794_v59 = vld [vmem:[#allocation16 + $0x8c0] sm:$0xff] }
 0x44f   :  { %4249 = vmatprep.subr.bf16.mxu0 %v4248_v7  ;;  %v2502_v7 = vsel %vm2494_vm4, %v2496_v40, %v2501_v22  ;;  %v2509_v21 = vrot.slane %v2455_v5, 6  ;;  %v2795_v62 = vld [vmem:[#allocation16 + $0x8c8] sm:$0xff]  ;;  %v4110_v63 = vpack.c.bf16 %v1838_v53, %v1837_v54  ;;  %v1839_v8 = vld [vmem:[#allocation16 + $0x240] sm:$0xff]  ;;  %v1857_v47 = vld [vmem:[#allocation16 + $0x2d0] sm:$0xff] }
 0x450   :  { %v2508_v46 = vsel %vm2494_vm4, %v2503_v0, %v2507_v37  ;;  %v1840_v11 = vld [vmem:[#allocation16 + $0x248] sm:$0xff]  ;;  %v2778_v40 = vld [vmem:[#allocation16 + $0x840] sm:$0xff]  ;;  %v2796_v22 = vld [vmem:[#allocation16 + $0x8d0] sm:$0xff] }
 0x451   :  { %4091 = vmatpush3.bf16.msra.mxu1 %v4090_v57  ;;  %v2792_v57 = vld [vmem:[#allocation16 + $0x8b0] sm:$0xff]  ;;  %v2779_v17 = vld [vmem:[#allocation16 + $0x848] sm:$0xff]  ;;  %v4114_v27 = vpack.c.bf16 %v1840_v11, %v1839_v8  ;;  %v1842_v34 = vld [vmem:[#allocation16 + $0x258] sm:$0xff] }
 0x452   :  { %4251 = vmatpush3.bf16.msra.mxu0 %v4250_v52  ;;  %4093 = vmatprep.subr.bf16.mxu1 %v4092_v50  ;;  %v2793_v52 = vld [vmem:[#allocation16 + $0x8b8] sm:$0xff]  ;;  %v2511_v50 = vrot.slane %v2456_v38, 6  ;;  %v4306_v28 = vpack.c.bf16 %v2779_v17, %v2778_v40  ;;  %v1841_v31 = vld [vmem:[#allocation16 + $0x250] sm:$0xff]  ;;  %v1860_v38 = vld [vmem:[#allocation16 + $0x2e8] sm:$0xff]  ;;  %v1873_v40 = vrot.slane %v5080_v30, 2 }
 0x453   :  { %4253 = vmatprep.subr.bf16.mxu0 %v4252_v51  ;;  %v1827_v51 = vld [vmem:[#allocation4 + $0x8] sm:$0xfc]  ;;  %v4300_v58 = vpack.c.bf16 %v2793_v52, %v2792_v57  ;;  %v2783_v10 = vld [vmem:[#allocation16 + $0x868] sm:$0xff] }
 0x454   :  { %v2512_v60 = vsel %vm2494_vm4, %v2507_v37, %v2511_v50  ;;  %v2780_v32 = vld [vmem:[#allocation16 + $0x850] sm:$0xff]  ;;  %v1859_v37 = vld [vmem:[#allocation16 + $0x2e0] sm:$0xff]  ;;  %v1862_v44 = vld [vmem:[#allocation16 + $0x2f8] sm:$0xff] }
 0x455   :  { %4095 = vmatpush3.bf16.msra.mxu1 %v4094_v56  ;;  %v2776_v56 = vld [vmem:[#allocation16 + $0x830] sm:$0xff]  ;;  %v2801_v52 = vld [vmem:[#allocation16 + $0x8f8] sm:$0xff] }
 0x456   :  { %4255 = vmatpush3.bf16.msra.mxu0 %v4254_v9  ;;  %4097 = vmatprep.subr.bf16.mxu1 %v4096_v45  ;;  %v2777_v9 = vld [vmem:[#allocation16 + $0x838] sm:$0xff]  ;;  %v1855_v45 = vld [vmem:[#allocation16 + $0x2c0] sm:$0xff]  ;;  %v1861_v18 = vld [vmem:[#allocation16 + $0x2f0] sm:$0xff] }
 0x457   :  { %4289 = vmatprep.subr.bf16.mxu0 %v4288_v23  ;;  %v1870_v23 = vrot.slane %v1827_v51, 2  ;;  %v4302_v4 = vpack.c.bf16 %v2777_v9, %v2776_v56  ;;  %v4112_v0 = vpack.c.bf16 %v1856_v61, %v1855_v45  ;;  %v2800_v57 = vld [vmem:[#allocation16 + $0x8f0] sm:$0xff]  ;;  %v4124_v50 = vpack.c.bf16 %v1862_v44, %v1861_v18  ;;  %v1987_v61 = vld [vmem:[#allocation16 + $0x300] sm:$0xff] }
 0x458   :  { %1806 = vmatmul.mubr.f32.vlgmr.msra.gmra.mrb[16].mxu1 %v1527_v6  ;;  %v1836_v6 = vld [vmem:[#allocation16 + $0x228] sm:$0xff]  ;;  %v1845_v51 = vld [vmem:[#allocation16 + $0x270] sm:$0xff]  ;;  %v4316_v53 = vpack.c.bf16 %v2801_v52, %v2800_v57  ;;  %v2028_v44 = vrot.slane %v5070_v43, 3 }
 0x459   :  { %2586 = vmatmul.mubr.f32.vlgmr.msra.gmra.mrb[20].mxu0 %v2497_v25  ;;  %1810 = vmatprep.mubr.f32.mxu1 %v5070_v43  ;;  %v4106_v48 = vpack.c.bf16 %v1836_v6, %v1835_v3  ;;  %v1858_v25 = vld [vmem:[#allocation16 + $0x2d8] sm:$0xff]  ;;  %v2799_v3 = vld [vmem:[#allocation16 + $0x8e8] sm:$0xff]  ;;  %v4118_v6 = vpack.c.bf16 %v1842_v34, %v1841_v31  ;;  %v2784_v54 = vld [vmem:[#allocation16 + $0x870] sm:$0xff] }
 0x45a   :  { %4099 = vmatpush3.bf16.msra.mxu1 %v4098_v13  ;;  %2590 = vmatprep.mubr.f32.mxu0 %v2504_v35  ;;  %v2510_v13 = vsel %vm2494_vm4, %v2505_v19, %v2509_v21  ;;  %v4116_v29 = vpack.c.bf16 %v1858_v25, %v1857_v47  ;;  %v1844_v19 = vld [vmem:[#allocation16 + $0x268] sm:$0xff]  ;;  %v1879_v47 = vrot.slane %v5096_v55, 2  ;;  %v2007_v25 = vld [vmem:[#allocation16 + $0x3a0] sm:$0xff]  ;;  %v5175_v57 = vld [vmem:[#allocation2 + $0x20] sm:$0xff] }
 0x45b   :  { %4291 = vmatpush3.bf16.msra.mxu0 %v4290_v15  ;;  %4101 = vmatprep.subr.bf16.mxu1 %v4100_v20  ;;  %v4304_v15 = vpack.c.bf16 %v2795_v62, %v2794_v59  ;;  %v1872_v20 = vsel %vm1383_vm2, %v1870_v23, %v1871_v2  ;;  %v2004_v21 = vld [vmem:[#allocation16 + $0x388] sm:$0xff]  ;;  %v1875_v62 = vrot.slane %v5084_v33, 2  ;;  %v1991_v31 = vld [vmem:[#allocation16 + $0x320] sm:$0xff] }
 0x45c   :  { %4293 = vmatprep.subr.bf16.mxu0 %v4292_v26  ;;  %1811 = vmatmul.mubr.f32.gmra.mrb[18].mxu1 %v5068_v41  ;;  %v2797_v26 = vld [vmem:[#allocation16 + $0x8d8] sm:$0xff]  ;;  %v1988_v59 = vld [vmem:[#allocation16 + $0x308] sm:$0xff] }
 0x45d   :  { %2591 = vmatmul.mubr.f32.gmra.mrb[22].mxu0 %v2502_v7  ;;  %1815 = vmatprep.mubr.f32.mxu1 %v5084_v33  ;;  %v4308_v35 = vpack.c.bf16 %v2797_v26, %v2796_v22  ;;  %v4120_v7 = vpack.c.bf16 %v1860_v38, %v1859_v37  ;;  %v4130_v8 = vpack.c.bf16 %v1988_v59, %v1987_v61  ;;  %v1829_v22 = vld [vmem:[#allocation4 + $0x48] sm:$0x3]  ;;  %v2010_v37 = vld [vmem:[#allocation16 + $0x3b8] sm:$0xff] }
 0x45e   :  { %4103 = vmatpush3.bf16.msra.mxu1 %v4102_v36  ;;  %2595 = vmatprep.mubr.f32.mxu0 %v2508_v46  ;;  %v2781_v36 = vld [vmem:[#allocation16 + $0x858] sm:$0xff]  ;;  %v1876_v17 = vsel %vm1383_vm2, %v1871_v2, %v1875_v62  ;;  %v1992_v2 = vld [vmem:[#allocation16 + $0x328] sm:$0xff]  ;;  %v1880_v34 = vsel %vm1383_vm2, %v1875_v62, %v1879_v47  ;;  %v2017_v61 = vld [vmem:[#allocation16 + $0x3f0] sm:$0xff] }
 0x45f   :  { %4295 = vmatpush3.bf16.msra.mxu0 %v4294_v39  ;;  %4105 = vmatprep.subr.bf16.mxu1 %v4104_v16  ;;  %v2798_v39 = vld [vmem:[#allocation16 + $0x8e0] sm:$0xff]  ;;  %v4310_v5 = vpack.c.bf16 %v2781_v36, %v2780_v32  ;;  %v1883_v32 = vrot.slane %v1829_v22, 2  ;;  %v2009_v36 = vld [vmem:[#allocation16 + $0x3b0] sm:$0xff]  ;;  %v2018_v59 = vld [vmem:[#allocation16 + $0x3f8] sm:$0xff]  ;;  %v2032_v22 = vrot.slane %v5084_v33, 3 }
 0x460   :  { %4297 = vmatprep.subr.bf16.mxu0 %v4296_v42  ;;  %1816 = vmatmul.mubr.f32.gmra.mrb[20].mxu1 %v5080_v30  ;;  %v1843_v16 = vld [vmem:[#allocation16 + $0x260] sm:$0xff]  ;;  %v4312_v14 = vpack.c.bf16 %v2799_v3, %v2798_v39  ;;  %v1983_v38 = vld [vmem:[#allocation4 + $0x8] sm:$0xf8]  ;;  %v4138_v39 = vpack.c.bf16 %v1992_v2, %v1991_v31 }
 0x461   :  { %2596 = vmatmul.mubr.f32.gmra.mrb[24].mxu0 %v2506_v12  ;;  %1820 = vmatprep.mubr.f32.mxu1 %v5096_v55  ;;  %v2782_v42 = vld [vmem:[#allocation16 + $0x860] sm:$0xff]  ;;  %v4122_v46 = vpack.c.bf16 %v1844_v19, %v1843_v16  ;;  %v2785_v12 = vld [vmem:[#allocation16 + $0x878] sm:$0xff]  ;;  %v1884_v19 = vsel %vm1383_vm2, %v1879_v47, %v1883_v32 }
 0x462   :  { %4107 = vmatpush3.bf16.msra.mxu1 %v4106_v48  ;;  %2600 = vmatprep.mubr.f32.mxu0 %v2512_v60  ;;  %v4314_v48 = vpack.c.bf16 %v2783_v10, %v2782_v42  ;;  %v4318_v9 = vpack.c.bf16 %v2785_v12, %v2784_v54  ;;  %v2005_v60 = vld [vmem:[#allocation16 + $0x390] sm:$0xff]  ;;  %v1994_v16 = vld [vmem:[#allocation16 + $0x338] sm:$0xff]  ;;  %v2027_v42 = vrot.slane %v1983_v38, 3  ;;  %v2012_v10 = vld [vmem:[#allocation16 + $0x3c8] sm:$0xff] }
 0x463   :  { %4299 = vmatpush3.bf16.msra.mxu0 %v4298_v24  ;;  %4109 = vmatprep.subr.bf16.mxu1 %v4108_v1  ;;  %v1846_v24 = vld [vmem:[#allocation16 + $0x278] sm:$0xff]  ;;  %v2003_v1 = vld [vmem:[#allocation16 + $0x380] sm:$0xff]  ;;  %v1997_v12 = vld [vmem:[#allocation16 + $0x350] sm:$0xff] }
 0x464   :  { %4301 = vmatprep.subr.bf16.mxu0 %v4300_v58  ;;  %1821 = vmatmul.mubr.f32.gmra.mrb[22].mxu1 %v5091_v49  ;;  %v1826_v58 = vld [vmem:[#allocation4] sm:$0xfc]  ;;  %v4126_v56 = vpack.c.bf16 %v1846_v24, %v1845_v51  ;;  %v4128_v45 = vpack.c.bf16 %v2004_v21, %v2003_v1  ;;  %v2029_v51 = vsel %vm2023_vm5, %v2027_v42, %v2028_v44  ;;  %v2014_v54 = vld [vmem:[#allocation16 + $0x3d8] sm:$0xff]  ;;  %v2015_v21 = vld [vmem:[#allocation16 + $0x3e0] sm:$0xff] }
 0x465   :  { %2601 = vmatmul.mubr.f32.gmra.mrb[26].mxu0 %v2510_v13  ;;  %1957 = vmatprep.mubr.f32.mxu1 %v1872_v20  ;;  %v1867_v23 = vrot.slane %v1826_v58, 2  ;;  %v2008_v20 = vld [vmem:[#allocation16 + $0x3a8] sm:$0xff]  ;;  %v2013_v24 = vld [vmem:[#allocation16 + $0x3d0] sm:$0xff]  ;;  %v1998_v1 = vld [vmem:[#allocation16 + $0x358] sm:$0xff] }
 0x466   :  { %4111 = vmatpush3.bf16.msra.mxu1 %v4110_v63  ;;  %2866 = vmatprep.mubr.f32.mxu0 %v5070_v43  ;;  %v2006_v63 = vld [vmem:[#allocation16 + $0x398] sm:$0xff]  ;;  %v2016_v58 = vld [vmem:[#allocation16 + $0x3e8] sm:$0xff]  ;;  %v2321_v32 = vld [vmem:[#allocation16 + $0x5a0] sm:$0xff] }
 0x467   :  { %4303 = vmatpush3.bf16.msra.mxu0 %v4302_v4  ;;  %4113 = vmatprep.subr.bf16.mxu1 %v4112_v0  ;;  %v1868_v4 = vrot.slane %v5068_v41, 2  ;;  %v4132_v13 = vpack.c.bf16 %v2006_v63, %v2005_v60  ;;  %v1989_v0 = vld [vmem:[#allocation16 + $0x310] sm:$0xff]  ;;  %v4156_v60 = vpack.c.bf16 %v2018_v59, %v2017_v61  ;;  %v2304_v31 = vld [vmem:[#allocation16 + $0x518] sm:$0xff]  ;;  %v1984_v42 = vld [vmem:[#allocation4 + $0x40] sm:$0x7] }
 0x468   :  { %4305 = vmatprep.subr.bf16.mxu0 %v4304_v15  ;;  %v1990_v15 = vld [vmem:[#allocation16 + $0x318] sm:$0xff]  ;;  %v2001_v63 = vld [vmem:[#allocation16 + $0x370] sm:$0xff] }
 0x469   :  { %v1869_v11 = vsel %vm1383_vm2, %v1867_v23, %v1868_v4  ;;  %v4134_v26 = vpack.c.bf16 %v1990_v15, %v1989_v0  ;;  %v2000_v23 = vld [vmem:[#allocation16 + $0x368] sm:$0xff]  ;;  %v2301_v15 = vld [vmem:[#allocation16 + $0x500] sm:$0xff]  ;;  %v2311_v61 = vld [vmem:[#allocation16 + $0x550] sm:$0xff] }
 0x46a   :  { %4115 = vmatpush3.bf16.msra.mxu1 %v4114_v27  ;;  %v1874_v27 = vsel %vm1383_vm2, %v1868_v4, %v1873_v40  ;;  %v2002_v4 = vld [vmem:[#allocation16 + $0x378] sm:$0xff] }
 0x46b   :  { %4307 = vmatpush3.bf16.msra.mxu0 %v4306_v28  ;;  %4117 = vmatprep.subr.bf16.mxu1 %v4116_v29  ;;  %v1877_v28 = vrot.slane %v5091_v49, 2  ;;  %v4136_v29 = vpack.c.bf16 %v2008_v20, %v2007_v25  ;;  %v2319_v25 = vld [vmem:[#allocation16 + $0x590] sm:$0xff]  ;;  %v2320_v20 = vld [vmem:[#allocation16 + $0x598] sm:$0xff] }
 0x46c   :  { %4309 = vmatprep.subr.bf16.mxu0 %v4308_v35  ;;  %v1828_v35 = vld [vmem:[#allocation4 + $0x40] sm:$0x3]  ;;  %v2312_v59 = vld [vmem:[#allocation16 + $0x558] sm:$0xff] }
 0x46d   :  { %v1878_v3 = vsel %vm1383_vm2, %v1873_v40, %v1877_v28  ;;  %v1982_v40 = vld [vmem:[#allocation4] sm:$0xf8] }
 0x46e   :  { %4119 = vmatpush3.bf16.msra.mxu1 %v4118_v6  ;;  %v1881_v6 = vrot.slane %v1828_v35, 2  ;;  %v2024_v47 = vrot.slane %v1982_v40, 3  ;;  %v2322_v35 = vld [vmem:[#allocation16 + $0x5a8] sm:$0xff]  ;;  %v2331_v40 = vld [vmem:[#allocation16 + $0x5f0] sm:$0xff] }
 0x46f   :  { %4311 = vmatpush3.bf16.msra.mxu0 %v4310_v5  ;;  %4121 = vmatprep.subr.bf16.mxu1 %v4120_v7  ;;  %v4140_v5 = vpack.c.bf16 %v2010_v37, %v2009_v36  ;;  %v1993_v7 = vld [vmem:[#allocation16 + $0x330] sm:$0xff]  ;;  %v2033_v36 = vsel %vm2023_vm5, %v2028_v44, %v2032_v22  ;;  %v2036_v37 = vrot.slane %v5096_v55, 3  ;;  %v4200_v38 = vpack.c.bf16 %v2322_v35, %v2321_v32  ;;  %v2308_v44 = vld [vmem:[#allocation16 + $0x538] sm:$0xff] }
 0x470   :  { %4313 = vmatprep.subr.bf16.mxu0 %v4312_v14  ;;  %v2011_v14 = vld [vmem:[#allocation16 + $0x3c0] sm:$0xff]  ;;  %v4142_v18 = vpack.c.bf16 %v1994_v16, %v1993_v7  ;;  %v1882_v52 = vsel %vm1383_vm2, %v1877_v28, %v1881_v6  ;;  %v4196_v28 = vpack.c.bf16 %v2320_v20, %v2319_v25  ;;  %v2324_v7 = vld [vmem:[#allocation16 + $0x5b8] sm:$0xff]  ;;  %v2632_v20 = vld [vmem:[#allocation16 + $0x788] sm:$0xff] }
 0x471   :  { %v2037_v16 = vsel %vm2023_vm5, %v2032_v22, %v2036_v37  ;;  %v2631_v25 = vld [vmem:[#allocation16 + $0x780] sm:$0xff]  ;;  %v2296_v22 = vld [vmem:[#allocation4] sm:$0xe0]  ;;  %v5197_v32 = vld [vmem:[#allocation4 + $0x28] sm:$0xff] }
 0x472   :  { %4123 = vmatpush3.bf16.msra.mxu1 %v4122_v46  ;;  %v4144_v46 = vpack.c.bf16 %v2012_v10, %v2011_v14  ;;  %v2297_v14 = vld [vmem:[#allocation4 + $0x8] sm:$0xe0]  ;;  %v2346_v35 = vrot.slane %v5197_v32, 5 }
 0x473   :  { %4315 = vmatpush3.bf16.msra.mxu0 %v4314_v48  ;;  %4125 = vmatprep.subr.bf16.mxu1 %v4124_v50  ;;  %v1995_v48 = vld [vmem:[#allocation16 + $0x340] sm:$0xff]  ;;  %v1996_v50 = vld [vmem:[#allocation16 + $0x348] sm:$0xff] }
 0x474   :  { %4317 = vmatprep.subr.bf16.mxu0 %v4316_v53  ;;  %v4146_v43 = vpack.c.bf16 %v1996_v50, %v1995_v48  ;;  %v4148_v53 = vpack.c.bf16 %v2014_v54, %v2013_v24  ;;  %v2325_v48 = vld [vmem:[#allocation16 + $0x5c0] sm:$0xff] }
 0x475   :  { %v5192_v54 = vld [vmem:[#allocation4 + $0x18] sm:$0xff] }
 0x476   :  { %4127 = vmatpush3.bf16.msra.mxu1 %v4126_v56  ;;  %v4150_v56 = vpack.c.bf16 %v1998_v1, %v1997_v12  ;;  %v2309_v12 = vld [vmem:[#allocation16 + $0x540] sm:$0xff]  ;;  %v2310_v1 = vld [vmem:[#allocation16 + $0x548] sm:$0xff] }
 0x477   :  { %4319 = vmatpush3.bf16.msra.mxu0 %v4318_v9  ;;  %4129 = vmatprep.subr.bf16.mxu1 %v4128_v45  ;;  %v4152_v9 = vpack.c.bf16 %v2016_v58, %v2015_v21  ;;  %v1999_v45 = vld [vmem:[#allocation16 + $0x360] sm:$0xff]  ;;  %v2327_v58 = vld [vmem:[#allocation16 + $0x5d0] sm:$0xff] }
 0x478   :  { %v4154_v62 = vpack.c.bf16 %v2000_v23, %v1999_v45  ;;  %v4210_v45 = vpack.c.bf16 %v2310_v1, %v2309_v12  ;;  %v2611_v12 = vld [vmem:[#allocation4 + $0x8] sm:$0x80] }
 0x479   :  { %1958 = vmatmul.mubr.f32.vlgmr.msra.gmra.mrb[24].mxu1 %v1869_v11  ;;  %v2318_v11 = vld [vmem:[#allocation16 + $0x588] sm:$0xff] }
 0x47a   :  { %2867 = vmatmul.mubr.f32.vlgmr.msra.gmra.mrb[28].mxu0 %v5068_v41  ;;  %1962 = vmatprep.mubr.f32.mxu1 %v1876_v17  ;;  %v2302_v17 = vld [vmem:[#allocation16 + $0x508] sm:$0xff] }
 0x47b   :  { %4131 = vmatpush3.bf16.msra.mxu1 %v4130_v8  ;;  %2871 = vmatprep.mubr.f32.mxu0 %v5084_v33  ;;  %v2317_v8 = vld [vmem:[#allocation16 + $0x580] sm:$0xff] }
 0x47c   :  { %4133 = vmatprep.subr.bf16.mxu1 %v4132_v13  ;;  %v4158_v13 = vpack.c.bf16 %v2002_v4, %v2001_v63  ;;  %v4192_v0 = vpack.c.bf16 %v2318_v11, %v2317_v8  ;;  %v4214_v63 = vpack.c.bf16 %v2312_v59, %v2311_v61  ;;  %v2313_v8 = vld [vmem:[#allocation16 + $0x560] sm:$0xff]  ;;  %v2314_v11 = vld [vmem:[#allocation16 + $0x568] sm:$0xff]  ;;  %v2655_v59 = vrot.slane %v2611_v12, 7 }
 0x47d   :  { %1963 = vmatmul.mubr.f32.gmra.mrb[26].mxu1 %v1874_v27  ;;  %v4194_v27 = vpack.c.bf16 %v2302_v17, %v2301_v15  ;;  %v2315_v17 = vld [vmem:[#allocation16 + $0x570] sm:$0xff]  ;;  %v2906_v12 = vld [vmem:[#allocation16 + $0x920] sm:$0xff] }
 0x47e   :  { %2872 = vmatmul.mubr.f32.gmra.mrb[30].mxu0 %v5080_v30  ;;  %1967 = vmatprep.mubr.f32.mxu1 %v1880_v34  ;;  %v2030_v34 = vrot.slane %v5080_v30, 3  ;;  %v2323_v30 = vld [vmem:[#allocation16 + $0x5b0] sm:$0xff] }
 0x47f   :  { %4135 = vmatpush3.bf16.msra.mxu1 %v4134_v26  ;;  %2876 = vmatprep.mubr.f32.mxu0 %v5096_v55  ;;  %v2025_v26 = vrot.slane %v5068_v41, 3  ;;  %v1985_v41 = vld [vmem:[#allocation4 + $0x48] sm:$0x7]  ;;  %v4204_v10 = vpack.c.bf16 %v2324_v7, %v2323_v30  ;;  %v2635_v30 = vld [vmem:[#allocation16 + $0x7a0] sm:$0xff]  ;;  %v2636_v7 = vld [vmem:[#allocation16 + $0x7a8] sm:$0xff] }
 0x480   :  { %4137 = vmatprep.subr.bf16.mxu1 %v4136_v29  ;;  %v2303_v29 = vld [vmem:[#allocation16 + $0x510] sm:$0xff] }
 0x481   :  { %1968 = vmatmul.mubr.f32.gmra.mrb[28].mxu1 %v1878_v3  ;;  %v2026_v2 = vsel %vm2023_vm5, %v2024_v47, %v2025_v26  ;;  %v4198_v33 = vpack.c.bf16 %v2304_v31, %v2303_v29  ;;  %v2306_v3 = vld [vmem:[#allocation16 + $0x528] sm:$0xff]  ;;  %v2031_v6 = vsel %vm2023_vm5, %v2025_v26, %v2030_v34  ;;  %v2316_v47 = vld [vmem:[#allocation16 + $0x578] sm:$0xff]  ;;  %v2338_v31 = vrot.slane %v2296_v22, 5 }
 0x482   :  { %2877 = vmatmul.mubr.f32.gmra.mrb[32].mxu0 %v5091_v49  ;;  %1972 = vmatprep.mubr.f32.mxu1 %v1884_v19  ;;  %v2040_v19 = vrot.slane %v1985_v41, 3  ;;  %v4222_v26 = vpack.c.bf16 %v2316_v47, %v2315_v17  ;;  %v2616_v29 = vld [vmem:[#allocation16 + $0x708] sm:$0xff]  ;;  %v2625_v47 = vld [vmem:[#allocation16 + $0x750] sm:$0xff] }
 0x483   :  { %4139 = vmatpush3.bf16.msra.mxu1 %v4138_v39  ;;  %2881 = vmatprep.mubr.f32.mxu0 %v5175_v57  ;;  %v2305_v39 = vld [vmem:[#allocation16 + $0x520] sm:$0xff]  ;;  %v2644_v22 = vld [vmem:[#allocation16 + $0x7e8] sm:$0xff] }
 0x484   :  { %4141 = vmatprep.subr.bf16.mxu1 %v4140_v5  ;;  %v2034_v5 = vrot.slane %v5091_v49, 3  ;;  %v4202_v55 = vpack.c.bf16 %v2306_v3, %v2305_v39  ;;  %v2326_v49 = vld [vmem:[#allocation16 + $0x5c8] sm:$0xff]  ;;  %v2041_v50 = vsel %vm2023_vm5, %v2036_v37, %v2040_v19  ;;  %v2618_v39 = vld [vmem:[#allocation16 + $0x718] sm:$0xff] }
 0x485   :  { %1973 = vmatmul.mubr.f32.gmra.mrb[30].mxu1 %v1882_v52  ;;  %v5208_v19 = vld [vmem:[#allocation4 + $0x38] sm:$0xff] }
 0x486   :  { %2114 = vmatprep.mubr.f32.mxu1 %v2029_v51  ;;  %2882 = vmatmul.mubr.f32.gmra.mrb[34].mxu0 %v5175_v57  ;;  %v2035_v52 = vsel %vm2023_vm5, %v2030_v34, %v2034_v5  ;;  %v2341_v51 = vrot.slane %v2297_v14, 5  ;;  %v2634_v34 = vld [vmem:[#allocation16 + $0x798] sm:$0xff]  ;;  %v2299_v14 = vld [vmem:[#allocation4 + $0x48] sm:$0x1f] }
 0x487   :  { %4143 = vmatpush3.bf16.msra.mxu1 %v4142_v18  ;;  %v2307_v18 = vld [vmem:[#allocation16 + $0x530] sm:$0xff] }
 0x488   :  { %4145 = vmatprep.subr.bf16.mxu1 %v4144_v46  ;;  %v2038_v46 = vrot.slane %v1984_v42, 3  ;;  %v4206_v24 = vpack.c.bf16 %v2308_v44, %v2307_v18  ;;  %v2350_v42 = vrot.slane %v5208_v19, 5  ;;  %v2619_v18 = vld [vmem:[#allocation16 + $0x720] sm:$0xff]  ;;  %v2620_v44 = vld [vmem:[#allocation16 + $0x728] sm:$0xff] }
 0x48a   :  { %v2039_v21 = vsel %vm2023_vm5, %v2034_v5, %v2038_v46  ;;  %v5212_v46 = vld [vmem:[#allocation4 + $0x30] sm:$0xff] }
 0x48b   :  { %4147 = vmatpush3.bf16.msra.mxu1 %v4146_v43  ;;  %v2342_v43 = vrot.slane %v5192_v54, 5 }
 0x48c   :  { %4149 = vmatprep.subr.bf16.mxu1 %v4148_v53  ;;  %v4208_v53 = vpack.c.bf16 %v2326_v49, %v2325_v48  ;;  %v2348_v48 = vrot.slane %v5212_v46, 5  ;;  %v2637_v49 = vld [vmem:[#allocation16 + $0x7b0] sm:$0xff] }
 0x48f   :  { %4151 = vmatpush3.bf16.msra.mxu1 %v4150_v56  ;;  %v2328_v56 = vld [vmem:[#allocation16 + $0x5d8] sm:$0xff] }
 0x490   :  { %4153 = vmatprep.subr.bf16.mxu1 %v4152_v9  ;;  %v2343_v9 = vsel %vm2337_vm6, %v2341_v51, %v2342_v43  ;;  %v4212_v23 = vpack.c.bf16 %v2328_v56, %v2327_v58  ;;  %v2351_v51 = vsel %vm2337_vm6, %v2346_v35, %v2350_v42  ;;  %v2622_v58 = vld [vmem:[#allocation16 + $0x738] sm:$0xff] }
 0x493   :  { %4155 = vmatpush3.bf16.msra.mxu1 %v4154_v62  ;;  %v2329_v62 = vld [vmem:[#allocation16 + $0x5e0] sm:$0xff] }
 0x494   :  { %4157 = vmatprep.subr.bf16.mxu1 %v4156_v60  ;;  %v2330_v60 = vld [vmem:[#allocation16 + $0x5e8] sm:$0xff] }
 0x495   :  { %v4216_v4 = vpack.c.bf16 %v2330_v60, %v2329_v62  ;;  %v2656_v60 = vrot.slane %v5192_v54, 7 }
 0x497   :  { %4159 = vmatpush3.bf16.msra.mxu1 %v4158_v13  ;;  %v2332_v13 = vld [vmem:[#allocation16 + $0x5f8] sm:$0xff] }
 0x498   :  { %4193 = vmatprep.subr.bf16.mxu1 %v4192_v0  ;;  %v4218_v0 = vpack.c.bf16 %v2314_v11, %v2313_v8  ;;  %v4220_v15 = vpack.c.bf16 %v2332_v13, %v2331_v40  ;;  %v2624_v8 = vld [vmem:[#allocation16 + $0x748] sm:$0xff]  ;;  %v2641_v40 = vld [vmem:[#allocation16 + $0x7d0] sm:$0xff]  ;;  %v2642_v13 = vld [vmem:[#allocation16 + $0x7d8] sm:$0xff] }
 0x499   :  { %v4276_v17 = vpack.c.bf16 %v2642_v13, %v2641_v40 }
 0x49a   :  { %2115 = vmatmul.mubr.f32.vlgmr.msra.gmra.mrb[32].mxu1 %v2026_v2  ;;  %v2633_v2 = vld [vmem:[#allocation16 + $0x790] sm:$0xff] }
 0x49b   :  { %2119 = vmatprep.mubr.f32.mxu1 %v2033_v36  ;;  %4195 = vmatpush3.bf16.msra.mxu1 %v4194_v27  ;;  %v4256_v27 = vpack.c.bf16 %v2632_v20, %v2631_v25  ;;  %v5200_v36 = vld [vmem:[#allocation4 + $0x10] sm:$0xff]  ;;  %v4260_v41 = vpack.c.bf16 %v2634_v34, %v2633_v2 }
 0x49c   :  { %4197 = vmatprep.subr.bf16.mxu1 %v4196_v28  ;;  %v2615_v28 = vld [vmem:[#allocation16 + $0x700] sm:$0xff]  ;;  %v2339_v37 = vrot.slane %v5200_v36, 5  ;;  %v2626_v25 = vld [vmem:[#allocation16 + $0x758] sm:$0xff] }
 0x49d   :  { %v2643_v20 = vld [vmem:[#allocation16 + $0x7e0] sm:$0xff]  ;;  %v4278_v54 = vpack.c.bf16 %v2626_v25, %v2625_v47  ;;  %v2911_v25 = vld [vmem:[#allocation16 + $0x948] sm:$0xff] }
 0x49e   :  { %2120 = vmatmul.mubr.f32.gmra.mrb[34].mxu1 %v2031_v6  ;;  %v2340_v3 = vsel %vm2337_vm6, %v2338_v31, %v2339_v37  ;;  %v5204_v6 = vld [vmem:[#allocation4 + $0x20] sm:$0xff]  ;;  %v2646_v31 = vld [vmem:[#allocation16 + $0x7f8] sm:$0xff]  ;;  %v2910_v47 = vld [vmem:[#allocation16 + $0x940] sm:$0xff] }
 0x49f   :  { %2124 = vmatprep.mubr.f32.mxu1 %v2037_v16  ;;  %4199 = vmatpush3.bf16.msra.mxu1 %v4198_v33  ;;  %v4258_v33 = vpack.c.bf16 %v2616_v29, %v2615_v28  ;;  %v2344_v5 = vrot.slane %v5204_v6, 5  ;;  %v2347_v16 = vsel %vm2337_vm6, %v2342_v43, %v2346_v35  ;;  %v2298_v43 = vld [vmem:[#allocation4 + $0x40] sm:$0x1f]  ;;  %v2645_v29 = vld [vmem:[#allocation16 + $0x7f0] sm:$0xff] }
 0x4a0   :  { %4201 = vmatprep.subr.bf16.mxu1 %v4200_v38  ;;  %v2617_v38 = vld [vmem:[#allocation16 + $0x710] sm:$0xff]  ;;  %v2628_v28 = vld [vmem:[#allocation16 + $0x768] sm:$0xff]  ;;  %v4284_v34 = vpack.c.bf16 %v2646_v31, %v2645_v29  ;;  %v2913_v31 = vld [vmem:[#allocation16 + $0x958] sm:$0xff] }
 0x4a1   :  { %v2349_v56 = vsel %vm2337_vm6, %v2344_v5, %v2348_v48  ;;  %v2629_v35 = vld [vmem:[#allocation16 + $0x770] sm:$0xff] }
 0x4a2   :  { %2125 = vmatmul.mubr.f32.gmra.mrb[36].mxu1 %v2035_v52  ;;  %v2345_v52 = vsel %vm2337_vm6, %v2339_v37, %v2344_v5  ;;  %v2630_v37 = vld [vmem:[#allocation16 + $0x778] sm:$0xff]  ;;  %v2902_v5 = vld [vmem:[#allocation16 + $0x900] sm:$0xff]  ;;  %v2912_v29 = vld [vmem:[#allocation16 + $0x950] sm:$0xff] }
 0x4a3   :  { %2129 = vmatprep.mubr.f32.mxu1 %v2041_v50  ;;  %4203 = vmatpush3.bf16.msra.mxu1 %v4202_v55  ;;  %v4262_v55 = vpack.c.bf16 %v2618_v39, %v2617_v38  ;;  %v2638_v50 = vld [vmem:[#allocation16 + $0x7b8] sm:$0xff]  ;;  %v2610_v38 = vld [vmem:[#allocation4] sm:$0x80]  ;;  %v4286_v39 = vpack.c.bf16 %v2630_v37, %v2629_v35  ;;  %v4342_v35 = vpack.c.bf16 %v2913_v31, %v2912_v29 }
 0x4a4   :  { %4205 = vmatprep.subr.bf16.mxu1 %v4204_v10  ;;  %v4264_v10 = vpack.c.bf16 %v2636_v7, %v2635_v30  ;;  %v4268_v1 = vpack.c.bf16 %v2638_v50, %v2637_v49  ;;  %v2903_v30 = vld [vmem:[#allocation16 + $0x908] sm:$0xff]  ;;  %v2652_v7 = vrot.slane %v2610_v38, 7  ;;  %v2658_v49 = vrot.slane %v5204_v6, 7  ;;  %v2922_v50 = vld [vmem:[#allocation16 + $0x9a0] sm:$0xff]  ;;  %v2924_v6 = vld [vmem:[#allocation16 + $0x9b0] sm:$0xff] }
 0x4a5   :  { %v2932_v38 = vld [vmem:[#allocation16 + $0x9f0] sm:$0xff] }
 0x4a6   :  { %2130 = vmatmul.mubr.f32.gmra.mrb[38].mxu1 %v2039_v21  ;;  %v2621_v21 = vld [vmem:[#allocation16 + $0x730] sm:$0xff] }
 0x4a7   :  { %4207 = vmatpush3.bf16.msra.mxu1 %v4206_v24  ;;  %2428 = vmatprep.mubr.f32.mxu1 %v2343_v9  ;;  %v2354_v24 = vrot.slane %v2299_v14, 5  ;;  %v2352_v9 = vrot.slane %v2298_v43, 5  ;;  %v4270_v62 = vpack.c.bf16 %v2622_v58, %v2621_v21  ;;  %v2653_v14 = vrot.slane %v5200_v36, 7  ;;  %v2613_v36 = vld [vmem:[#allocation4 + $0x48] sm:$0x7f] }
 0x4a8   :  { %4209 = vmatprep.subr.bf16.mxu1 %v4208_v53  ;;  %v4266_v53 = vpack.c.bf16 %v2620_v44, %v2619_v18  ;;  %v2904_v44 = vld [vmem:[#allocation16 + $0x910] sm:$0xff]  ;;  %v2664_v43 = vrot.slane %v5208_v19, 7  ;;  %v2662_v58 = vrot.slane %v5212_v46, 7  ;;  %v2892_v46 = vld [vmem:[#allocation4 + $0x18] sm:$0xfe] }
 0x4a9   :  { %v2355_v61 = vsel %vm2337_vm6, %v2350_v42, %v2354_v24  ;;  %v2353_v11 = vsel %vm2337_vm6, %v2348_v48, %v2352_v9  ;;  %v2921_v42 = vld [vmem:[#allocation16 + $0x998] sm:$0xff]  ;;  %v2654_v48 = vsel %vm2651_vm7, %v2652_v7, %v2653_v14  ;;  %v2659_v21 = vsel %vm2651_vm7, %v2653_v14, %v2658_v49 }
 0x4aa   :  { %v2917_v7 = vld [vmem:[#allocation16 + $0x978] sm:$0xff] }
 0x4ab   :  { %4211 = vmatpush3.bf16.msra.mxu1 %v4210_v45  ;;  %v2639_v45 = vld [vmem:[#allocation16 + $0x7c0] sm:$0xff] }
 0x4ac   :  { %4213 = vmatprep.subr.bf16.mxu1 %v4212_v23  ;;  %v2640_v23 = vld [vmem:[#allocation16 + $0x7c8] sm:$0xff]  ;;  %v2891_v14 = vld [vmem:[#allocation4 + $0x10] sm:$0xfe] }
 0x4af   :  { %4215 = vmatpush3.bf16.msra.mxu1 %v4214_v63  ;;  %v4272_v63 = vpack.c.bf16 %v2640_v23, %v2639_v45  ;;  %v2668_v45 = vrot.slane %v2613_v36, 7  ;;  %v2612_v23 = vld [vmem:[#allocation4 + $0x40] sm:$0x7f] }
 0x4b0   :  { %4217 = vmatprep.subr.bf16.mxu1 %v4216_v4  ;;  %v2623_v4 = vld [vmem:[#allocation16 + $0x740] sm:$0xff] }
 0x4b1   :  { %v2669_v40 = vsel %vm2651_vm7, %v2664_v43, %v2668_v45 }
 0x4b3   :  { %4219 = vmatpush3.bf16.msra.mxu1 %v4218_v0  ;;  %v2657_v0 = vsel %vm2651_vm7, %v2655_v59, %v2656_v60 }
 0x4b4   :  { %4221 = vmatprep.subr.bf16.mxu1 %v4220_v15  ;;  %v4274_v15 = vpack.c.bf16 %v2624_v8, %v2623_v4  ;;  %v2666_v4 = vrot.slane %v2612_v23, 7  ;;  %v2926_v8 = vld [vmem:[#allocation16 + $0x9c0] sm:$0xff] }
 0x4b7   :  { %4223 = vmatpush3.bf16.msra.mxu1 %v4222_v26  ;;  %v4280_v26 = vpack.c.bf16 %v2644_v22, %v2643_v20  ;;  %v2667_v20 = vsel %vm2651_vm7, %v2662_v58, %v2666_v4  ;;  %v2928_v22 = vld [vmem:[#allocation16 + $0x9d0] sm:$0xff] }
 0x4b8   :  { %4257 = vmatprep.subr.bf16.mxu1 %v4256_v27  ;;  %v2627_v27 = vld [vmem:[#allocation16 + $0x760] sm:$0xff] }
 0x4b9   :  { %v4282_v2 = vpack.c.bf16 %v2628_v28, %v2627_v27  ;;  %v4338_v27 = vpack.c.bf16 %v2911_v25, %v2910_v47 }
 0x4ba   :  { %2429 = vmatmul.mubr.f32.vlgmr.msra.gmra.mrb[40].mxu1 %v2340_v3 }
 0x4bb   :  { %2433 = vmatprep.mubr.f32.mxu1 %v2347_v16  ;;  %4259 = vmatpush3.bf16.msra.mxu1 %v4258_v33  ;;  %v2918_v33 = vld [vmem:[#allocation16 + $0x980] sm:$0xff]  ;;  %v2920_v16 = vld [vmem:[#allocation16 + $0x990] sm:$0xff] }
 0x4bc   :  { %4261 = vmatprep.subr.bf16.mxu1 %v4260_v41  ;;  %v2919_v41 = vld [vmem:[#allocation16 + $0x988] sm:$0xff]  ;;  %v4324_v18 = vpack.c.bf16 %v2921_v42, %v2920_v16 }
 0x4bd   :  { %v4320_v3 = vpack.c.bf16 %v2919_v41, %v2918_v33  ;;  %v2914_v33 = vld [vmem:[#allocation16 + $0x960] sm:$0xff]  ;;  %v2915_v41 = vld [vmem:[#allocation16 + $0x968] sm:$0xff] }
 0x4be   :  { %2434 = vmatmul.mubr.f32.gmra.mrb[42].mxu1 %v2345_v52  ;;  %v2905_v52 = vld [vmem:[#allocation16 + $0x918] sm:$0xff]  ;;  %v2893_v16 = vld [vmem:[#allocation4 + $0x20] sm:$0xff] }
 0x4bf   :  { %2438 = vmatprep.mubr.f32.mxu1 %v2351_v51  ;;  %4263 = vmatpush3.bf16.msra.mxu1 %v4262_v55  ;;  %v2660_v55 = vrot.slane %v5197_v32, 7  ;;  %v2923_v51 = vld [vmem:[#allocation16 + $0x9a8] sm:$0xff]  ;;  %v4326_v32 = vpack.c.bf16 %v2905_v52, %v2904_v44  ;;  %v2895_v44 = vld [vmem:[#allocation4 + $0x30] sm:$0xff]  ;;  %v2944_v52 = vrot.slane %v2891_v14, 1 }
 0x4c0   :  { %4265 = vmatprep.subr.bf16.mxu1 %v4264_v10  ;;  %v4322_v10 = vpack.c.bf16 %v2903_v30, %v2902_v5  ;;  %v2916_v30 = vld [vmem:[#allocation16 + $0x970] sm:$0xff] }
 0x4c1   :  { %v2661_v24 = vsel %vm2651_vm7, %v2656_v60, %v2660_v55  ;;  %v2665_v9 = vsel %vm2651_vm7, %v2660_v55, %v2664_v43  ;;  %v2909_v60 = vld [vmem:[#allocation16 + $0x938] sm:$0xff]  ;;  %v4350_v42 = vpack.c.bf16 %v2917_v7, %v2916_v30  ;;  %v2896_v55 = vld [vmem:[#allocation4 + $0x38] sm:$0xff] }
 0x4c2   :  { %2439 = vmatmul.mubr.f32.gmra.mrb[44].mxu1 %v2349_v56  ;;  %v2925_v56 = vld [vmem:[#allocation16 + $0x9b8] sm:$0xff] }
 0x4c3   :  { %2443 = vmatprep.mubr.f32.mxu1 %v2355_v61  ;;  %4267 = vmatpush3.bf16.msra.mxu1 %v4266_v53  ;;  %v4328_v53 = vpack.c.bf16 %v2923_v51, %v2922_v50  ;;  %v5230_v61 = vld [vmem:[#allocation4 + $0x28] sm:$0xff]  ;;  %v4332_v59 = vpack.c.bf16 %v2925_v56, %v2924_v6  ;;  %v2900_v50 = vld [vmem:[#allocation4 + $0x58] sm:$0x1] }
 0x4c4   :  { %4269 = vmatprep.subr.bf16.mxu1 %v4268_v1  ;;  %v2907_v1 = vld [vmem:[#allocation16 + $0x928] sm:$0xff]  ;;  %v2948_v13 = vrot.slane %v5230_v61, 1  ;;  %v2960_v43 = vrot.slane %v2900_v50, 1 }
 0x4c5   :  { %v4330_v19 = vpack.c.bf16 %v2907_v1, %v2906_v12 }
 0x4c6   :  { %2444 = vmatmul.mubr.f32.gmra.mrb[46].mxu1 %v2353_v11  ;;  %v2927_v11 = vld [vmem:[#allocation16 + $0x9c8] sm:$0xff] }
 0x4c7   :  { %4271 = vmatpush3.bf16.msra.mxu1 %v4270_v62  ;;  %2742 = vmatprep.mubr.f32.mxu1 %v2657_v0  ;;  %v2908_v62 = vld [vmem:[#allocation16 + $0x930] sm:$0xff] }
 0x4c8   :  { %4273 = vmatprep.subr.bf16.mxu1 %v4272_v63  ;;  %v2663_v63 = vsel %vm2651_vm7, %v2658_v49, %v2662_v58  ;;  %v4334_v0 = vpack.c.bf16 %v2909_v60, %v2908_v62  ;;  %v2950_v49 = vrot.slane %v2895_v44, 1 }
 0x4cb   :  { %4275 = vmatpush3.bf16.msra.mxu1 %v4274_v15  ;;  %v2947_v15 = vrot.slane %v2892_v46, 1 }
 0x4cc   :  { %4277 = vmatprep.subr.bf16.mxu1 %v4276_v17  ;;  %v4336_v17 = vpack.c.bf16 %v2927_v11, %v2926_v8 }
 0x4cf   :  { %4279 = vmatpush3.bf16.msra.mxu1 %v4278_v54  ;;  %v2929_v54 = vld [vmem:[#allocation16 + $0x9d8] sm:$0xff] }
 0x4d0   :  { %4281 = vmatprep.subr.bf16.mxu1 %v4280_v26  ;;  %v2949_v26 = vsel %vm1105_vm1, %v2947_v15, %v2948_v13  ;;  %v4340_v28 = vpack.c.bf16 %v2929_v54, %v2928_v22 }
 0x4d3   :  { %4283 = vmatpush3.bf16.msra.mxu1 %v4282_v2  ;;  %v2930_v2 = vld [vmem:[#allocation16 + $0x9e0] sm:$0xff] }
 0x4d4   :  { %4285 = vmatprep.subr.bf16.mxu1 %v4284_v34  ;;  %v2931_v34 = vld [vmem:[#allocation16 + $0x9e8] sm:$0xff] }
 0x4d5   :  { %v4344_v37 = vpack.c.bf16 %v2931_v34, %v2930_v2 }
 0x4d7   :  { %4287 = vmatpush3.bf16.msra.mxu1 %v4286_v39  ;;  %v2933_v39 = vld [vmem:[#allocation16 + $0x9f8] sm:$0xff] }
 0x4d8   :  { %4321 = vmatprep.subr.bf16.mxu1 %v4320_v3  ;;  %v4346_v3 = vpack.c.bf16 %v2915_v41, %v2914_v33  ;;  %v4348_v5 = vpack.c.bf16 %v2933_v39, %v2932_v38 }
 0x4da   :  { %2743 = vmatmul.mubr.f32.vlgmr.msra.gmra.mrb[48].mxu1 %v2654_v48 }
 0x4db   :  { %2747 = vmatprep.mubr.f32.mxu1 %v2661_v24  ;;  %4323 = vmatpush3.bf16.msra.mxu1 %v4322_v10  ;;  %v2945_v10 = vrot.slane %v2893_v16, 1  ;;  %v2956_v24 = vrot.slane %v5175_v57, 1 }
 0x4dc   :  { %4325 = vmatprep.subr.bf16.mxu1 %v4324_v18  ;;  %v2952_v18 = vrot.slane %v2896_v55, 1 }
 0x4dd   :  { %v2946_v48 = vsel %vm1105_vm1, %v2944_v52, %v2945_v10  ;;  %v2951_v36 = vsel %vm1105_vm1, %v2945_v10, %v2950_v49  ;;  %v2961_v1 = vsel %vm1105_vm1, %v2956_v24, %v2960_v43 }
 0x4de   :  { %2748 = vmatmul.mubr.f32.gmra.mrb[50].mxu1 %v2659_v21  ;;  %v2953_v51 = vsel %vm1105_vm1, %v2948_v13, %v2952_v18  ;;  %v2955_v21 = vsel %vm1105_vm1, %v2950_v49, %v2956_v24 }
 0x4df   :  { %2752 = vmatprep.mubr.f32.mxu1 %v2665_v9  ;;  %4327 = vmatpush3.bf16.msra.mxu1 %v4326_v32  ;;  %v2899_v32 = vld [vmem:[#allocation4 + $0x50] sm:$0x1] }
 0x4e0   :  { %4329 = vmatprep.subr.bf16.mxu1 %v4328_v53  ;;  %v2957_v53 = vsel %vm1105_vm1, %v2952_v18, %v2956_v24  ;;  %v2958_v12 = vrot.slane %v2899_v32, 1 }
 0x4e2   :  { %2753 = vmatmul.mubr.f32.gmra.mrb[52].mxu1 %v2663_v63  ;;  %v2959_v58 = vsel %vm1105_vm1, %v2956_v24, %v2958_v12 }
 0x4e3   :  { %2757 = vmatprep.mubr.f32.mxu1 %v2669_v40  ;;  %4331 = vmatpush3.bf16.msra.mxu1 %v4330_v19 }
 0x4e4   :  { %4333 = vmatprep.subr.bf16.mxu1 %v4332_v59 }
 0x4e6   :  { %2758 = vmatmul.mubr.f32.gmra.mrb[54].mxu1 %v2667_v20 }
 0x4e7   :  { %4335 = vmatpush3.bf16.msra.mxu1 %v4334_v0  ;;  %3034 = vmatprep.mubr.f32.mxu1 %v2949_v26 }
 0x4e8   :  { %4337 = vmatprep.subr.bf16.mxu1 %v4336_v17 }
 0x4eb   :  { %4339 = vmatpush3.bf16.msra.mxu1 %v4338_v27 }
 0x4ec   :  { %4341 = vmatprep.subr.bf16.mxu1 %v4340_v28 }
 0x4ef   :  { %4343 = vmatpush3.bf16.msra.mxu1 %v4342_v35 }
 0x4f0   :  { %4345 = vmatprep.subr.bf16.mxu1 %v4344_v37 }
 0x4f3   :  { %4347 = vmatpush3.bf16.msra.mxu1 %v4346_v3 }
 0x4f4   :  { %4349 = vmatprep.subr.bf16.mxu1 %v4348_v5 }
 0x4f7   :  { %4351 = vmatpush3.bf16.msra.mxu1 %v4350_v42 }
 0x4fa   :  { %3035 = vmatmul.mubr.f32.vlgmr.msra.gmra.mrb[56].mxu1 %v2946_v48 }
 0x4fb   :  { %3039 = vmatprep.mubr.f32.mxu1 %v2953_v51 }
 0x4fe   :  { %3040 = vmatmul.mubr.f32.gmra.mrb[58].mxu1 %v2951_v36 }
 0x4ff   :  { %3044 = vmatprep.mubr.f32.mxu1 %v2957_v53 }
 0x502   :  { %3045 = vmatmul.mubr.f32.gmra.mrb[60].mxu1 %v2955_v21 }
 0x503   :  { %3049 = vmatprep.mubr.f32.mxu1 %v2961_v1 }
 0x506   :  { %3050 = vmatmul.mubr.f32.gmra.mrb[62].mxu1 %v2959_v58 }
 0x50b   :  { %v3275_v57 = vpop.f32.mrb[8].mxu1 }
 0x50c   :  { %v3451_v6 = vpop.f32.mrb[12].mxu0  ;;  %v3276_v56 = vpop.f32.mrb[9].mxu1 }
 0x50d   :  { %v3452_v9 = vpop.f32.mrb[13].mxu0  ;;  %v3277_v45 = vadd.f32 %v3276_v56, %v3275_v57 }
 0x50e   :  { %v5245_v23 = vadd.f32 %v3452_v9, %v3451_v6 }
 0x50f   :  { %v3278_v19 = vpop.f32.mrb[10].mxu1 }
 0x510   :  { %v3454_v61 = vpop.f32.mrb[14].mxu0  ;;  %v3279_v59 = vpop.f32.mrb[11].mxu1 }
 0x511   :  { %v3455_v62 = vpop.f32.mrb[15].mxu0  ;;  %v3280_v60 = vadd.f32 %v3279_v59, %v3278_v19  ;;  %v3074_v19 = vld [vmem:[#allocation19] sm:$0xff] }
 0x512   :  { %v5247_v63 = vadd.f32 %v3455_v62, %v3454_v61  ;;  %v3075_v61 = vld [vmem:[#allocation19 + $0x8] sm:$0xff] }
 0x513   :  { %v3281_v4 = vpop.f32.mrb[12].mxu1 }
 0x514   :  { %v3457_v46 = vpop.f32.mrb[16].mxu0  ;;  %v3282_v8 = vpop.f32.mrb[13].mxu1 }
 0x515   :  { %v3458_v11 = vpop.f32.mrb[17].mxu0  ;;  %v3283_v40 = vadd.f32 %v3282_v8, %v3281_v4 }
 0x516   :  { %v5249_v13 = vadd.f32 %v3458_v11, %v3457_v46 }
 0x517   :  { %v3284_v0 = vpop.f32.mrb[14].mxu1 }
 0x518   :  { %v3460_v15 = vpop.f32.mrb[18].mxu0  ;;  %v3285_v17 = vpop.f32.mrb[15].mxu1 }
 0x519   :  { %v3461_v47 = vpop.f32.mrb[19].mxu0  ;;  %v3286_v25 = vadd.f32 %v3285_v17, %v3284_v0 }
 0x51a   :  { %v5251_v20 = vadd.f32 %v3461_v47, %v3460_v15 }
 0x52b   :  { %v3319_v22 = vpop.f32.mrb[16].mxu1 }
 0x52c   :  { %v3539_v54 = vpop.f32.mrb[20].mxu0  ;;  %v3320_v26 = vpop.f32.mrb[17].mxu1 }
 0x52d   :  { %v3540_v27 = vpop.f32.mrb[21].mxu0  ;;  %v3321_v28 = vadd.f32 %v3320_v26, %v3319_v22 }
 0x52e   :  { %v5253_v29 = vadd.f32 %v3540_v27, %v3539_v54 }
 0x52f   :  { %v1808_v31 = vadd.f32 %v3321_v28, %v3277_v45  ;;  %v3322_v2 = vpop.f32.mrb[18].mxu1 }
 0x530   :  { %v3542_v34 = vpop.f32.mrb[22].mxu0  ;;  %v3323_v35 = vpop.f32.mrb[19].mxu1 }
 0x531   :  { %v3543_v37 = vpop.f32.mrb[23].mxu0  ;;  %v3324_v33 = vadd.f32 %v3323_v35, %v3322_v2 }
 0x532   :  { %v5255_v41 = vadd.f32 %v3543_v37, %v3542_v34 }
 0x533   :  { %v1813_v38 = vadd.f32 %v3324_v33, %v3280_v60  ;;  %v3325_v39 = vpop.f32.mrb[20].mxu1  ;;  %v4352_v60 = vpack.c.bf16 %v3075_v61, %v3074_v19 }
 0x534   :  { %v3545_v3 = vpop.f32.mrb[24].mxu0  ;;  %v3326_v5 = vpop.f32.mrb[21].mxu1 }
 0x535   :  { %v3546_v30 = vpop.f32.mrb[25].mxu0  ;;  %v3327_v7 = vadd.f32 %v3326_v5, %v3325_v39  ;;  %4353 = vmatprep.subr.bf16.mxu0 %v4352_v60 }
 0x536   :  { %v5257_v16 = vadd.f32 %v3546_v30, %v3545_v3  ;;  %4355 = vmatpush3.bf16.msra.mxu0 %v4352_v60 }
 0x537   :  { %v1818_v42 = vadd.f32 %v3327_v7, %v3283_v40  ;;  %v3328_v55 = vpop.f32.mrb[22].mxu1 }
 0x538   :  { %v3548_v14 = vpop.f32.mrb[26].mxu0  ;;  %v3329_v10 = vpop.f32.mrb[23].mxu1 }
 0x539   :  { %v3549_v18 = vpop.f32.mrb[27].mxu0  ;;  %v3330_v44 = vadd.f32 %v3329_v10, %v3328_v55 }
 0x53a   :  { %v5259_v52 = vadd.f32 %v3549_v18, %v3548_v14 }
 0x53b   :  { %v1823_v48 = vadd.f32 %v3330_v44, %v3286_v25  ;;  %v3076_v25 = vld [vmem:[#allocation19 + $0x10] sm:$0xf] }
 0x53c   :  { %3724 = vmatprep.subr.msk.mxu0 %vm2180_vm3, %v3076_v25 }
 0x53d   :  { %3725 = vmatpush3.msk.msra.mxu0 %vm2180_vm3, %v3076_v25 }
 0x54c   :  { %v3363_v49 = vpop.f32.mrb[24].mxu1 }
 0x54d   :  { %v3627_v50 = vpop.f32.mrb[28].mxu0  ;;  %v3364_v51 = vpop.f32.mrb[25].mxu1 }
 0x54e   :  { %v3365_v24 = vadd.f32 %v3364_v51, %v3363_v49  ;;  %v3628_v43 = vpop.f32.mrb[29].mxu0 }
 0x54f   :  { %v5261_v32 = vadd.f32 %v3628_v43, %v3627_v50 }
 0x550   :  { %v1978_v36 = vadd.f32 %v3365_v24, %v1808_v31  ;;  %v3366_v53 = vpop.f32.mrb[26].mxu1 }
 0x551   :  { %v3630_v12 = vpop.f32.mrb[30].mxu0  ;;  %v3367_v1 = vpop.f32.mrb[27].mxu1 }
 0x552   :  { %v3368_v21 = vadd.f32 %v3367_v1, %v3366_v53  ;;  %v3631_v58 = vpop.f32.mrb[31].mxu0 }
 0x553   :  { %v5263_v57 = vadd.f32 %v3631_v58, %v3630_v12 }
 0x554   :  { %v1979_v6 = vadd.f32 %v3368_v21, %v1813_v38  ;;  %v3369_v56 = vpop.f32.mrb[28].mxu1 }
 0x555   :  { %v3633_v9 = vpop.f32.mrb[32].mxu0  ;;  %v3370_v45 = vpop.f32.mrb[29].mxu1 }
 0x556   :  { %v3371_v59 = vadd.f32 %v3370_v45, %v3369_v56  ;;  %v3634_v62 = vpop.f32.mrb[33].mxu0 }
 0x557   :  { %v5265_v4 = vadd.f32 %v3634_v62, %v3633_v9 }
 0x558   :  { %v1980_v46 = vadd.f32 %v3371_v59, %v1818_v42  ;;  %v3372_v8 = vpop.f32.mrb[30].mxu1 }
 0x559   :  { %v3373_v11 = vpop.f32.mrb[31].mxu1  ;;  %v3636_v40 = vpop.f32.mrb[34].mxu0 }
 0x55a   :  { %v3374_v0 = vadd.f32 %v3373_v11, %v3372_v8  ;;  %v3637_v15 = vpop.f32.mrb[35].mxu0 }
 0x55b   :  { %v5267_v17 = vadd.f32 %v3637_v15, %v3636_v40 }
 0x55c   :  { %v1981_v47 = vadd.f32 %v3374_v0, %v1823_v48 }
 0x56d   :  { %v3407_v22 = vpop.f32.mrb[32].mxu1 }
 0x56e   :  { %v3408_v54 = vpop.f32.mrb[33].mxu1 }
 0x56f   :  { %v3409_v26 = vadd.f32 %v3408_v54, %v3407_v22 }
 0x571   :  { %v2135_v27 = vadd.f32 %v3409_v26, %v1978_v36  ;;  %v3410_v28 = vpop.f32.mrb[34].mxu1 }
 0x572   :  { %v3411_v31 = vpop.f32.mrb[35].mxu1 }
 0x573   :  { %v3412_v2 = vadd.f32 %v3411_v31, %v3410_v28  ;;  %v2292_v34 = vadd.f32 %v5245_v23, %v2135_v27  ;;  %v3218_v27 = vld [vmem:[#allocation17] ss:$0 sm:$0xff] }
 0x575   :  { %v2136_v35 = vadd.f32 %v3412_v2, %v1979_v6  ;;  %v3413_v37 = vpop.f32.mrb[36].mxu1 }
 0x576   :  { %v3414_v33 = vpop.f32.mrb[37].mxu1 }
 0x577   :  { %v3415_v38 = vadd.f32 %v3414_v33, %v3413_v37  ;;  %v2293_v39 = vadd.f32 %v5247_v63, %v2136_v35 }
 0x579   :  { %v2137_v3 = vadd.f32 %v3415_v38, %v1980_v46  ;;  %v3416_v5 = vpop.f32.mrb[38].mxu1 }
 0x57a   :  { %v3417_v30 = vpop.f32.mrb[39].mxu1 }
 0x57b   :  { %v3418_v7 = vadd.f32 %v3417_v30, %v3416_v5  ;;  %v2294_v42 = vadd.f32 %v5249_v13, %v2137_v3 }
 0x57d   :  { %v2138_v55 = vadd.f32 %v3418_v7, %v1981_v47 }
 0x57f   :  { %v2295_v14 = vadd.f32 %v5251_v20, %v2138_v55 }
 0x58d   :  { %v3495_v10 = vpop.f32.mrb[40].mxu1 }
 0x58e   :  { %v3496_v18 = vpop.f32.mrb[41].mxu1 }
 0x58f   :  { %v3497_v44 = vadd.f32 %v3496_v18, %v3495_v10  ;;  %v3219_v18 = vld [vmem:[#allocation20] ss:$0 sm:$0xff] }
 0x591   :  { %v2449_v48 = vadd.f32 %v3497_v44, %v2292_v34  ;;  %v3498_v23 = vpop.f32.mrb[42].mxu1 }
 0x592   :  { %v3499_v49 = vpop.f32.mrb[43].mxu1 }
 0x593   :  { %v3500_v50 = vadd.f32 %v3499_v49, %v3498_v23  ;;  %v2606_v51 = vadd.f32 %v5253_v29, %v2449_v48 }
 0x595   :  { %v2450_v24 = vadd.f32 %v3500_v50, %v2293_v39  ;;  %v3501_v63 = vpop.f32.mrb[44].mxu1 }
 0x596   :  { %v3502_v43 = vpop.f32.mrb[45].mxu1 }
 0x597   :  { %v3503_v36 = vadd.f32 %v3502_v43, %v3501_v63  ;;  %v2607_v53 = vadd.f32 %v5255_v41, %v2450_v24 }
 0x599   :  { %v2451_v12 = vadd.f32 %v3503_v36, %v2294_v42  ;;  %v3504_v13 = vpop.f32.mrb[46].mxu1 }
 0x59a   :  { %v3505_v1 = vpop.f32.mrb[47].mxu1 }
 0x59b   :  { %v3506_v21 = vadd.f32 %v3505_v1, %v3504_v13  ;;  %v2608_v20 = vadd.f32 %v5257_v16, %v2451_v12 }
 0x59d   :  { %v2452_v58 = vadd.f32 %v3506_v21, %v2295_v14 }
 0x59f   :  { %v2609_v6 = vadd.f32 %v5259_v52, %v2452_v58 }
 0x5ad   :  { %v3583_v56 = vpop.f32.mrb[48].mxu1 }
 0x5ae   :  { %v3584_v9 = vpop.f32.mrb[49].mxu1 }
 0x5af   :  { %v3585_v45 = vadd.f32 %v3584_v9, %v3583_v56 }
 0x5b1   :  { %v2763_v19 = vadd.f32 %v3585_v45, %v2606_v51  ;;  %v3586_v29 = vpop.f32.mrb[50].mxu1 }
 0x5b2   :  { %v3587_v61 = vpop.f32.mrb[51].mxu1 }
 0x5b3   :  { %v3588_v59 = vadd.f32 %v3587_v61, %v3586_v29  ;;  %v2887_v62 = vadd.f32 %v5261_v32, %v2763_v19 }
 0x5b5   :  { %v2764_v60 = vadd.f32 %v3588_v59, %v2607_v53  ;;  %v3589_v41 = vpop.f32.mrb[52].mxu1 }
 0x5b6   :  { %v3590_v46 = vpop.f32.mrb[53].mxu1 }
 0x5b7   :  { %v3591_v8 = vadd.f32 %v3590_v46, %v3589_v41  ;;  %v2888_v11 = vadd.f32 %v5263_v57, %v2764_v60 }
 0x5b9   :  { %v2765_v40 = vadd.f32 %v3591_v8, %v2608_v20  ;;  %v3592_v16 = vpop.f32.mrb[54].mxu1 }
 0x5ba   :  { %v3593_v0 = vpop.f32.mrb[55].mxu1 }
 0x5bb   :  { %v3594_v15 = vadd.f32 %v3593_v0, %v3592_v16  ;;  %v2889_v52 = vadd.f32 %v5265_v4, %v2765_v40 }
 0x5bd   :  { %v2766_v47 = vadd.f32 %v3594_v15, %v2609_v6 }
 0x5bf   :  { %v2890_v25 = vadd.f32 %v5267_v17, %v2766_v47 }
 0x5cd   :  { %v3671_v22 = vpop.f32.mrb[56].mxu1 }
 0x5ce   :  { %v3672_v54 = vpop.f32.mrb[57].mxu1 }
 0x5cf   :  { %v3673_v26 = vadd.f32 %v3672_v54, %v3671_v22 }
 0x5d1   :  { %v3055_v32 = vadd.f32 %v3673_v26, %v2887_v62  ;;  %v3674_v28 = vpop.f32.mrb[58].mxu1 }
 0x5d2   :  { %v3675_v31 = vpop.f32.mrb[59].mxu1 }
 0x5d3   :  { %v3066_v2 = vadd.f32 %v3218_v27, %v3055_v32  ;;  %v3676_v34 = vadd.f32 %v3675_v31, %v3674_v28 }
 0x5d5   :  { %v3070_v57 = vmax.f32 %v3066_v2, 0.0  ;;  %v3056_v35 = vadd.f32 %v3676_v34, %v2888_v11  ;;  %v3677_v37 = vpop.f32.mrb[60].mxu1 }
 0x5d6   :  { %v3678_v33 = vpop.f32.mrb[61].mxu1 }
 0x5d7   :  { %v3067_v38 = vadd.f32 %v3218_v27, %v3056_v35  ;;  %v3679_v39 = vadd.f32 %v3678_v33, %v3677_v37  ;;  %3726 = vmatprep.mubr.msk.f32.mxu0 %vm3084_vm8, %v3070_v57 }
 0x5d9   :  { %v3071_v4 = vmax.f32 %v3067_v38, 0.0  ;;  %v3057_v17 = vadd.f32 %v3679_v39, %v2889_v52  ;;  %v3680_v3 = vpop.f32.mrb[62].mxu1 }
 0x5da   :  { %v3681_v5 = vpop.f32.mrb[63].mxu1 }
 0x5db   :  { %v3068_v30 = vadd.f32 %v3218_v27, %v3057_v17  ;;  %v3682_v7 = vadd.f32 %v3681_v5, %v3680_v3  ;;  %3727 = vmatmul.mubr.msk.f32.vlgmr.msra.gmra.mrb[36].mxu0 %vm3084_vm8, %v3071_v4 }
 0x5dd   :  { %v3072_v42 = vmax.f32 %v3068_v30, 0.0  ;;  %v3058_v55 = vadd.f32 %v3682_v7, %v2890_v25 }
 0x5df   :  { %v3069_v14 = vadd.f32 %v3218_v27, %v3058_v55  ;;  %3729 = vmatprep.mubr.msk.f32.mxu0 %vm3084_vm8, %v3072_v42 }
 0x5e1   :  { %v3073_v10 = vmax.f32 %v3069_v14, 0.0 }
 0x5e3   :  { %3730 = vmatmul.mubr.msk.f32.gmra.mrb[38].mxu0 %vm3084_vm8, %v3073_v10 }
 0x6ae   :  { %v3728_v44 = vpop.f32.mrb[36].mxu0 }
 0x6af   :  { %v3166_v48 = vpop.f32.mrb[37].mxu0 }
 0x6b0   :  { %v3167_v23 = vadd.f32 %v3219_v18, %v3166_v48 }
 0x6b2   :  { %3183 = vst [vmem:[#allocation22] sm:$0x1] %v3167_v23 }
 0x6b6   :  { %v3731_v49 = vpop.f32.mrb[38].mxu0 }
 0x6b7   :  { %v3175_v50 = vpop.f32.mrb[39].mxu0 }
 0x6b8   :  { %v3176_v51 = vadd.f32 %v3219_v18, %v3175_v50 }
 0x6ba   :  { %3184 = vst [vmem:[#allocation22 + $0x1] sm:$0x1] %v3176_v51 }
 0x6bb   :  { %4650 = shalt.err (!%p4647_p0)
}
 0x6bc   :  { %s4651_s8 = scalar_lea.hbm %s5310_s11, 32 }
 0x6bd   :  { %p4652_p1 = scmp.ne.s32.totalorder %s5310_s11, %s4651_s8  ;;  %p4655_p2 = scmp.lt.u32.totalorder %s4651_s8, %s5310_s11 }
 0x6bf   :  { %p4657_p3 = pnand %p4655_p2, %p4652_p1 }
 0x6c1   :  { %4660 = shalt.err (!%p4657_p3)
}
 0x6c2   :  { %3194 = dma.vmem_to_hbm [thread:$0]  %s3192_s29, 32, %s5310_s11, [#allocation7]  }
 0x6c3   :  { %4673 = dma.done.wait [#allocation7], 32  }
 0x6c4   :  { %4674 = vsyncadd [#allocation7], 4294967264 }
 0x6c5   :  { %3198 = vsyncpa [#allocation6], 1 }
 0x6c6   :  { %3199 = vsyncpa [#allocation9], 1 }
 0x6c7   :  { %3200 = vsyncpa [#allocation12], 1 }
 0x6c8   :  { %3201 = vsyncpa [#allocation15], 1 }
 0x6c9   :  { %3202 = vsyncpa [#allocation18], 1 }
 0x6ca   :  { %3203 = vsyncpa [#allocation21], 1 }
 0x6cb   :  { %3204 = vsyncpa [#allocation7], 1 }

</bundles_post_ra>
